<compile_context>
chip_gen: v6e
topology: v6e:2x2x1
jax: 0.10.0
libtpu: 0.0.40
codegen_flags: <defaults>
</compile_context>

<pallas_src>
import math
from functools import partial

import jax
import jax.numpy as jnp
from jax.experimental import pallas as pl
from jax.experimental.pallas import tpu as pltpu


# ----------------------------------------------------------------------------
# Pallas kernel: out = act( A @ B + bias [+ R | + A2 @ B2] )
# A:(tm,K) bf16  B:(K,N) bf16  bias:(1,N) f32  R:(tm,N) f32  A2:(tm,K2) B2:(K2,N)
# Output block (tm, N) f32 is lane-dense over the full channel width.
# ----------------------------------------------------------------------------
def _fused_mm_kernel(*refs, act, mode):
    if mode == 'plain':
        a_ref, b_ref, bias_ref, o_ref = refs
    elif mode == 'res':
        a_ref, b_ref, bias_ref, r_ref, o_ref = refs
    else:  # 'res_mm' : second matmul fused in (point_conv2 + shortcut conv)
        a_ref, b_ref, bias_ref, a2_ref, b2_ref, o_ref = refs

    out = jnp.dot(a_ref[...], b_ref[...], preferred_element_type=jnp.float32)
    out = out + bias_ref[...]
    if mode == 'res':
        out = out + r_ref[...]
    elif mode == 'res_mm':
        out = out + jnp.dot(a2_ref[...], b2_ref[...], preferred_element_type=jnp.float32)
    if act == 'relu':
        out = jnp.maximum(out, 0.0)
    o_ref[...] = out.astype(o_ref.dtype)


def _pick_tm(m):
    # Row tile: keep (8,128)-legal tiles; split only when M is large enough to be
    # worth distributing across TensorCores (v7x megacore). Otherwise full extent.
    if m > 256 and m % 256 == 0:
        return 256
    return m


def fused_matmul(a, b, bias, *, act='none', residual=None, a2=None, b2=None):
    """act( a @ b + bias [+ residual | + a2 @ b2] ) -> (M, N) f32."""
    m, k = a.shape
    n = b.shape[1]
    tm = _pick_tm(m)
    bias2d = bias.reshape(1, n)

    in_specs = [
        pl.BlockSpec((tm, k), lambda i: (i, 0)),
        pl.BlockSpec((k, n), lambda i: (0, 0)),
        pl.BlockSpec((1, n), lambda i: (0, 0)),
    ]
    args = [a, b, bias2d]
    if residual is not None:
        mode = 'res'
        in_specs.append(pl.BlockSpec((tm, n), lambda i: (i, 0)))
        args.append(residual)
    elif a2 is not None:
        mode = 'res_mm'
        k2 = a2.shape[1]
        in_specs.append(pl.BlockSpec((tm, k2), lambda i: (i, 0)))
        in_specs.append(pl.BlockSpec((k2, n), lambda i: (0, 0)))
        args += [a2, b2]
    else:
        mode = 'plain'

    return pl.pallas_call(
        partial(_fused_mm_kernel, act=act, mode=mode),
        out_shape=jax.ShapeDtypeStruct((m, n), jnp.float32),
        grid=(m // tm,),
        in_specs=in_specs,
        out_specs=pl.BlockSpec((tm, n), lambda i: (i, 0)),
        compiler_params=pltpu.CompilerParams(dimension_semantics=("parallel",)),
    )(*args)


# ----------------------------------------------------------------------------
# im2col glue (bf16 patches).
# TODO(synk): patch extraction stays as JAX glue; fusing it into the kernel via
# memory_space=pl.ANY + manual windowed DMA is the remaining HBM-traffic win.
# ----------------------------------------------------------------------------
def _im2col(x, k, stride, pad):
    """x:(N,H,W,C) -> patches (N,Ho,Wo,k*k,C); column order (kh, kw, cin)."""
    if pad:
        x = jnp.pad(x, ((0, 0), (pad, pad), (pad, pad), (0, 0)))
    n, hp, wp, c = x.shape
    ho = (hp - k) // stride + 1
    wo = (wp - k) // stride + 1
    cols = []
    for i in range(k):
        for j in range(k):
            cols.append(x[:, i:i + stride * ho:stride, j:j + stride * wo:stride, :])
    return jnp.stack(cols, axis=3), ho, wo


def conv_kxk(x, w_bd, bias, *, k, stride, act):
    """k x k conv (grouped via block-diagonal weight) + folded BN + act.
    x:(N,H,W,Cin) f32 -> (N,Ho,Wo,Cout) f32."""
    n = x.shape[0]
    if k == 1 and stride == 1:
        a = x.reshape(-1, x.shape[-1]).astype(jnp.bfloat16)
        ho, wo = x.shape[1], x.shape[2]
    else:
        patches, ho, wo = _im2col(x.astype(jnp.bfloat16), k, stride, k // 2)
        a = patches.reshape(n * ho * wo, -1)
    out = fused_matmul(a, w_bd, bias, act=act)
    return out.reshape(n, ho, wo, -1)


# ----------------------------------------------------------------------------
# BignasRegNet default architecture config
# ----------------------------------------------------------------------------
def get_same_length(element, depth):
    if len(element) == len(depth):
        out = []
        for e, d in zip(element, depth):
            out += [e] * d
        return out
    return list(element)


OUT_CHANNEL = [8, 8, 16, 48, 224]
DEPTH = [1, 2, 2, 1, 2]
KERNEL_SIZE = get_same_length([7, 3, 3, 3, 3], DEPTH)
EXPAND = get_same_length([0, 1, 1, 1, 1], DEPTH)
GROUP_WIDTH = get_same_length([8, 8, 8, 8, 8], DEPTH)
STRIDES = [2, 2, 2, 2, 2]
NUM_CLASSES = 1000
NUM_CLASSES_PAD = 1024  # padded for full-lane (128-multiple) stores


def make_divisible(v, divisor=8, min_val=None):
    if min_val is None:
        min_val = divisor
    new_v = max(min_val, int(v + divisor / 2) // divisor * divisor)
    if new_v < 0.9 * v:
        new_v += divisor
    return new_v


def build_block_cfgs():
    cfgs = []
    input_channel = OUT_CHANNEL[0]
    stage_num = 1
    block_idx = 1
    for s, n_block in zip(STRIDES[1:], DEPTH[1:]):
        oc = OUT_CHANNEL[stage_num]
        stage_num += 1
        for i in range(n_block):
            k = KERNEL_SIZE[block_idx]
            e = EXPAND[block_idx]
            gw = GROUP_WIDTH[stage_num]  # mirrors original indexing (all values == 8)
            block_idx += 1
            stride = s if i == 0 else 1
            mid = make_divisible(round(oc * e), 8)
            cfgs.append(dict(cin=input_channel, cout=oc, k=k, mid=mid,
                             groups=mid // gw, stride=stride,
                             has_sc=not (input_channel == oc and stride == 1)))
            input_channel = oc
    return cfgs, input_channel


BLOCK_CFGS, LAST_CHANNEL = build_block_cfgs()


# ----------------------------------------------------------------------------
# Deterministic synthetic parameters: msra-like conv weights, eval-mode BN folded.
# Grouped weights are expanded offline to a block-diagonal (k*k*Cin, Cout) matrix
# with BN scale multiplied in; kernels only see bf16 weight + f32 bias.
# ----------------------------------------------------------------------------
def _conv_params(key, k, cin, cout, groups, eps=1e-5):
    kw, k1, k2, k3, k4 = jax.random.split(key, 5)
    cpg = cin // groups
    cout_pg = cout // groups
    std = math.sqrt(2.0 / (k * k * cout_pg))  # msra / kaiming (fan_out)
    wg = std * jax.random.normal(kw, (groups, k, k, cpg, cout_pg), jnp.float32)

    gamma = 1.0 + 0.1 * jax.random.normal(k1, (cout,), jnp.float32)
    beta = 0.1 * jax.random.normal(k2, (cout,), jnp.float32)
    mean = 0.1 * jax.random.normal(k3, (cout,), jnp.float32)
    var = 1.0 + 0.1 * jax.random.uniform(k4, (cout,), jnp.float32)
    scale = gamma / jnp.sqrt(var + eps)
    bias = beta - mean * scale

    # block-diagonal expansion: rows ordered (kh, kw, cin_global), cols cout_global
    eye = jnp.eye(groups, dtype=jnp.float32)
    w_bd = jnp.einsum('gijco,gh->ijgcho', wg, eye).reshape(k * k * cin, cout)
    w_bd = w_bd * scale[None, :]                      # fold BN scale into weights
    return w_bd.astype(jnp.bfloat16), bias


def build_params(key):
    keys = iter(jax.random.split(key, 64))
    params = {'first': _conv_params(next(keys), 7, 3, OUT_CHANNEL[0], 1), 'blocks': []}
    for cfg in BLOCK_CFGS:
        bp = {
            'pc1': _conv_params(next(keys), 1, cfg['cin'], cfg['mid'], 1),
            'nc': _conv_params(next(keys), cfg['k'], cfg['mid'], cfg['mid'], cfg['groups']),
            'pc2': _conv_params(next(keys), 1, cfg['mid'], cfg['cout'], 1),
        }
        if cfg['has_sc']:
            bp['sc'] = _conv_params(next(keys), 1, cfg['cin'], cfg['cout'], 1)
        params['blocks'].append(bp)
    kw, kb = jax.random.split(next(keys))
    w = 0.01 * jax.random.normal(kw, (LAST_CHANNEL, NUM_CLASSES), jnp.float32)
    b = 0.01 * jax.random.normal(kb, (NUM_CLASSES,), jnp.float32)
    params['cls_w'] = (jnp.zeros((LAST_CHANNEL, NUM_CLASSES_PAD), jnp.float32)
                       .at[:, :NUM_CLASSES].set(w).astype(jnp.bfloat16))
    params['cls_b'] = jnp.zeros((NUM_CLASSES_PAD,), jnp.float32).at[:NUM_CLASSES].set(b)
    return params


# ----------------------------------------------------------------------------
# Forward pass (task='classification')
# TODO(synk): whole-block fusion (pc1 -> grouped nc -> pc2 in one pallas_call with
# VMEM-resident intermediates) left for a follow-up; stride/padding of the grouped
# conv would need in-kernel windowing.
# ----------------------------------------------------------------------------
def forward(params, x_nchw):
    x = jnp.transpose(x_nchw, (0, 2, 3, 1)).astype(jnp.float32)  # NCHW -> NHWC
    n = x.shape[0]

    # first_conv: 7x7 s2 + folded BN + ReLU
    x = conv_kxk(x, *params['first'], k=7, stride=STRIDES[0], act='relu')

    # RegBottleneckBlocks
    for cfg, bp in zip(BLOCK_CFGS, params['blocks']):
        identity = x
        # point_conv1: 1x1 + BN + ReLU
        y = conv_kxk(x, *bp['pc1'], k=1, stride=1, act='relu')
        # normal_conv: kxk grouped (block-diagonal weight) + BN + ReLU
        y = conv_kxk(y, *bp['nc'], k=cfg['k'], stride=cfg['stride'], act='relu')
        _, ho, wo, _ = y.shape
        m = n * ho * wo
        yf = y.reshape(m, cfg['mid']).astype(jnp.bfloat16)

        w2, b2 = bp['pc2']
        if cfg['has_sc']:
            # point_conv2 + shortcut 1x1 conv + residual add + ReLU in ONE kernel.
            ws, bs = bp['sc']
            xs = identity[:, ::cfg['stride'], ::cfg['stride'], :]
            a2 = xs.reshape(m, cfg['cin']).astype(jnp.bfloat16)
            out = fused_matmul(yf, w2, b2 + bs, a2=a2, b2=ws, act='relu')
        else:
            # point_conv2 + identity residual + ReLU in ONE kernel.
            res = identity.reshape(m, cfg['cout'])
            out = fused_matmul(yf, w2, b2, residual=res, act='relu')
        x = out.reshape(n, ho, wo, cfg['cout'])

    # classification head: global avg pool -> dropout(eval: identity) -> linear
    # TODO(synk): dropout_rate=0.1 is identity at inference; training-mode dropout/BN not modeled.
    pooled = jnp.mean(x, axis=(1, 2)).astype(jnp.bfloat16)       # (N, 224)
    logits = fused_matmul(pooled, params['cls_w'], params['cls_b'], act='none')
    return logits[:, :NUM_CLASSES]


if __name__ == "__main__":
    x = jax.random.normal(jax.random.PRNGKey(0), (2, 3, 32, 32), jnp.float32)  # NCHW like PyTorch
    params = build_params(jax.random.PRNGKey(1))
    logits = jax.jit(forward)(params, x)
    jax.block_until_ready(logits)
    assert logits.shape == (2, NUM_CLASSES)
    assert bool(jnp.all(jnp.isfinite(logits)))
    print("KERNEL_OK")
</pallas_src>

<mosaic_0001>
module attributes {stable_mosaic.version = 11 : i64} {
  func.func @_fused_mm_kernel(%arg0: i32, %arg1: memref<256x147xbf16, #tpu.memory_space<vmem>>, %arg2: memref<147x8xbf16, #tpu.memory_space<vmem>>, %arg3: memref<1x8xf32, #tpu.memory_space<vmem>>, %arg4: memref<256x8xf32, #tpu.memory_space<vmem>>) attributes {dimension_semantics = [#tpu.dimension_semantics<parallel>], iteration_bounds = array<i64: 2>, scalar_prefetch = 0 : i64, scratch_operands = 0 : i64, tpu.core_type = #tpu.core_type<tc>, window_params = [{transform_indices = @transform_0, window_bounds = array<i64: 256, 147>}, {pipeline_mode = #tpu.pipeline_mode<synchronous>, transform_indices = @transform_1, window_bounds = array<i64: 147, 8>}, {pipeline_mode = #tpu.pipeline_mode<synchronous>, transform_indices = @transform_2, window_bounds = array<i64: 1, 8>}, {transform_indices = @transform_3, window_bounds = array<i64: 256, 8>}]} {
    %c0 = arith.constant 0 : index
    %c0_0 = arith.constant 0 : index
    %0 = vector.load %arg1[%c0, %c0_0] : memref<256x147xbf16, #tpu.memory_space<vmem>>, vector<256x147xbf16>
    %c0_1 = arith.constant 0 : index
    %c0_2 = arith.constant 0 : index
    %1 = vector.load %arg2[%c0_1, %c0_2] : memref<147x8xbf16, #tpu.memory_space<vmem>>, vector<147x8xbf16>
    %cst = arith.constant dense<0.000000e+00> : vector<256x8xf32>
    %2 = tpu.matmul %0, %1, %cst {dimension_numbers = #tpu.dot_dimension_numbers<[1], [0], [0], [1], [0, 0, 1, 1], [], []>} : vector<256x147xbf16>, vector<147x8xbf16>, vector<256x8xf32> -> vector<256x8xf32>
    %c0_3 = arith.constant 0 : index
    %c0_4 = arith.constant 0 : index
    %3 = vector.load %arg3[%c0_3, %c0_4] : memref<1x8xf32, #tpu.memory_space<vmem>>, vector<1x8xf32>
    %4 = vector.broadcast %3 : vector<1x8xf32> to vector<256x8xf32>
    %5 = arith.addf %2, %4 : vector<256x8xf32>
    %cst_5 = arith.constant 0.000000e+00 : f32
    %6 = vector.broadcast %cst_5 : f32 to vector<256x8xf32>
    %7 = arith.maximumf %5, %6 : vector<256x8xf32>
    %c0_6 = arith.constant 0 : index
    %c0_7 = arith.constant 0 : index
    %8 = vector.load %arg4[%c0_6, %c0_7] : memref<256x8xf32, #tpu.memory_space<vmem>>, vector<256x8xf32>
    tpu.vector_store %arg4[%c0_6, %c0_7], %7 {strides = array<i32>} : memref<256x8xf32, #tpu.memory_space<vmem>>, vector<256x8xf32>,
    return
  }
  func.func @transform_0(%arg0: i32) -> (i32, i32) {
    %c0_i32 = arith.constant 0 : i32
    %c0_i32_0 = arith.constant 0 : i32
    return %arg0, %c0_i32 : i32, i32
  }
  func.func @transform_1(%arg0: i32) -> (i32, i32) {
    %c0_i32 = arith.constant 0 : i32
    %c0_i32_0 = arith.constant 0 : i32
    %c0_i32_1 = arith.constant 0 : i32
    return %c0_i32, %c0_i32_0 : i32, i32
  }
  func.func @transform_2(%arg0: i32) -> (i32, i32) {
    %c0_i32 = arith.constant 0 : i32
    %c0_i32_0 = arith.constant 0 : i32
    %c0_i32_1 = arith.constant 0 : i32
    return %c0_i32, %c0_i32_0 : i32, i32
  }
  func.func @transform_3(%arg0: i32) -> (i32, i32) {
    %c0_i32 = arith.constant 0 : i32
    %c0_i32_0 = arith.constant 0 : i32
    return %arg0, %c0_i32 : i32, i32
  }
}

module attributes {stable_mosaic.version = 11 : i64} {
  func.func @_fused_mm_kernel(%arg0: i32, %arg1: memref<256x8xbf16, #tpu.memory_space<vmem>>, %arg2: memref<8x8xbf16, #tpu.memory_space<vmem>>, %arg3: memref<1x8xf32, #tpu.memory_space<vmem>>, %arg4: memref<256x8xf32, #tpu.memory_space<vmem>>) attributes {dimension_semantics = [#tpu.dimension_semantics<parallel>], iteration_bounds = array<i64: 2>, scalar_prefetch = 0 : i64, scratch_operands = 0 : i64, tpu.core_type = #tpu.core_type<tc>, window_params = [{transform_indices = @transform_0, window_bounds = array<i64: 256, 8>}, {pipeline_mode = #tpu.pipeline_mode<synchronous>, transform_indices = @transform_1, window_bounds = array<i64: 8, 8>}, {pipeline_mode = #tpu.pipeline_mode<synchronous>, transform_indices = @transform_2, window_bounds = array<i64: 1, 8>}, {transform_indices = @transform_3, window_bounds = array<i64: 256, 8>}]} {
    %c0 = arith.constant 0 : index
    %c0_0 = arith.constant 0 : index
    %0 = vector.load %arg1[%c0, %c0_0] : memref<256x8xbf16, #tpu.memory_space<vmem>>, vector<256x8xbf16>
    %c0_1 = arith.constant 0 : index
    %c0_2 = arith.constant 0 : index
    %1 = vector.load %arg2[%c0_1, %c0_2] : memref<8x8xbf16, #tpu.memory_space<vmem>>, vector<8x8xbf16>
    %cst = arith.constant dense<0.000000e+00> : vector<256x8xf32>
    %2 = tpu.matmul %0, %1, %cst {dimension_numbers = #tpu.dot_dimension_numbers<[1], [0], [0], [1], [0, 0, 1, 1], [], []>} : vector<256x8xbf16>, vector<8x8xbf16>, vector<256x8xf32> -> vector<256x8xf32>
    %c0_3 = arith.constant 0 : index
    %c0_4 = arith.constant 0 : index
    %3 = vector.load %arg3[%c0_3, %c0_4] : memref<1x8xf32, #tpu.memory_space<vmem>>, vector<1x8xf32>
    %4 = vector.broadcast %3 : vector<1x8xf32> to vector<256x8xf32>
    %5 = arith.addf %2, %4 : vector<256x8xf32>
    %cst_5 = arith.constant 0.000000e+00 : f32
    %6 = vector.broadcast %cst_5 : f32 to vector<256x8xf32>
    %7 = arith.maximumf %5, %6 : vector<256x8xf32>
    %c0_6 = arith.constant 0 : index
    %c0_7 = arith.constant 0 : index
    %8 = vector.load %arg4[%c0_6, %c0_7] : memref<256x8xf32, #tpu.memory_space<vmem>>, vector<256x8xf32>
    tpu.vector_store %arg4[%c0_6, %c0_7], %7 {strides = array<i32>} : memref<256x8xf32, #tpu.memory_space<vmem>>, vector<256x8xf32>,
    return
  }
  func.func @transform_0(%arg0: i32) -> (i32, i32) {
    %c0_i32 = arith.constant 0 : i32
    %c0_i32_0 = arith.constant 0 : i32
    return %arg0, %c0_i32 : i32, i32
  }
  func.func @transform_1(%arg0: i32) -> (i32, i32) {
    %c0_i32 = arith.constant 0 : i32
    %c0_i32_0 = arith.constant 0 : i32
    %c0_i32_1 = arith.constant 0 : i32
    return %c0_i32, %c0_i32_0 : i32, i32
  }
  func.func @transform_2(%arg0: i32) -> (i32, i32) {
    %c0_i32 = arith.constant 0 : i32
    %c0_i32_0 = arith.constant 0 : i32
    %c0_i32_1 = arith.constant 0 : i32
    return %c0_i32, %c0_i32_0 : i32, i32
  }
  func.func @transform_3(%arg0: i32) -> (i32, i32) {
    %c0_i32 = arith.constant 0 : i32
    %c0_i32_0 = arith.constant 0 : i32
    return %arg0, %c0_i32 : i32, i32
  }
}

module attributes {stable_mosaic.version = 11 : i64} {
  func.func @_fused_mm_kernel(%arg0: i32, %arg1: memref<128x72xbf16, #tpu.memory_space<vmem>>, %arg2: memref<72x8xbf16, #tpu.memory_space<vmem>>, %arg3: memref<1x8xf32, #tpu.memory_space<vmem>>, %arg4: memref<128x8xf32, #tpu.memory_space<vmem>>) attributes {dimension_semantics = [#tpu.dimension_semantics<parallel>], iteration_bounds = array<i64: 1>, scalar_prefetch = 0 : i64, scratch_operands = 0 : i64, tpu.core_type = #tpu.core_type<tc>, window_params = [{transform_indices = @transform_0, window_bounds = array<i64: 128, 72>}, {pipeline_mode = #tpu.pipeline_mode<synchronous>, transform_indices = @transform_1, window_bounds = array<i64: 72, 8>}, {pipeline_mode = #tpu.pipeline_mode<synchronous>, transform_indices = @transform_2, window_bounds = array<i64: 1, 8>}, {transform_indices = @transform_3, window_bounds = array<i64: 128, 8>}]} {
    %c0 = arith.constant 0 : index
    %c0_0 = arith.constant 0 : index
    %0 = vector.load %arg1[%c0, %c0_0] : memref<128x72xbf16, #tpu.memory_space<vmem>>, vector<128x72xbf16>
    %c0_1 = arith.constant 0 : index
    %c0_2 = arith.constant 0 : index
    %1 = vector.load %arg2[%c0_1, %c0_2] : memref<72x8xbf16, #tpu.memory_space<vmem>>, vector<72x8xbf16>
    %cst = arith.constant dense<0.000000e+00> : vector<128x8xf32>
    %2 = tpu.matmul %0, %1, %cst {dimension_numbers = #tpu.dot_dimension_numbers<[1], [0], [0], [1], [0, 0, 1, 1], [], []>} : vector<128x72xbf16>, vector<72x8xbf16>, vector<128x8xf32> -> vector<128x8xf32>
    %c0_3 = arith.constant 0 : index
    %c0_4 = arith.constant 0 : index
    %3 = vector.load %arg3[%c0_3, %c0_4] : memref<1x8xf32, #tpu.memory_space<vmem>>, vector<1x8xf32>
    %4 = vector.broadcast %3 : vector<1x8xf32> to vector<128x8xf32>
    %5 = arith.addf %2, %4 : vector<128x8xf32>
    %cst_5 = arith.constant 0.000000e+00 : f32
    %6 = vector.broadcast %cst_5 : f32 to vector<128x8xf32>
    %7 = arith.maximumf %5, %6 : vector<128x8xf32>
    %c0_6 = arith.constant 0 : index
    %c0_7 = arith.constant 0 : index
    %8 = vector.load %arg4[%c0_6, %c0_7] : memref<128x8xf32, #tpu.memory_space<vmem>>, vector<128x8xf32>
    tpu.vector_store %arg4[%c0_6, %c0_7], %7 {strides = array<i32>} : memref<128x8xf32, #tpu.memory_space<vmem>>, vector<128x8xf32>,
    return
  }
  func.func @transform_0(%arg0: i32) -> (i32, i32) {
    %c0_i32 = arith.constant 0 : i32
    %c0_i32_0 = arith.constant 0 : i32
    return %arg0, %c0_i32 : i32, i32
  }
  func.func @transform_1(%arg0: i32) -> (i32, i32) {
    %c0_i32 = arith.constant 0 : i32
    %c0_i32_0 = arith.constant 0 : i32
    %c0_i32_1 = arith.constant 0 : i32
    return %c0_i32, %c0_i32_0 : i32, i32
  }
  func.func @transform_2(%arg0: i32) -> (i32, i32) {
    %c0_i32 = arith.constant 0 : i32
    %c0_i32_0 = arith.constant 0 : i32
    %c0_i32_1 = arith.constant 0 : i32
    return %c0_i32, %c0_i32_0 : i32, i32
  }
  func.func @transform_3(%arg0: i32) -> (i32, i32) {
    %c0_i32 = arith.constant 0 : i32
    %c0_i32_0 = arith.constant 0 : i32
    return %arg0, %c0_i32 : i32, i32
  }
}

module attributes {stable_mosaic.version = 11 : i64} {
  func.func @_fused_mm_kernel(%arg0: i32, %arg1: memref<128x8xbf16, #tpu.memory_space<vmem>>, %arg2: memref<8x8xbf16, #tpu.memory_space<vmem>>, %arg3: memref<1x8xf32, #tpu.memory_space<vmem>>, %arg4: memref<128x8xbf16, #tpu.memory_space<vmem>>, %arg5: memref<8x8xbf16, #tpu.memory_space<vmem>>, %arg6: memref<128x8xf32, #tpu.memory_space<vmem>>) attributes {dimension_semantics = [#tpu.dimension_semantics<parallel>], iteration_bounds = array<i64: 1>, scalar_prefetch = 0 : i64, scratch_operands = 0 : i64, tpu.core_type = #tpu.core_type<tc>, window_params = [{transform_indices = @transform_0, window_bounds = array<i64: 128, 8>}, {pipeline_mode = #tpu.pipeline_mode<synchronous>, transform_indices = @transform_1, window_bounds = array<i64: 8, 8>}, {pipeline_mode = #tpu.pipeline_mode<synchronous>, transform_indices = @transform_2, window_bounds = array<i64: 1, 8>}, {transform_indices = @transform_3, window_bounds = array<i64: 128, 8>}, {pipeline_mode = #tpu.pipeline_mode<synchronous>, transform_indices = @transform_4, window_bounds = array<i64: 8, 8>}, {transform_indices = @transform_5, window_bounds = array<i64: 128, 8>}]} {
    %c0 = arith.constant 0 : index
    %c0_0 = arith.constant 0 : index
    %0 = vector.load %arg1[%c0, %c0_0] : memref<128x8xbf16, #tpu.memory_space<vmem>>, vector<128x8xbf16>
    %c0_1 = arith.constant 0 : index
    %c0_2 = arith.constant 0 : index
    %1 = vector.load %arg2[%c0_1, %c0_2] : memref<8x8xbf16, #tpu.memory_space<vmem>>, vector<8x8xbf16>
    %cst = arith.constant dense<0.000000e+00> : vector<128x8xf32>
    %2 = tpu.matmul %0, %1, %cst {dimension_numbers = #tpu.dot_dimension_numbers<[1], [0], [0], [1], [0, 0, 1, 1], [], []>} : vector<128x8xbf16>, vector<8x8xbf16>, vector<128x8xf32> -> vector<128x8xf32>
    %c0_3 = arith.constant 0 : index
    %c0_4 = arith.constant 0 : index
    %3 = vector.load %arg3[%c0_3, %c0_4] : memref<1x8xf32, #tpu.memory_space<vmem>>, vector<1x8xf32>
    %4 = vector.broadcast %3 : vector<1x8xf32> to vector<128x8xf32>
    %5 = arith.addf %2, %4 : vector<128x8xf32>
    %c0_5 = arith.constant 0 : index
    %c0_6 = arith.constant 0 : index
    %6 = vector.load %arg4[%c0_5, %c0_6] : memref<128x8xbf16, #tpu.memory_space<vmem>>, vector<128x8xbf16>
    %c0_7 = arith.constant 0 : index
    %c0_8 = arith.constant 0 : index
    %7 = vector.load %arg5[%c0_7, %c0_8] : memref<8x8xbf16, #tpu.memory_space<vmem>>, vector<8x8xbf16>
    %cst_9 = arith.constant dense<0.000000e+00> : vector<128x8xf32>
    %8 = tpu.matmul %6, %7, %cst_9 {dimension_numbers = #tpu.dot_dimension_numbers<[1], [0], [0], [1], [0, 0, 1, 1], [], []>} : vector<128x8xbf16>, vector<8x8xbf16>, vector<128x8xf32> -> vector<128x8xf32>
    %9 = arith.addf %5, %8 : vector<128x8xf32>
    %cst_10 = arith.constant 0.000000e+00 : f32
    %10 = vector.broadcast %cst_10 : f32 to vector<128x8xf32>
    %11 = arith.maximumf %9, %10 : vector<128x8xf32>
    %c0_11 = arith.constant 0 : index
    %c0_12 = arith.constant 0 : index
    %12 = vector.load %arg6[%c0_11, %c0_12] : memref<128x8xf32, #tpu.memory_space<vmem>>, vector<128x8xf32>
    tpu.vector_store %arg6[%c0_11, %c0_12], %11 {strides = array<i32>} : memref<128x8xf32, #tpu.memory_space<vmem>>, vector<128x8xf32>,
    return
  }
  func.func @transform_0(%arg0: i32) -> (i32, i32) {
    %c0_i32 = arith.constant 0 : i32
    %c0_i32_0 = arith.constant 0 : i32
    return %arg0, %c0_i32 : i32, i32
  }
  func.func @transform_1(%arg0: i32) -> (i32, i32) {
    %c0_i32 = arith.constant 0 : i32
    %c0_i32_0 = arith.constant 0 : i32
    %c0_i32_1 = arith.constant 0 : i32
    return %c0_i32, %c0_i32_0 : i32, i32
  }
  func.func @transform_2(%arg0: i32) -> (i32, i32) {
    %c0_i32 = arith.constant 0 : i32
    %c0_i32_0 = arith.constant 0 : i32
    %c0_i32_1 = arith.constant 0 : i32
    return %c0_i32, %c0_i32_0 : i32, i32
  }
  func.func @transform_3(%arg0: i32) -> (i32, i32) {
    %c0_i32 = arith.constant 0 : i32
    %c0_i32_0 = arith.constant 0 : i32
    return %arg0, %c0_i32 : i32, i32
  }
  func.func @transform_4(%arg0: i32) -> (i32, i32) {
    %c0_i32 = arith.constant 0 : i32
    %c0_i32_0 = arith.constant 0 : i32
    %c0_i32_1 = arith.constant 0 : i32
    return %c0_i32, %c0_i32_0 : i32, i32
  }
  func.func @transform_5(%arg0: i32) -> (i32, i32) {
    %c0_i32 = arith.constant 0 : i32
    %c0_i32_0 = arith.constant 0 : i32
    return %arg0, %c0_i32 : i32, i32
  }
}

module attributes {stable_mosaic.version = 11 : i64} {
  func.func @_fused_mm_kernel(%arg0: i32, %arg1: memref<128x8xbf16, #tpu.memory_space<vmem>>, %arg2: memref<8x8xbf16, #tpu.memory_space<vmem>>, %arg3: memref<1x8xf32, #tpu.memory_space<vmem>>, %arg4: memref<128x8xf32, #tpu.memory_space<vmem>>) attributes {dimension_semantics = [#tpu.dimension_semantics<parallel>], iteration_bounds = array<i64: 1>, scalar_prefetch = 0 : i64, scratch_operands = 0 : i64, tpu.core_type = #tpu.core_type<tc>, window_params = [{transform_indices = @transform_0, window_bounds = array<i64: 128, 8>}, {pipeline_mode = #tpu.pipeline_mode<synchronous>, transform_indices = @transform_1, window_bounds = array<i64: 8, 8>}, {pipeline_mode = #tpu.pipeline_mode<synchronous>, transform_indices = @transform_2, window_bounds = array<i64: 1, 8>}, {transform_indices = @transform_3, window_bounds = array<i64: 128, 8>}]} {
    %c0 = arith.constant 0 : index
    %c0_0 = arith.constant 0 : index
    %0 = vector.load %arg1[%c0, %c0_0] : memref<128x8xbf16, #tpu.memory_space<vmem>>, vector<128x8xbf16>
    %c0_1 = arith.constant 0 : index
    %c0_2 = arith.constant 0 : index
    %1 = vector.load %arg2[%c0_1, %c0_2] : memref<8x8xbf16, #tpu.memory_space<vmem>>, vector<8x8xbf16>
    %cst = arith.constant dense<0.000000e+00> : vector<128x8xf32>
    %2 = tpu.matmul %0, %1, %cst {dimension_numbers = #tpu.dot_dimension_numbers<[1], [0], [0], [1], [0, 0, 1, 1], [], []>} : vector<128x8xbf16>, vector<8x8xbf16>, vector<128x8xf32> -> vector<128x8xf32>
    %c0_3 = arith.constant 0 : index
    %c0_4 = arith.constant 0 : index
    %3 = vector.load %arg3[%c0_3, %c0_4] : memref<1x8xf32, #tpu.memory_space<vmem>>, vector<1x8xf32>
    %4 = vector.broadcast %3 : vector<1x8xf32> to vector<128x8xf32>
    %5 = arith.addf %2, %4 : vector<128x8xf32>
    %cst_5 = arith.constant 0.000000e+00 : f32
    %6 = vector.broadcast %cst_5 : f32 to vector<128x8xf32>
    %7 = arith.maximumf %5, %6 : vector<128x8xf32>
    %c0_6 = arith.constant 0 : index
    %c0_7 = arith.constant 0 : index
    %8 = vector.load %arg4[%c0_6, %c0_7] : memref<128x8xf32, #tpu.memory_space<vmem>>, vector<128x8xf32>
    tpu.vector_store %arg4[%c0_6, %c0_7], %7 {strides = array<i32>} : memref<128x8xf32, #tpu.memory_space<vmem>>, vector<128x8xf32>,
    return
  }
  func.func @transform_0(%arg0: i32) -> (i32, i32) {
    %c0_i32 = arith.constant 0 : i32
    %c0_i32_0 = arith.constant 0 : i32
    return %arg0, %c0_i32 : i32, i32
  }
  func.func @transform_1(%arg0: i32) -> (i32, i32) {
    %c0_i32 = arith.constant 0 : i32
    %c0_i32_0 = arith.constant 0 : i32
    %c0_i32_1 = arith.constant 0 : i32
    return %c0_i32, %c0_i32_0 : i32, i32
  }
  func.func @transform_2(%arg0: i32) -> (i32, i32) {
    %c0_i32 = arith.constant 0 : i32
    %c0_i32_0 = arith.constant 0 : i32
    %c0_i32_1 = arith.constant 0 : i32
    return %c0_i32, %c0_i32_0 : i32, i32
  }
  func.func @transform_3(%arg0: i32) -> (i32, i32) {
    %c0_i32 = arith.constant 0 : i32
    %c0_i32_0 = arith.constant 0 : i32
    return %arg0, %c0_i32 : i32, i32
  }
}

module attributes {stable_mosaic.version = 11 : i64} {
  func.func @_fused_mm_kernel(%arg0: i32, %arg1: memref<128x8xbf16, #tpu.memory_space<vmem>>, %arg2: memref<8x8xbf16, #tpu.memory_space<vmem>>, %arg3: memref<1x8xf32, #tpu.memory_space<vmem>>, %arg4: memref<128x8xf32, #tpu.memory_space<vmem>>, %arg5: memref<128x8xf32, #tpu.memory_space<vmem>>) attributes {dimension_semantics = [#tpu.dimension_semantics<parallel>], iteration_bounds = array<i64: 1>, scalar_prefetch = 0 : i64, scratch_operands = 0 : i64, tpu.core_type = #tpu.core_type<tc>, window_params = [{transform_indices = @transform_0, window_bounds = array<i64: 128, 8>}, {pipeline_mode = #tpu.pipeline_mode<synchronous>, transform_indices = @transform_1, window_bounds = array<i64: 8, 8>}, {pipeline_mode = #tpu.pipeline_mode<synchronous>, transform_indices = @transform_2, window_bounds = array<i64: 1, 8>}, {transform_indices = @transform_3, window_bounds = array<i64: 128, 8>}, {transform_indices = @transform_4, window_bounds = array<i64: 128, 8>}]} {
    %c0 = arith.constant 0 : index
    %c0_0 = arith.constant 0 : index
    %0 = vector.load %arg1[%c0, %c0_0] : memref<128x8xbf16, #tpu.memory_space<vmem>>, vector<128x8xbf16>
    %c0_1 = arith.constant 0 : index
    %c0_2 = arith.constant 0 : index
    %1 = vector.load %arg2[%c0_1, %c0_2] : memref<8x8xbf16, #tpu.memory_space<vmem>>, vector<8x8xbf16>
    %cst = arith.constant dense<0.000000e+00> : vector<128x8xf32>
    %2 = tpu.matmul %0, %1, %cst {dimension_numbers = #tpu.dot_dimension_numbers<[1], [0], [0], [1], [0, 0, 1, 1], [], []>} : vector<128x8xbf16>, vector<8x8xbf16>, vector<128x8xf32> -> vector<128x8xf32>
    %c0_3 = arith.constant 0 : index
    %c0_4 = arith.constant 0 : index
    %3 = vector.load %arg3[%c0_3, %c0_4] : memref<1x8xf32, #tpu.memory_space<vmem>>, vector<1x8xf32>
    %4 = vector.broadcast %3 : vector<1x8xf32> to vector<128x8xf32>
    %5 = arith.addf %2, %4 : vector<128x8xf32>
    %c0_5 = arith.constant 0 : index
    %c0_6 = arith.constant 0 : index
    %6 = vector.load %arg4[%c0_5, %c0_6] : memref<128x8xf32, #tpu.memory_space<vmem>>, vector<128x8xf32>
    %7 = arith.addf %5, %6 : vector<128x8xf32>
    %cst_7 = arith.constant 0.000000e+00 : f32
    %8 = vector.broadcast %cst_7 : f32 to vector<128x8xf32>
    %9 = arith.maximumf %7, %8 : vector<128x8xf32>
    %c0_8 = arith.constant 0 : index
    %c0_9 = arith.constant 0 : index
    %10 = vector.load %arg5[%c0_8, %c0_9] : memref<128x8xf32, #tpu.memory_space<vmem>>, vector<128x8xf32>
    tpu.vector_store %arg5[%c0_8, %c0_9], %9 {strides = array<i32>} : memref<128x8xf32, #tpu.memory_space<vmem>>, vector<128x8xf32>,
    return
  }
  func.func @transform_0(%arg0: i32) -> (i32, i32) {
    %c0_i32 = arith.constant 0 : i32
    %c0_i32_0 = arith.constant 0 : i32
    return %arg0, %c0_i32 : i32, i32
  }
  func.func @transform_1(%arg0: i32) -> (i32, i32) {
    %c0_i32 = arith.constant 0 : i32
    %c0_i32_0 = arith.constant 0 : i32
    %c0_i32_1 = arith.constant 0 : i32
    return %c0_i32, %c0_i32_0 : i32, i32
  }
  func.func @transform_2(%arg0: i32) -> (i32, i32) {
    %c0_i32 = arith.constant 0 : i32
    %c0_i32_0 = arith.constant 0 : i32
    %c0_i32_1 = arith.constant 0 : i32
    return %c0_i32, %c0_i32_0 : i32, i32
  }
  func.func @transform_3(%arg0: i32) -> (i32, i32) {
    %c0_i32 = arith.constant 0 : i32
    %c0_i32_0 = arith.constant 0 : i32
    return %arg0, %c0_i32 : i32, i32
  }
  func.func @transform_4(%arg0: i32) -> (i32, i32) {
    %c0_i32 = arith.constant 0 : i32
    %c0_i32_0 = arith.constant 0 : i32
    return %arg0, %c0_i32 : i32, i32
  }
}

module attributes {stable_mosaic.version = 11 : i64} {
  func.func @_fused_mm_kernel(%arg0: i32, %arg1: memref<128x8xbf16, #tpu.memory_space<vmem>>, %arg2: memref<8x16xbf16, #tpu.memory_space<vmem>>, %arg3: memref<1x16xf32, #tpu.memory_space<vmem>>, %arg4: memref<128x16xf32, #tpu.memory_space<vmem>>) attributes {dimension_semantics = [#tpu.dimension_semantics<parallel>], iteration_bounds = array<i64: 1>, scalar_prefetch = 0 : i64, scratch_operands = 0 : i64, tpu.core_type = #tpu.core_type<tc>, window_params = [{transform_indices = @transform_0, window_bounds = array<i64: 128, 8>}, {pipeline_mode = #tpu.pipeline_mode<synchronous>, transform_indices = @transform_1, window_bounds = array<i64: 8, 16>}, {pipeline_mode = #tpu.pipeline_mode<synchronous>, transform_indices = @transform_2, window_bounds = array<i64: 1, 16>}, {transform_indices = @transform_3, window_bounds = array<i64: 128, 16>}]} {
    %c0 = arith.constant 0 : index
    %c0_0 = arith.constant 0 : index
    %0 = vector.load %arg1[%c0, %c0_0] : memref<128x8xbf16, #tpu.memory_space<vmem>>, vector<128x8xbf16>
    %c0_1 = arith.constant 0 : index
    %c0_2 = arith.constant 0 : index
    %1 = vector.load %arg2[%c0_1, %c0_2] : memref<8x16xbf16, #tpu.memory_space<vmem>>, vector<8x16xbf16>
    %cst = arith.constant dense<0.000000e+00> : vector<128x16xf32>
    %2 = tpu.matmul %0, %1, %cst {dimension_numbers = #tpu.dot_dimension_numbers<[1], [0], [0], [1], [0, 0, 1, 1], [], []>} : vector<128x8xbf16>, vector<8x16xbf16>, vector<128x16xf32> -> vector<128x16xf32>
    %c0_3 = arith.constant 0 : index
    %c0_4 = arith.constant 0 : index
    %3 = vector.load %arg3[%c0_3, %c0_4] : memref<1x16xf32, #tpu.memory_space<vmem>>, vector<1x16xf32>
    %4 = vector.broadcast %3 : vector<1x16xf32> to vector<128x16xf32>
    %5 = arith.addf %2, %4 : vector<128x16xf32>
    %cst_5 = arith.constant 0.000000e+00 : f32
    %6 = vector.broadcast %cst_5 : f32 to vector<128x16xf32>
    %7 = arith.maximumf %5, %6 : vector<128x16xf32>
    %c0_6 = arith.constant 0 : index
    %c0_7 = arith.constant 0 : index
    %8 = vector.load %arg4[%c0_6, %c0_7] : memref<128x16xf32, #tpu.memory_space<vmem>>, vector<128x16xf32>
    tpu.vector_store %arg4[%c0_6, %c0_7], %7 {strides = array<i32>} : memref<128x16xf32, #tpu.memory_space<vmem>>, vector<128x16xf32>,
    return
  }
  func.func @transform_0(%arg0: i32) -> (i32, i32) {
    %c0_i32 = arith.constant 0 : i32
    %c0_i32_0 = arith.constant 0 : i32
    return %arg0, %c0_i32 : i32, i32
  }
  func.func @transform_1(%arg0: i32) -> (i32, i32) {
    %c0_i32 = arith.constant 0 : i32
    %c0_i32_0 = arith.constant 0 : i32
    %c0_i32_1 = arith.constant 0 : i32
    return %c0_i32, %c0_i32_0 : i32, i32
  }
  func.func @transform_2(%arg0: i32) -> (i32, i32) {
    %c0_i32 = arith.constant 0 : i32
    %c0_i32_0 = arith.constant 0 : i32
    %c0_i32_1 = arith.constant 0 : i32
    return %c0_i32, %c0_i32_0 : i32, i32
  }
  func.func @transform_3(%arg0: i32) -> (i32, i32) {
    %c0_i32 = arith.constant 0 : i32
    %c0_i32_0 = arith.constant 0 : i32
    return %arg0, %c0_i32 : i32, i32
  }
}

module attributes {stable_mosaic.version = 11 : i64} {
  func.func @_fused_mm_kernel(%arg0: i32, %arg1: memref<32x144xbf16, #tpu.memory_space<vmem>>, %arg2: memref<144x16xbf16, #tpu.memory_space<vmem>>, %arg3: memref<1x16xf32, #tpu.memory_space<vmem>>, %arg4: memref<32x16xf32, #tpu.memory_space<vmem>>) attributes {dimension_semantics = [#tpu.dimension_semantics<parallel>], iteration_bounds = array<i64: 1>, scalar_prefetch = 0 : i64, scratch_operands = 0 : i64, tpu.core_type = #tpu.core_type<tc>, window_params = [{transform_indices = @transform_0, window_bounds = array<i64: 32, 144>}, {pipeline_mode = #tpu.pipeline_mode<synchronous>, transform_indices = @transform_1, window_bounds = array<i64: 144, 16>}, {pipeline_mode = #tpu.pipeline_mode<synchronous>, transform_indices = @transform_2, window_bounds = array<i64: 1, 16>}, {transform_indices = @transform_3, window_bounds = array<i64: 32, 16>}]} {
    %c0 = arith.constant 0 : index
    %c0_0 = arith.constant 0 : index
    %0 = vector.load %arg1[%c0, %c0_0] : memref<32x144xbf16, #tpu.memory_space<vmem>>, vector<32x144xbf16>
    %c0_1 = arith.constant 0 : index
    %c0_2 = arith.constant 0 : index
    %1 = vector.load %arg2[%c0_1, %c0_2] : memref<144x16xbf16, #tpu.memory_space<vmem>>, vector<144x16xbf16>
    %cst = arith.constant dense<0.000000e+00> : vector<32x16xf32>
    %2 = tpu.matmul %0, %1, %cst {dimension_numbers = #tpu.dot_dimension_numbers<[1], [0], [0], [1], [0, 0, 1, 1], [], []>} : vector<32x144xbf16>, vector<144x16xbf16>, vector<32x16xf32> -> vector<32x16xf32>
    %c0_3 = arith.constant 0 : index
    %c0_4 = arith.constant 0 : index
    %3 = vector.load %arg3[%c0_3, %c0_4] : memref<1x16xf32, #tpu.memory_space<vmem>>, vector<1x16xf32>
    %4 = vector.broadcast %3 : vector<1x16xf32> to vector<32x16xf32>
    %5 = arith.addf %2, %4 : vector<32x16xf32>
    %cst_5 = arith.constant 0.000000e+00 : f32
    %6 = vector.broadcast %cst_5 : f32 to vector<32x16xf32>
    %7 = arith.maximumf %5, %6 : vector<32x16xf32>
    %c0_6 = arith.constant 0 : index
    %c0_7 = arith.constant 0 : index
    %8 = vector.load %arg4[%c0_6, %c0_7] : memref<32x16xf32, #tpu.memory_space<vmem>>, vector<32x16xf32>
    tpu.vector_store %arg4[%c0_6, %c0_7], %7 {strides = array<i32>} : memref<32x16xf32, #tpu.memory_space<vmem>>, vector<32x16xf32>,
    return
  }
  func.func @transform_0(%arg0: i32) -> (i32, i32) {
    %c0_i32 = arith.constant 0 : i32
    %c0_i32_0 = arith.constant 0 : i32
    return %arg0, %c0_i32 : i32, i32
  }
  func.func @transform_1(%arg0: i32) -> (i32, i32) {
    %c0_i32 = arith.constant 0 : i32
    %c0_i32_0 = arith.constant 0 : i32
    %c0_i32_1 = arith.constant 0 : i32
    return %c0_i32, %c0_i32_0 : i32, i32
  }
  func.func @transform_2(%arg0: i32) -> (i32, i32) {
    %c0_i32 = arith.constant 0 : i32
    %c0_i32_0 = arith.constant 0 : i32
    %c0_i32_1 = arith.constant 0 : i32
    return %c0_i32, %c0_i32_0 : i32, i32
  }
  func.func @transform_3(%arg0: i32) -> (i32, i32) {
    %c0_i32 = arith.constant 0 : i32
    %c0_i32_0 = arith.constant 0 : i32
    return %arg0, %c0_i32 : i32, i32
  }
}

module attributes {stable_mosaic.version = 11 : i64} {
  func.func @_fused_mm_kernel(%arg0: i32, %arg1: memref<32x16xbf16, #tpu.memory_space<vmem>>, %arg2: memref<16x16xbf16, #tpu.memory_space<vmem>>, %arg3: memref<1x16xf32, #tpu.memory_space<vmem>>, %arg4: memref<32x8xbf16, #tpu.memory_space<vmem>>, %arg5: memref<8x16xbf16, #tpu.memory_space<vmem>>, %arg6: memref<32x16xf32, #tpu.memory_space<vmem>>) attributes {dimension_semantics = [#tpu.dimension_semantics<parallel>], iteration_bounds = array<i64: 1>, scalar_prefetch = 0 : i64, scratch_operands = 0 : i64, tpu.core_type = #tpu.core_type<tc>, window_params = [{transform_indices = @transform_0, window_bounds = array<i64: 32, 16>}, {pipeline_mode = #tpu.pipeline_mode<synchronous>, transform_indices = @transform_1, window_bounds = array<i64: 16, 16>}, {pipeline_mode = #tpu.pipeline_mode<synchronous>, transform_indices = @transform_2, window_bounds = array<i64: 1, 16>}, {transform_indices = @transform_3, window_bounds = array<i64: 32, 8>}, {pipeline_mode = #tpu.pipeline_mode<synchronous>, transform_indices = @transform_4, window_bounds = array<i64: 8, 16>}, {transform_indices = @transform_5, window_bounds = array<i64: 32, 16>}]} {
    %c0 = arith.constant 0 : index
    %c0_0 = arith.constant 0 : index
    %0 = vector.load %arg1[%c0, %c0_0] : memref<32x16xbf16, #tpu.memory_space<vmem>>, vector<32x16xbf16>
    %c0_1 = arith.constant 0 : index
    %c0_2 = arith.constant 0 : index
    %1 = vector.load %arg2[%c0_1, %c0_2] : memref<16x16xbf16, #tpu.memory_space<vmem>>, vector<16x16xbf16>
    %cst = arith.constant dense<0.000000e+00> : vector<32x16xf32>
    %2 = tpu.matmul %0, %1, %cst {dimension_numbers = #tpu.dot_dimension_numbers<[1], [0], [0], [1], [0, 0, 1, 1], [], []>} : vector<32x16xbf16>, vector<16x16xbf16>, vector<32x16xf32> -> vector<32x16xf32>
    %c0_3 = arith.constant 0 : index
    %c0_4 = arith.constant 0 : index
    %3 = vector.load %arg3[%c0_3, %c0_4] : memref<1x16xf32, #tpu.memory_space<vmem>>, vector<1x16xf32>
    %4 = vector.broadcast %3 : vector<1x16xf32> to vector<32x16xf32>
    %5 = arith.addf %2, %4 : vector<32x16xf32>
    %c0_5 = arith.constant 0 : index
    %c0_6 = arith.constant 0 : index
    %6 = vector.load %arg4[%c0_5, %c0_6] : memref<32x8xbf16, #tpu.memory_space<vmem>>, vector<32x8xbf16>
    %c0_7 = arith.constant 0 : index
    %c0_8 = arith.constant 0 : index
    %7 = vector.load %arg5[%c0_7, %c0_8] : memref<8x16xbf16, #tpu.memory_space<vmem>>, vector<8x16xbf16>
    %cst_9 = arith.constant dense<0.000000e+00> : vector<32x16xf32>
    %8 = tpu.matmul %6, %7, %cst_9 {dimension_numbers = #tpu.dot_dimension_numbers<[1], [0], [0], [1], [0, 0, 1, 1], [], []>} : vector<32x8xbf16>, vector<8x16xbf16>, vector<32x16xf32> -> vector<32x16xf32>
    %9 = arith.addf %5, %8 : vector<32x16xf32>
    %cst_10 = arith.constant 0.000000e+00 : f32
    %10 = vector.broadcast %cst_10 : f32 to vector<32x16xf32>
    %11 = arith.maximumf %9, %10 : vector<32x16xf32>
    %c0_11 = arith.constant 0 : index
    %c0_12 = arith.constant 0 : index
    %12 = vector.load %arg6[%c0_11, %c0_12] : memref<32x16xf32, #tpu.memory_space<vmem>>, vector<32x16xf32>
    tpu.vector_store %arg6[%c0_11, %c0_12], %11 {strides = array<i32>} : memref<32x16xf32, #tpu.memory_space<vmem>>, vector<32x16xf32>,
    return
  }
  func.func @transform_0(%arg0: i32) -> (i32, i32) {
    %c0_i32 = arith.constant 0 : i32
    %c0_i32_0 = arith.constant 0 : i32
    return %arg0, %c0_i32 : i32, i32
  }
  func.func @transform_1(%arg0: i32) -> (i32, i32) {
    %c0_i32 = arith.constant 0 : i32
    %c0_i32_0 = arith.constant 0 : i32
    %c0_i32_1 = arith.constant 0 : i32
    return %c0_i32, %c0_i32_0 : i32, i32
  }
  func.func @transform_2(%arg0: i32) -> (i32, i32) {
    %c0_i32 = arith.constant 0 : i32
    %c0_i32_0 = arith.constant 0 : i32
    %c0_i32_1 = arith.constant 0 : i32
    return %c0_i32, %c0_i32_0 : i32, i32
  }
  func.func @transform_3(%arg0: i32) -> (i32, i32) {
    %c0_i32 = arith.constant 0 : i32
    %c0_i32_0 = arith.constant 0 : i32
    return %arg0, %c0_i32 : i32, i32
  }
  func.func @transform_4(%arg0: i32) -> (i32, i32) {
    %c0_i32 = arith.constant 0 : i32
    %c0_i32_0 = arith.constant 0 : i32
    %c0_i32_1 = arith.constant 0 : i32
    return %c0_i32, %c0_i32_0 : i32, i32
  }
  func.func @transform_5(%arg0: i32) -> (i32, i32) {
    %c0_i32 = arith.constant 0 : i32
    %c0_i32_0 = arith.constant 0 : i32
    return %arg0, %c0_i32 : i32, i32
  }
}

module attributes {stable_mosaic.version = 11 : i64} {
  func.func @_fused_mm_kernel(%arg0: i32, %arg1: memref<32x16xbf16, #tpu.memory_space<vmem>>, %arg2: memref<16x16xbf16, #tpu.memory_space<vmem>>, %arg3: memref<1x16xf32, #tpu.memory_space<vmem>>, %arg4: memref<32x16xf32, #tpu.memory_space<vmem>>) attributes {dimension_semantics = [#tpu.dimension_semantics<parallel>], iteration_bounds = array<i64: 1>, scalar_prefetch = 0 : i64, scratch_operands = 0 : i64, tpu.core_type = #tpu.core_type<tc>, window_params = [{transform_indices = @transform_0, window_bounds = array<i64: 32, 16>}, {pipeline_mode = #tpu.pipeline_mode<synchronous>, transform_indices = @transform_1, window_bounds = array<i64: 16, 16>}, {pipeline_mode = #tpu.pipeline_mode<synchronous>, transform_indices = @transform_2, window_bounds = array<i64: 1, 16>}, {transform_indices = @transform_3, window_bounds = array<i64: 32, 16>}]} {
    %c0 = arith.constant 0 : index
    %c0_0 = arith.constant 0 : index
    %0 = vector.load %arg1[%c0, %c0_0] : memref<32x16xbf16, #tpu.memory_space<vmem>>, vector<32x16xbf16>
    %c0_1 = arith.constant 0 : index
    %c0_2 = arith.constant 0 : index
    %1 = vector.load %arg2[%c0_1, %c0_2] : memref<16x16xbf16, #tpu.memory_space<vmem>>, vector<16x16xbf16>
    %cst = arith.constant dense<0.000000e+00> : vector<32x16xf32>
    %2 = tpu.matmul %0, %1, %cst {dimension_numbers = #tpu.dot_dimension_numbers<[1], [0], [0], [1], [0, 0, 1, 1], [], []>} : vector<32x16xbf16>, vector<16x16xbf16>, vector<32x16xf32> -> vector<32x16xf32>
    %c0_3 = arith.constant 0 : index
    %c0_4 = arith.constant 0 : index
    %3 = vector.load %arg3[%c0_3, %c0_4] : memref<1x16xf32, #tpu.memory_space<vmem>>, vector<1x16xf32>
    %4 = vector.broadcast %3 : vector<1x16xf32> to vector<32x16xf32>
    %5 = arith.addf %2, %4 : vector<32x16xf32>
    %cst_5 = arith.constant 0.000000e+00 : f32
    %6 = vector.broadcast %cst_5 : f32 to vector<32x16xf32>
    %7 = arith.maximumf %5, %6 : vector<32x16xf32>
    %c0_6 = arith.constant 0 : index
    %c0_7 = arith.constant 0 : index
    %8 = vector.load %arg4[%c0_6, %c0_7] : memref<32x16xf32, #tpu.memory_space<vmem>>, vector<32x16xf32>
    tpu.vector_store %arg4[%c0_6, %c0_7], %7 {strides = array<i32>} : memref<32x16xf32, #tpu.memory_space<vmem>>, vector<32x16xf32>,
    return
  }
  func.func @transform_0(%arg0: i32) -> (i32, i32) {
    %c0_i32 = arith.constant 0 : i32
    %c0_i32_0 = arith.constant 0 : i32
    return %arg0, %c0_i32 : i32, i32
  }
  func.func @transform_1(%arg0: i32) -> (i32, i32) {
    %c0_i32 = arith.constant 0 : i32
    %c0_i32_0 = arith.constant 0 : i32
    %c0_i32_1 = arith.constant 0 : i32
    return %c0_i32, %c0_i32_0 : i32, i32
  }
  func.func @transform_2(%arg0: i32) -> (i32, i32) {
    %c0_i32 = arith.constant 0 : i32
    %c0_i32_0 = arith.constant 0 : i32
    %c0_i32_1 = arith.constant 0 : i32
    return %c0_i32, %c0_i32_0 : i32, i32
  }
  func.func @transform_3(%arg0: i32) -> (i32, i32) {
    %c0_i32 = arith.constant 0 : i32
    %c0_i32_0 = arith.constant 0 : i32
    return %arg0, %c0_i32 : i32, i32
  }
}

module attributes {stable_mosaic.version = 11 : i64} {
  func.func @_fused_mm_kernel(%arg0: i32, %arg1: memref<32x16xbf16, #tpu.memory_space<vmem>>, %arg2: memref<16x48xbf16, #tpu.memory_space<vmem>>, %arg3: memref<1x48xf32, #tpu.memory_space<vmem>>, %arg4: memref<32x48xf32, #tpu.memory_space<vmem>>) attributes {dimension_semantics = [#tpu.dimension_semantics<parallel>], iteration_bounds = array<i64: 1>, scalar_prefetch = 0 : i64, scratch_operands = 0 : i64, tpu.core_type = #tpu.core_type<tc>, window_params = [{transform_indices = @transform_0, window_bounds = array<i64: 32, 16>}, {pipeline_mode = #tpu.pipeline_mode<synchronous>, transform_indices = @transform_1, window_bounds = array<i64: 16, 48>}, {pipeline_mode = #tpu.pipeline_mode<synchronous>, transform_indices = @transform_2, window_bounds = array<i64: 1, 48>}, {transform_indices = @transform_3, window_bounds = array<i64: 32, 48>}]} {
    %c0 = arith.constant 0 : index
    %c0_0 = arith.constant 0 : index
    %0 = vector.load %arg1[%c0, %c0_0] : memref<32x16xbf16, #tpu.memory_space<vmem>>, vector<32x16xbf16>
    %c0_1 = arith.constant 0 : index
    %c0_2 = arith.constant 0 : index
    %1 = vector.load %arg2[%c0_1, %c0_2] : memref<16x48xbf16, #tpu.memory_space<vmem>>, vector<16x48xbf16>
    %cst = arith.constant dense<0.000000e+00> : vector<32x48xf32>
    %2 = tpu.matmul %0, %1, %cst {dimension_numbers = #tpu.dot_dimension_numbers<[1], [0], [0], [1], [0, 0, 1, 1], [], []>} : vector<32x16xbf16>, vector<16x48xbf16>, vector<32x48xf32> -> vector<32x48xf32>
    %c0_3 = arith.constant 0 : index
    %c0_4 = arith.constant 0 : index
    %3 = vector.load %arg3[%c0_3, %c0_4] : memref<1x48xf32, #tpu.memory_space<vmem>>, vector<1x48xf32>
    %4 = vector.broadcast %3 : vector<1x48xf32> to vector<32x48xf32>
    %5 = arith.addf %2, %4 : vector<32x48xf32>
    %cst_5 = arith.constant 0.000000e+00 : f32
    %6 = vector.broadcast %cst_5 : f32 to vector<32x48xf32>
    %7 = arith.maximumf %5, %6 : vector<32x48xf32>
    %c0_6 = arith.constant 0 : index
    %c0_7 = arith.constant 0 : index
    %8 = vector.load %arg4[%c0_6, %c0_7] : memref<32x48xf32, #tpu.memory_space<vmem>>, vector<32x48xf32>
    tpu.vector_store %arg4[%c0_6, %c0_7], %7 {strides = array<i32>} : memref<32x48xf32, #tpu.memory_space<vmem>>, vector<32x48xf32>,
    return
  }
  func.func @transform_0(%arg0: i32) -> (i32, i32) {
    %c0_i32 = arith.constant 0 : i32
    %c0_i32_0 = arith.constant 0 : i32
    return %arg0, %c0_i32 : i32, i32
  }
  func.func @transform_1(%arg0: i32) -> (i32, i32) {
    %c0_i32 = arith.constant 0 : i32
    %c0_i32_0 = arith.constant 0 : i32
    %c0_i32_1 = arith.constant 0 : i32
    return %c0_i32, %c0_i32_0 : i32, i32
  }
  func.func @transform_2(%arg0: i32) -> (i32, i32) {
    %c0_i32 = arith.constant 0 : i32
    %c0_i32_0 = arith.constant 0 : i32
    %c0_i32_1 = arith.constant 0 : i32
    return %c0_i32, %c0_i32_0 : i32, i32
  }
  func.func @transform_3(%arg0: i32) -> (i32, i32) {
    %c0_i32 = arith.constant 0 : i32
    %c0_i32_0 = arith.constant 0 : i32
    return %arg0, %c0_i32 : i32, i32
  }
}

module attributes {stable_mosaic.version = 11 : i64} {
  func.func @_fused_mm_kernel(%arg0: i32, %arg1: memref<32x16xbf16, #tpu.memory_space<vmem>>, %arg2: memref<16x16xbf16, #tpu.memory_space<vmem>>, %arg3: memref<1x16xf32, #tpu.memory_space<vmem>>, %arg4: memref<32x16xf32, #tpu.memory_space<vmem>>, %arg5: memref<32x16xf32, #tpu.memory_space<vmem>>) attributes {dimension_semantics = [#tpu.dimension_semantics<parallel>], iteration_bounds = array<i64: 1>, scalar_prefetch = 0 : i64, scratch_operands = 0 : i64, tpu.core_type = #tpu.core_type<tc>, window_params = [{transform_indices = @transform_0, window_bounds = array<i64: 32, 16>}, {pipeline_mode = #tpu.pipeline_mode<synchronous>, transform_indices = @transform_1, window_bounds = array<i64: 16, 16>}, {pipeline_mode = #tpu.pipeline_mode<synchronous>, transform_indices = @transform_2, window_bounds = array<i64: 1, 16>}, {transform_indices = @transform_3, window_bounds = array<i64: 32, 16>}, {transform_indices = @transform_4, window_bounds = array<i64: 32, 16>}]} {
    %c0 = arith.constant 0 : index
    %c0_0 = arith.constant 0 : index
    %0 = vector.load %arg1[%c0, %c0_0] : memref<32x16xbf16, #tpu.memory_space<vmem>>, vector<32x16xbf16>
    %c0_1 = arith.constant 0 : index
    %c0_2 = arith.constant 0 : index
    %1 = vector.load %arg2[%c0_1, %c0_2] : memref<16x16xbf16, #tpu.memory_space<vmem>>, vector<16x16xbf16>
    %cst = arith.constant dense<0.000000e+00> : vector<32x16xf32>
    %2 = tpu.matmul %0, %1, %cst {dimension_numbers = #tpu.dot_dimension_numbers<[1], [0], [0], [1], [0, 0, 1, 1], [], []>} : vector<32x16xbf16>, vector<16x16xbf16>, vector<32x16xf32> -> vector<32x16xf32>
    %c0_3 = arith.constant 0 : index
    %c0_4 = arith.constant 0 : index
    %3 = vector.load %arg3[%c0_3, %c0_4] : memref<1x16xf32, #tpu.memory_space<vmem>>, vector<1x16xf32>
    %4 = vector.broadcast %3 : vector<1x16xf32> to vector<32x16xf32>
    %5 = arith.addf %2, %4 : vector<32x16xf32>
    %c0_5 = arith.constant 0 : index
    %c0_6 = arith.constant 0 : index
    %6 = vector.load %arg4[%c0_5, %c0_6] : memref<32x16xf32, #tpu.memory_space<vmem>>, vector<32x16xf32>
    %7 = arith.addf %5, %6 : vector<32x16xf32>
    %cst_7 = arith.constant 0.000000e+00 : f32
    %8 = vector.broadcast %cst_7 : f32 to vector<32x16xf32>
    %9 = arith.maximumf %7, %8 : vector<32x16xf32>
    %c0_8 = arith.constant 0 : index
    %c0_9 = arith.constant 0 : index
    %10 = vector.load %arg5[%c0_8, %c0_9] : memref<32x16xf32, #tpu.memory_space<vmem>>, vector<32x16xf32>
    tpu.vector_store %arg5[%c0_8, %c0_9], %9 {strides = array<i32>} : memref<32x16xf32, #tpu.memory_space<vmem>>, vector<32x16xf32>,
    return
  }
  func.func @transform_0(%arg0: i32) -> (i32, i32) {
    %c0_i32 = arith.constant 0 : i32
    %c0_i32_0 = arith.constant 0 : i32
    return %arg0, %c0_i32 : i32, i32
  }
  func.func @transform_1(%arg0: i32) -> (i32, i32) {
    %c0_i32 = arith.constant 0 : i32
    %c0_i32_0 = arith.constant 0 : i32
    %c0_i32_1 = arith.constant 0 : i32
    return %c0_i32, %c0_i32_0 : i32, i32
  }
  func.func @transform_2(%arg0: i32) -> (i32, i32) {
    %c0_i32 = arith.constant 0 : i32
    %c0_i32_0 = arith.constant 0 : i32
    %c0_i32_1 = arith.constant 0 : i32
    return %c0_i32, %c0_i32_0 : i32, i32
  }
  func.func @transform_3(%arg0: i32) -> (i32, i32) {
    %c0_i32 = arith.constant 0 : i32
    %c0_i32_0 = arith.constant 0 : i32
    return %arg0, %c0_i32 : i32, i32
  }
  func.func @transform_4(%arg0: i32) -> (i32, i32) {
    %c0_i32 = arith.constant 0 : i32
    %c0_i32_0 = arith.constant 0 : i32
    return %arg0, %c0_i32 : i32, i32
  }
}

module attributes {stable_mosaic.version = 11 : i64} {
  func.func @_fused_mm_kernel(%arg0: i32, %arg1: memref<8x432xbf16, #tpu.memory_space<vmem>>, %arg2: memref<432x48xbf16, #tpu.memory_space<vmem>>, %arg3: memref<1x48xf32, #tpu.memory_space<vmem>>, %arg4: memref<8x48xf32, #tpu.memory_space<vmem>>) attributes {dimension_semantics = [#tpu.dimension_semantics<parallel>], iteration_bounds = array<i64: 1>, scalar_prefetch = 0 : i64, scratch_operands = 0 : i64, tpu.core_type = #tpu.core_type<tc>, window_params = [{transform_indices = @transform_0, window_bounds = array<i64: 8, 432>}, {pipeline_mode = #tpu.pipeline_mode<synchronous>, transform_indices = @transform_1, window_bounds = array<i64: 432, 48>}, {pipeline_mode = #tpu.pipeline_mode<synchronous>, transform_indices = @transform_2, window_bounds = array<i64: 1, 48>}, {transform_indices = @transform_3, window_bounds = array<i64: 8, 48>}]} {
    %c0 = arith.constant 0 : index
    %c0_0 = arith.constant 0 : index
    %0 = vector.load %arg1[%c0, %c0_0] : memref<8x432xbf16, #tpu.memory_space<vmem>>, vector<8x432xbf16>
    %c0_1 = arith.constant 0 : index
    %c0_2 = arith.constant 0 : index
    %1 = vector.load %arg2[%c0_1, %c0_2] : memref<432x48xbf16, #tpu.memory_space<vmem>>, vector<432x48xbf16>
    %cst = arith.constant dense<0.000000e+00> : vector<8x48xf32>
    %2 = tpu.matmul %0, %1, %cst {dimension_numbers = #tpu.dot_dimension_numbers<[1], [0], [0], [1], [0, 0, 1, 1], [], []>} : vector<8x432xbf16>, vector<432x48xbf16>, vector<8x48xf32> -> vector<8x48xf32>
    %c0_3 = arith.constant 0 : index
    %c0_4 = arith.constant 0 : index
    %3 = vector.load %arg3[%c0_3, %c0_4] : memref<1x48xf32, #tpu.memory_space<vmem>>, vector<1x48xf32>
    %4 = vector.broadcast %3 : vector<1x48xf32> to vector<8x48xf32>
    %5 = arith.addf %2, %4 : vector<8x48xf32>
    %cst_5 = arith.constant 0.000000e+00 : f32
    %6 = vector.broadcast %cst_5 : f32 to vector<8x48xf32>
    %7 = arith.maximumf %5, %6 : vector<8x48xf32>
    %c0_6 = arith.constant 0 : index
    %c0_7 = arith.constant 0 : index
    %8 = vector.load %arg4[%c0_6, %c0_7] : memref<8x48xf32, #tpu.memory_space<vmem>>, vector<8x48xf32>
    tpu.vector_store %arg4[%c0_6, %c0_7], %7 {strides = array<i32>} : memref<8x48xf32, #tpu.memory_space<vmem>>, vector<8x48xf32>,
    return
  }
  func.func @transform_0(%arg0: i32) -> (i32, i32) {
    %c0_i32 = arith.constant 0 : i32
    %c0_i32_0 = arith.constant 0 : i32
    return %arg0, %c0_i32 : i32, i32
  }
  func.func @transform_1(%arg0: i32) -> (i32, i32) {
    %c0_i32 = arith.constant 0 : i32
    %c0_i32_0 = arith.constant 0 : i32
    %c0_i32_1 = arith.constant 0 : i32
    return %c0_i32, %c0_i32_0 : i32, i32
  }
  func.func @transform_2(%arg0: i32) -> (i32, i32) {
    %c0_i32 = arith.constant 0 : i32
    %c0_i32_0 = arith.constant 0 : i32
    %c0_i32_1 = arith.constant 0 : i32
    return %c0_i32, %c0_i32_0 : i32, i32
  }
  func.func @transform_3(%arg0: i32) -> (i32, i32) {
    %c0_i32 = arith.constant 0 : i32
    %c0_i32_0 = arith.constant 0 : i32
    return %arg0, %c0_i32 : i32, i32
  }
}

module attributes {stable_mosaic.version = 11 : i64} {
  func.func @_fused_mm_kernel(%arg0: i32, %arg1: memref<8x48xbf16, #tpu.memory_space<vmem>>, %arg2: memref<48x48xbf16, #tpu.memory_space<vmem>>, %arg3: memref<1x48xf32, #tpu.memory_space<vmem>>, %arg4: memref<8x16xbf16, #tpu.memory_space<vmem>>, %arg5: memref<16x48xbf16, #tpu.memory_space<vmem>>, %arg6: memref<8x48xf32, #tpu.memory_space<vmem>>) attributes {dimension_semantics = [#tpu.dimension_semantics<parallel>], iteration_bounds = array<i64: 1>, scalar_prefetch = 0 : i64, scratch_operands = 0 : i64, tpu.core_type = #tpu.core_type<tc>, window_params = [{transform_indices = @transform_0, window_bounds = array<i64: 8, 48>}, {pipeline_mode = #tpu.pipeline_mode<synchronous>, transform_indices = @transform_1, window_bounds = array<i64: 48, 48>}, {pipeline_mode = #tpu.pipeline_mode<synchronous>, transform_indices = @transform_2, window_bounds = array<i64: 1, 48>}, {transform_indices = @transform_3, window_bounds = array<i64: 8, 16>}, {pipeline_mode = #tpu.pipeline_mode<synchronous>, transform_indices = @transform_4, window_bounds = array<i64: 16, 48>}, {transform_indices = @transform_5, window_bounds = array<i64: 8, 48>}]} {
    %c0 = arith.constant 0 : index
    %c0_0 = arith.constant 0 : index
    %0 = vector.load %arg1[%c0, %c0_0] : memref<8x48xbf16, #tpu.memory_space<vmem>>, vector<8x48xbf16>
    %c0_1 = arith.constant 0 : index
    %c0_2 = arith.constant 0 : index
    %1 = vector.load %arg2[%c0_1, %c0_2] : memref<48x48xbf16, #tpu.memory_space<vmem>>, vector<48x48xbf16>
    %cst = arith.constant dense<0.000000e+00> : vector<8x48xf32>
    %2 = tpu.matmul %0, %1, %cst {dimension_numbers = #tpu.dot_dimension_numbers<[1], [0], [0], [1], [0, 0, 1, 1], [], []>} : vector<8x48xbf16>, vector<48x48xbf16>, vector<8x48xf32> -> vector<8x48xf32>
    %c0_3 = arith.constant 0 : index
    %c0_4 = arith.constant 0 : index
    %3 = vector.load %arg3[%c0_3, %c0_4] : memref<1x48xf32, #tpu.memory_space<vmem>>, vector<1x48xf32>
    %4 = vector.broadcast %3 : vector<1x48xf32> to vector<8x48xf32>
    %5 = arith.addf %2, %4 : vector<8x48xf32>
    %c0_5 = arith.constant 0 : index
    %c0_6 = arith.constant 0 : index
    %6 = vector.load %arg4[%c0_5, %c0_6] : memref<8x16xbf16, #tpu.memory_space<vmem>>, vector<8x16xbf16>
    %c0_7 = arith.constant 0 : index
    %c0_8 = arith.constant 0 : index
    %7 = vector.load %arg5[%c0_7, %c0_8] : memref<16x48xbf16, #tpu.memory_space<vmem>>, vector<16x48xbf16>
    %cst_9 = arith.constant dense<0.000000e+00> : vector<8x48xf32>
    %8 = tpu.matmul %6, %7, %cst_9 {dimension_numbers = #tpu.dot_dimension_numbers<[1], [0], [0], [1], [0, 0, 1, 1], [], []>} : vector<8x16xbf16>, vector<16x48xbf16>, vector<8x48xf32> -> vector<8x48xf32>
    %9 = arith.addf %5, %8 : vector<8x48xf32>
    %cst_10 = arith.constant 0.000000e+00 : f32
    %10 = vector.broadcast %cst_10 : f32 to vector<8x48xf32>
    %11 = arith.maximumf %9, %10 : vector<8x48xf32>
    %c0_11 = arith.constant 0 : index
    %c0_12 = arith.constant 0 : index
    %12 = vector.load %arg6[%c0_11, %c0_12] : memref<8x48xf32, #tpu.memory_space<vmem>>, vector<8x48xf32>
    tpu.vector_store %arg6[%c0_11, %c0_12], %11 {strides = array<i32>} : memref<8x48xf32, #tpu.memory_space<vmem>>, vector<8x48xf32>,
    return
  }
  func.func @transform_0(%arg0: i32) -> (i32, i32) {
    %c0_i32 = arith.constant 0 : i32
    %c0_i32_0 = arith.constant 0 : i32
    return %arg0, %c0_i32 : i32, i32
  }
  func.func @transform_1(%arg0: i32) -> (i32, i32) {
    %c0_i32 = arith.constant 0 : i32
    %c0_i32_0 = arith.constant 0 : i32
    %c0_i32_1 = arith.constant 0 : i32
    return %c0_i32, %c0_i32_0 : i32, i32
  }
  func.func @transform_2(%arg0: i32) -> (i32, i32) {
    %c0_i32 = arith.constant 0 : i32
    %c0_i32_0 = arith.constant 0 : i32
    %c0_i32_1 = arith.constant 0 : i32
    return %c0_i32, %c0_i32_0 : i32, i32
  }
  func.func @transform_3(%arg0: i32) -> (i32, i32) {
    %c0_i32 = arith.constant 0 : i32
    %c0_i32_0 = arith.constant 0 : i32
    return %arg0, %c0_i32 : i32, i32
  }
  func.func @transform_4(%arg0: i32) -> (i32, i32) {
    %c0_i32 = arith.constant 0 : i32
    %c0_i32_0 = arith.constant 0 : i32
    %c0_i32_1 = arith.constant 0 : i32
    return %c0_i32, %c0_i32_0 : i32, i32
  }
  func.func @transform_5(%arg0: i32) -> (i32, i32) {
    %c0_i32 = arith.constant 0 : i32
    %c0_i32_0 = arith.constant 0 : i32
    return %arg0, %c0_i32 : i32, i32
  }
}

module attributes {stable_mosaic.version = 11 : i64} {
  func.func @_fused_mm_kernel(%arg0: i32, %arg1: memref<8x48xbf16, #tpu.memory_space<vmem>>, %arg2: memref<48x224xbf16, #tpu.memory_space<vmem>>, %arg3: memref<1x224xf32, #tpu.memory_space<vmem>>, %arg4: memref<8x224xf32, #tpu.memory_space<vmem>>) attributes {dimension_semantics = [#tpu.dimension_semantics<parallel>], iteration_bounds = array<i64: 1>, scalar_prefetch = 0 : i64, scratch_operands = 0 : i64, tpu.core_type = #tpu.core_type<tc>, window_params = [{transform_indices = @transform_0, window_bounds = array<i64: 8, 48>}, {pipeline_mode = #tpu.pipeline_mode<synchronous>, transform_indices = @transform_1, window_bounds = array<i64: 48, 224>}, {pipeline_mode = #tpu.pipeline_mode<synchronous>, transform_indices = @transform_2, window_bounds = array<i64: 1, 224>}, {transform_indices = @transform_3, window_bounds = array<i64: 8, 224>}]} {
    %c0 = arith.constant 0 : index
    %c0_0 = arith.constant 0 : index
    %0 = vector.load %arg1[%c0, %c0_0] : memref<8x48xbf16, #tpu.memory_space<vmem>>, vector<8x48xbf16>
    %c0_1 = arith.constant 0 : index
    %c0_2 = arith.constant 0 : index
    %1 = vector.load %arg2[%c0_1, %c0_2] : memref<48x224xbf16, #tpu.memory_space<vmem>>, vector<48x224xbf16>
    %cst = arith.constant dense<0.000000e+00> : vector<8x224xf32>
    %2 = tpu.matmul %0, %1, %cst {dimension_numbers = #tpu.dot_dimension_numbers<[1], [0], [0], [1], [0, 0, 1, 1], [], []>} : vector<8x48xbf16>, vector<48x224xbf16>, vector<8x224xf32> -> vector<8x224xf32>
    %c0_3 = arith.constant 0 : index
    %c0_4 = arith.constant 0 : index
    %3 = vector.load %arg3[%c0_3, %c0_4] : memref<1x224xf32, #tpu.memory_space<vmem>>, vector<1x224xf32>
    %4 = vector.broadcast %3 : vector<1x224xf32> to vector<8x224xf32>
    %5 = arith.addf %2, %4 : vector<8x224xf32>
    %cst_5 = arith.constant 0.000000e+00 : f32
    %6 = vector.broadcast %cst_5 : f32 to vector<8x224xf32>
    %7 = arith.maximumf %5, %6 : vector<8x224xf32>
    %c0_6 = arith.constant 0 : index
    %c0_7 = arith.constant 0 : index
    %8 = vector.load %arg4[%c0_6, %c0_7] : memref<8x224xf32, #tpu.memory_space<vmem>>, vector<8x224xf32>
    tpu.vector_store %arg4[%c0_6, %c0_7], %7 {strides = array<i32>} : memref<8x224xf32, #tpu.memory_space<vmem>>, vector<8x224xf32>,
    return
  }
  func.func @transform_0(%arg0: i32) -> (i32, i32) {
    %c0_i32 = arith.constant 0 : i32
    %c0_i32_0 = arith.constant 0 : i32
    return %arg0, %c0_i32 : i32, i32
  }
  func.func @transform_1(%arg0: i32) -> (i32, i32) {
    %c0_i32 = arith.constant 0 : i32
    %c0_i32_0 = arith.constant 0 : i32
    %c0_i32_1 = arith.constant 0 : i32
    return %c0_i32, %c0_i32_0 : i32, i32
  }
  func.func @transform_2(%arg0: i32) -> (i32, i32) {
    %c0_i32 = arith.constant 0 : i32
    %c0_i32_0 = arith.constant 0 : i32
    %c0_i32_1 = arith.constant 0 : i32
    return %c0_i32, %c0_i32_0 : i32, i32
  }
  func.func @transform_3(%arg0: i32) -> (i32, i32) {
    %c0_i32 = arith.constant 0 : i32
    %c0_i32_0 = arith.constant 0 : i32
    return %arg0, %c0_i32 : i32, i32
  }
}

module attributes {stable_mosaic.version = 11 : i64} {
  func.func @_fused_mm_kernel(%arg0: i32, %arg1: memref<2x2016xbf16, #tpu.memory_space<vmem>>, %arg2: memref<2016x224xbf16, #tpu.memory_space<vmem>>, %arg3: memref<1x224xf32, #tpu.memory_space<vmem>>, %arg4: memref<2x224xf32, #tpu.memory_space<vmem>>) attributes {dimension_semantics = [#tpu.dimension_semantics<parallel>], iteration_bounds = array<i64: 1>, scalar_prefetch = 0 : i64, scratch_operands = 0 : i64, tpu.core_type = #tpu.core_type<tc>, window_params = [{transform_indices = @transform_0, window_bounds = array<i64: 2, 2016>}, {pipeline_mode = #tpu.pipeline_mode<synchronous>, transform_indices = @transform_1, window_bounds = array<i64: 2016, 224>}, {pipeline_mode = #tpu.pipeline_mode<synchronous>, transform_indices = @transform_2, window_bounds = array<i64: 1, 224>}, {transform_indices = @transform_3, window_bounds = array<i64: 2, 224>}]} {
    %c0 = arith.constant 0 : index
    %c0_0 = arith.constant 0 : index
    %0 = vector.load %arg1[%c0, %c0_0] : memref<2x2016xbf16, #tpu.memory_space<vmem>>, vector<2x2016xbf16>
    %c0_1 = arith.constant 0 : index
    %c0_2 = arith.constant 0 : index
    %1 = vector.load %arg2[%c0_1, %c0_2] : memref<2016x224xbf16, #tpu.memory_space<vmem>>, vector<2016x224xbf16>
    %cst = arith.constant dense<0.000000e+00> : vector<2x224xf32>
    %2 = tpu.matmul %0, %1, %cst {dimension_numbers = #tpu.dot_dimension_numbers<[1], [0], [0], [1], [0, 0, 1, 1], [], []>} : vector<2x2016xbf16>, vector<2016x224xbf16>, vector<2x224xf32> -> vector<2x224xf32>
    %c0_3 = arith.constant 0 : index
    %c0_4 = arith.constant 0 : index
    %3 = vector.load %arg3[%c0_3, %c0_4] : memref<1x224xf32, #tpu.memory_space<vmem>>, vector<1x224xf32>
    %4 = vector.broadcast %3 : vector<1x224xf32> to vector<2x224xf32>
    %5 = arith.addf %2, %4 : vector<2x224xf32>
    %cst_5 = arith.constant 0.000000e+00 : f32
    %6 = vector.broadcast %cst_5 : f32 to vector<2x224xf32>
    %7 = arith.maximumf %5, %6 : vector<2x224xf32>
    %c0_6 = arith.constant 0 : index
    %c0_7 = arith.constant 0 : index
    %8 = vector.load %arg4[%c0_6, %c0_7] : memref<2x224xf32, #tpu.memory_space<vmem>>, vector<2x224xf32>
    tpu.vector_store %arg4[%c0_6, %c0_7], %7 {strides = array<i32>} : memref<2x224xf32, #tpu.memory_space<vmem>>, vector<2x224xf32>,
    return
  }
  func.func @transform_0(%arg0: i32) -> (i32, i32) {
    %c0_i32 = arith.constant 0 : i32
    %c0_i32_0 = arith.constant 0 : i32
    return %arg0, %c0_i32 : i32, i32
  }
  func.func @transform_1(%arg0: i32) -> (i32, i32) {
    %c0_i32 = arith.constant 0 : i32
    %c0_i32_0 = arith.constant 0 : i32
    %c0_i32_1 = arith.constant 0 : i32
    return %c0_i32, %c0_i32_0 : i32, i32
  }
  func.func @transform_2(%arg0: i32) -> (i32, i32) {
    %c0_i32 = arith.constant 0 : i32
    %c0_i32_0 = arith.constant 0 : i32
    %c0_i32_1 = arith.constant 0 : i32
    return %c0_i32, %c0_i32_0 : i32, i32
  }
  func.func @transform_3(%arg0: i32) -> (i32, i32) {
    %c0_i32 = arith.constant 0 : i32
    %c0_i32_0 = arith.constant 0 : i32
    return %arg0, %c0_i32 : i32, i32
  }
}

module attributes {stable_mosaic.version = 11 : i64} {
  func.func @_fused_mm_kernel(%arg0: i32, %arg1: memref<2x224xbf16, #tpu.memory_space<vmem>>, %arg2: memref<224x224xbf16, #tpu.memory_space<vmem>>, %arg3: memref<1x224xf32, #tpu.memory_space<vmem>>, %arg4: memref<2x48xbf16, #tpu.memory_space<vmem>>, %arg5: memref<48x224xbf16, #tpu.memory_space<vmem>>, %arg6: memref<2x224xf32, #tpu.memory_space<vmem>>) attributes {dimension_semantics = [#tpu.dimension_semantics<parallel>], iteration_bounds = array<i64: 1>, scalar_prefetch = 0 : i64, scratch_operands = 0 : i64, tpu.core_type = #tpu.core_type<tc>, window_params = [{transform_indices = @transform_0, window_bounds = array<i64: 2, 224>}, {pipeline_mode = #tpu.pipeline_mode<synchronous>, transform_indices = @transform_1, window_bounds = array<i64: 224, 224>}, {pipeline_mode = #tpu.pipeline_mode<synchronous>, transform_indices = @transform_2, window_bounds = array<i64: 1, 224>}, {transform_indices = @transform_3, window_bounds = array<i64: 2, 48>}, {pipeline_mode = #tpu.pipeline_mode<synchronous>, transform_indices = @transform_4, window_bounds = array<i64: 48, 224>}, {transform_indices = @transform_5, window_bounds = array<i64: 2, 224>}]} {
    %c0 = arith.constant 0 : index
    %c0_0 = arith.constant 0 : index
    %0 = vector.load %arg1[%c0, %c0_0] : memref<2x224xbf16, #tpu.memory_space<vmem>>, vector<2x224xbf16>
    %c0_1 = arith.constant 0 : index
    %c0_2 = arith.constant 0 : index
    %1 = vector.load %arg2[%c0_1, %c0_2] : memref<224x224xbf16, #tpu.memory_space<vmem>>, vector<224x224xbf16>
    %cst = arith.constant dense<0.000000e+00> : vector<2x224xf32>
    %2 = tpu.matmul %0, %1, %cst {dimension_numbers = #tpu.dot_dimension_numbers<[1], [0], [0], [1], [0, 0, 1, 1], [], []>} : vector<2x224xbf16>, vector<224x224xbf16>, vector<2x224xf32> -> vector<2x224xf32>
    %c0_3 = arith.constant 0 : index
    %c0_4 = arith.constant 0 : index
    %3 = vector.load %arg3[%c0_3, %c0_4] : memref<1x224xf32, #tpu.memory_space<vmem>>, vector<1x224xf32>
    %4 = vector.broadcast %3 : vector<1x224xf32> to vector<2x224xf32>
    %5 = arith.addf %2, %4 : vector<2x224xf32>
    %c0_5 = arith.constant 0 : index
    %c0_6 = arith.constant 0 : index
    %6 = vector.load %arg4[%c0_5, %c0_6] : memref<2x48xbf16, #tpu.memory_space<vmem>>, vector<2x48xbf16>
    %c0_7 = arith.constant 0 : index
    %c0_8 = arith.constant 0 : index
    %7 = vector.load %arg5[%c0_7, %c0_8] : memref<48x224xbf16, #tpu.memory_space<vmem>>, vector<48x224xbf16>
    %cst_9 = arith.constant dense<0.000000e+00> : vector<2x224xf32>
    %8 = tpu.matmul %6, %7, %cst_9 {dimension_numbers = #tpu.dot_dimension_numbers<[1], [0], [0], [1], [0, 0, 1, 1], [], []>} : vector<2x48xbf16>, vector<48x224xbf16>, vector<2x224xf32> -> vector<2x224xf32>
    %9 = arith.addf %5, %8 : vector<2x224xf32>
    %cst_10 = arith.constant 0.000000e+00 : f32
    %10 = vector.broadcast %cst_10 : f32 to vector<2x224xf32>
    %11 = arith.maximumf %9, %10 : vector<2x224xf32>
    %c0_11 = arith.constant 0 : index
    %c0_12 = arith.constant 0 : index
    %12 = vector.load %arg6[%c0_11, %c0_12] : memref<2x224xf32, #tpu.memory_space<vmem>>, vector<2x224xf32>
    tpu.vector_store %arg6[%c0_11, %c0_12], %11 {strides = array<i32>} : memref<2x224xf32, #tpu.memory_space<vmem>>, vector<2x224xf32>,
    return
  }
  func.func @transform_0(%arg0: i32) -> (i32, i32) {
    %c0_i32 = arith.constant 0 : i32
    %c0_i32_0 = arith.constant 0 : i32
    return %arg0, %c0_i32 : i32, i32
  }
  func.func @transform_1(%arg0: i32) -> (i32, i32) {
    %c0_i32 = arith.constant 0 : i32
    %c0_i32_0 = arith.constant 0 : i32
    %c0_i32_1 = arith.constant 0 : i32
    return %c0_i32, %c0_i32_0 : i32, i32
  }
  func.func @transform_2(%arg0: i32) -> (i32, i32) {
    %c0_i32 = arith.constant 0 : i32
    %c0_i32_0 = arith.constant 0 : i32
    %c0_i32_1 = arith.constant 0 : i32
    return %c0_i32, %c0_i32_0 : i32, i32
  }
  func.func @transform_3(%arg0: i32) -> (i32, i32) {
    %c0_i32 = arith.constant 0 : i32
    %c0_i32_0 = arith.constant 0 : i32
    return %arg0, %c0_i32 : i32, i32
  }
  func.func @transform_4(%arg0: i32) -> (i32, i32) {
    %c0_i32 = arith.constant 0 : i32
    %c0_i32_0 = arith.constant 0 : i32
    %c0_i32_1 = arith.constant 0 : i32
    return %c0_i32, %c0_i32_0 : i32, i32
  }
  func.func @transform_5(%arg0: i32) -> (i32, i32) {
    %c0_i32 = arith.constant 0 : i32
    %c0_i32_0 = arith.constant 0 : i32
    return %arg0, %c0_i32 : i32, i32
  }
}

module attributes {stable_mosaic.version = 11 : i64} {
  func.func @_fused_mm_kernel(%arg0: i32, %arg1: memref<2x224xbf16, #tpu.memory_space<vmem>>, %arg2: memref<224x224xbf16, #tpu.memory_space<vmem>>, %arg3: memref<1x224xf32, #tpu.memory_space<vmem>>, %arg4: memref<2x224xf32, #tpu.memory_space<vmem>>) attributes {dimension_semantics = [#tpu.dimension_semantics<parallel>], iteration_bounds = array<i64: 1>, scalar_prefetch = 0 : i64, scratch_operands = 0 : i64, tpu.core_type = #tpu.core_type<tc>, window_params = [{transform_indices = @transform_0, window_bounds = array<i64: 2, 224>}, {pipeline_mode = #tpu.pipeline_mode<synchronous>, transform_indices = @transform_1, window_bounds = array<i64: 224, 224>}, {pipeline_mode = #tpu.pipeline_mode<synchronous>, transform_indices = @transform_2, window_bounds = array<i64: 1, 224>}, {transform_indices = @transform_3, window_bounds = array<i64: 2, 224>}]} {
    %c0 = arith.constant 0 : index
    %c0_0 = arith.constant 0 : index
    %0 = vector.load %arg1[%c0, %c0_0] : memref<2x224xbf16, #tpu.memory_space<vmem>>, vector<2x224xbf16>
    %c0_1 = arith.constant 0 : index
    %c0_2 = arith.constant 0 : index
    %1 = vector.load %arg2[%c0_1, %c0_2] : memref<224x224xbf16, #tpu.memory_space<vmem>>, vector<224x224xbf16>
    %cst = arith.constant dense<0.000000e+00> : vector<2x224xf32>
    %2 = tpu.matmul %0, %1, %cst {dimension_numbers = #tpu.dot_dimension_numbers<[1], [0], [0], [1], [0, 0, 1, 1], [], []>} : vector<2x224xbf16>, vector<224x224xbf16>, vector<2x224xf32> -> vector<2x224xf32>
    %c0_3 = arith.constant 0 : index
    %c0_4 = arith.constant 0 : index
    %3 = vector.load %arg3[%c0_3, %c0_4] : memref<1x224xf32, #tpu.memory_space<vmem>>, vector<1x224xf32>
    %4 = vector.broadcast %3 : vector<1x224xf32> to vector<2x224xf32>
    %5 = arith.addf %2, %4 : vector<2x224xf32>
    %cst_5 = arith.constant 0.000000e+00 : f32
    %6 = vector.broadcast %cst_5 : f32 to vector<2x224xf32>
    %7 = arith.maximumf %5, %6 : vector<2x224xf32>
    %c0_6 = arith.constant 0 : index
    %c0_7 = arith.constant 0 : index
    %8 = vector.load %arg4[%c0_6, %c0_7] : memref<2x224xf32, #tpu.memory_space<vmem>>, vector<2x224xf32>
    tpu.vector_store %arg4[%c0_6, %c0_7], %7 {strides = array<i32>} : memref<2x224xf32, #tpu.memory_space<vmem>>, vector<2x224xf32>,
    return
  }
  func.func @transform_0(%arg0: i32) -> (i32, i32) {
    %c0_i32 = arith.constant 0 : i32
    %c0_i32_0 = arith.constant 0 : i32
    return %arg0, %c0_i32 : i32, i32
  }
  func.func @transform_1(%arg0: i32) -> (i32, i32) {
    %c0_i32 = arith.constant 0 : i32
    %c0_i32_0 = arith.constant 0 : i32
    %c0_i32_1 = arith.constant 0 : i32
    return %c0_i32, %c0_i32_0 : i32, i32
  }
  func.func @transform_2(%arg0: i32) -> (i32, i32) {
    %c0_i32 = arith.constant 0 : i32
    %c0_i32_0 = arith.constant 0 : i32
    %c0_i32_1 = arith.constant 0 : i32
    return %c0_i32, %c0_i32_0 : i32, i32
  }
  func.func @transform_3(%arg0: i32) -> (i32, i32) {
    %c0_i32 = arith.constant 0 : i32
    %c0_i32_0 = arith.constant 0 : i32
    return %arg0, %c0_i32 : i32, i32
  }
}

module attributes {stable_mosaic.version = 11 : i64} {
  func.func @_fused_mm_kernel(%arg0: i32, %arg1: memref<2x224xbf16, #tpu.memory_space<vmem>>, %arg2: memref<224x224xbf16, #tpu.memory_space<vmem>>, %arg3: memref<1x224xf32, #tpu.memory_space<vmem>>, %arg4: memref<2x224xf32, #tpu.memory_space<vmem>>, %arg5: memref<2x224xf32, #tpu.memory_space<vmem>>) attributes {dimension_semantics = [#tpu.dimension_semantics<parallel>], iteration_bounds = array<i64: 1>, scalar_prefetch = 0 : i64, scratch_operands = 0 : i64, tpu.core_type = #tpu.core_type<tc>, window_params = [{transform_indices = @transform_0, window_bounds = array<i64: 2, 224>}, {pipeline_mode = #tpu.pipeline_mode<synchronous>, transform_indices = @transform_1, window_bounds = array<i64: 224, 224>}, {pipeline_mode = #tpu.pipeline_mode<synchronous>, transform_indices = @transform_2, window_bounds = array<i64: 1, 224>}, {transform_indices = @transform_3, window_bounds = array<i64: 2, 224>}, {transform_indices = @transform_4, window_bounds = array<i64: 2, 224>}]} {
    %c0 = arith.constant 0 : index
    %c0_0 = arith.constant 0 : index
    %0 = vector.load %arg1[%c0, %c0_0] : memref<2x224xbf16, #tpu.memory_space<vmem>>, vector<2x224xbf16>
    %c0_1 = arith.constant 0 : index
    %c0_2 = arith.constant 0 : index
    %1 = vector.load %arg2[%c0_1, %c0_2] : memref<224x224xbf16, #tpu.memory_space<vmem>>, vector<224x224xbf16>
    %cst = arith.constant dense<0.000000e+00> : vector<2x224xf32>
    %2 = tpu.matmul %0, %1, %cst {dimension_numbers = #tpu.dot_dimension_numbers<[1], [0], [0], [1], [0, 0, 1, 1], [], []>} : vector<2x224xbf16>, vector<224x224xbf16>, vector<2x224xf32> -> vector<2x224xf32>
    %c0_3 = arith.constant 0 : index
    %c0_4 = arith.constant 0 : index
    %3 = vector.load %arg3[%c0_3, %c0_4] : memref<1x224xf32, #tpu.memory_space<vmem>>, vector<1x224xf32>
    %4 = vector.broadcast %3 : vector<1x224xf32> to vector<2x224xf32>
    %5 = arith.addf %2, %4 : vector<2x224xf32>
    %c0_5 = arith.constant 0 : index
    %c0_6 = arith.constant 0 : index
    %6 = vector.load %arg4[%c0_5, %c0_6] : memref<2x224xf32, #tpu.memory_space<vmem>>, vector<2x224xf32>
    %7 = arith.addf %5, %6 : vector<2x224xf32>
    %cst_7 = arith.constant 0.000000e+00 : f32
    %8 = vector.broadcast %cst_7 : f32 to vector<2x224xf32>
    %9 = arith.maximumf %7, %8 : vector<2x224xf32>
    %c0_8 = arith.constant 0 : index
    %c0_9 = arith.constant 0 : index
    %10 = vector.load %arg5[%c0_8, %c0_9] : memref<2x224xf32, #tpu.memory_space<vmem>>, vector<2x224xf32>
    tpu.vector_store %arg5[%c0_8, %c0_9], %9 {strides = array<i32>} : memref<2x224xf32, #tpu.memory_space<vmem>>, vector<2x224xf32>,
    return
  }
  func.func @transform_0(%arg0: i32) -> (i32, i32) {
    %c0_i32 = arith.constant 0 : i32
    %c0_i32_0 = arith.constant 0 : i32
    return %arg0, %c0_i32 : i32, i32
  }
  func.func @transform_1(%arg0: i32) -> (i32, i32) {
    %c0_i32 = arith.constant 0 : i32
    %c0_i32_0 = arith.constant 0 : i32
    %c0_i32_1 = arith.constant 0 : i32
    return %c0_i32, %c0_i32_0 : i32, i32
  }
  func.func @transform_2(%arg0: i32) -> (i32, i32) {
    %c0_i32 = arith.constant 0 : i32
    %c0_i32_0 = arith.constant 0 : i32
    %c0_i32_1 = arith.constant 0 : i32
    return %c0_i32, %c0_i32_0 : i32, i32
  }
  func.func @transform_3(%arg0: i32) -> (i32, i32) {
    %c0_i32 = arith.constant 0 : i32
    %c0_i32_0 = arith.constant 0 : i32
    return %arg0, %c0_i32 : i32, i32
  }
  func.func @transform_4(%arg0: i32) -> (i32, i32) {
    %c0_i32 = arith.constant 0 : i32
    %c0_i32_0 = arith.constant 0 : i32
    return %arg0, %c0_i32 : i32, i32
  }
}

module attributes {stable_mosaic.version = 11 : i64} {
  func.func @_fused_mm_kernel(%arg0: i32, %arg1: memref<2x224xbf16, #tpu.memory_space<vmem>>, %arg2: memref<224x1024xbf16, #tpu.memory_space<vmem>>, %arg3: memref<1x1024xf32, #tpu.memory_space<vmem>>, %arg4: memref<2x1024xf32, #tpu.memory_space<vmem>>) attributes {dimension_semantics = [#tpu.dimension_semantics<parallel>], iteration_bounds = array<i64: 1>, scalar_prefetch = 0 : i64, scratch_operands = 0 : i64, tpu.core_type = #tpu.core_type<tc>, window_params = [{transform_indices = @transform_0, window_bounds = array<i64: 2, 224>}, {pipeline_mode = #tpu.pipeline_mode<synchronous>, transform_indices = @transform_1, window_bounds = array<i64: 224, 1024>}, {pipeline_mode = #tpu.pipeline_mode<synchronous>, transform_indices = @transform_2, window_bounds = array<i64: 1, 1024>}, {transform_indices = @transform_3, window_bounds = array<i64: 2, 1024>}]} {
    %c0 = arith.constant 0 : index
    %c0_0 = arith.constant 0 : index
    %0 = vector.load %arg1[%c0, %c0_0] : memref<2x224xbf16, #tpu.memory_space<vmem>>, vector<2x224xbf16>
    %c0_1 = arith.constant 0 : index
    %c0_2 = arith.constant 0 : index
    %1 = vector.load %arg2[%c0_1, %c0_2] : memref<224x1024xbf16, #tpu.memory_space<vmem>>, vector<224x1024xbf16>
    %cst = arith.constant dense<0.000000e+00> : vector<2x1024xf32>
    %2 = tpu.matmul %0, %1, %cst {dimension_numbers = #tpu.dot_dimension_numbers<[1], [0], [0], [1], [0, 0, 1, 1], [], []>} : vector<2x224xbf16>, vector<224x1024xbf16>, vector<2x1024xf32> -> vector<2x1024xf32>
    %c0_3 = arith.constant 0 : index
    %c0_4 = arith.constant 0 : index
    %3 = vector.load %arg3[%c0_3, %c0_4] : memref<1x1024xf32, #tpu.memory_space<vmem>>, vector<1x1024xf32>
    %4 = vector.broadcast %3 : vector<1x1024xf32> to vector<2x1024xf32>
    %5 = arith.addf %2, %4 : vector<2x1024xf32>
    %c0_5 = arith.constant 0 : index
    %c0_6 = arith.constant 0 : index
    %6 = vector.load %arg4[%c0_5, %c0_6] : memref<2x1024xf32, #tpu.memory_space<vmem>>, vector<2x1024xf32>
    tpu.vector_store %arg4[%c0_5, %c0_6], %5 {strides = array<i32>} : memref<2x1024xf32, #tpu.memory_space<vmem>>, vector<2x1024xf32>,
    return
  }
  func.func @transform_0(%arg0: i32) -> (i32, i32) {
    %c0_i32 = arith.constant 0 : i32
    %c0_i32_0 = arith.constant 0 : i32
    return %arg0, %c0_i32 : i32, i32
  }
  func.func @transform_1(%arg0: i32) -> (i32, i32) {
    %c0_i32 = arith.constant 0 : i32
    %c0_i32_0 = arith.constant 0 : i32
    %c0_i32_1 = arith.constant 0 : i32
    return %c0_i32, %c0_i32_0 : i32, i32
  }
  func.func @transform_2(%arg0: i32) -> (i32, i32) {
    %c0_i32 = arith.constant 0 : i32
    %c0_i32_0 = arith.constant 0 : i32
    %c0_i32_1 = arith.constant 0 : i32
    return %c0_i32, %c0_i32_0 : i32, i32
  }
  func.func @transform_3(%arg0: i32) -> (i32, i32) {
    %c0_i32 = arith.constant 0 : i32
    %c0_i32_0 = arith.constant 0 : i32
    return %arg0, %c0_i32 : i32, i32
  }
}

</mosaic_0001>

<bundles_post_ra>
// kernel: forward.24
= control target key start
LH: loop header
LB: loop body
LE: loop exit
PB: predicated region body
PF: predicated region fallthrough
CT: control target
= control target key end

     0   :  { %s780_s12 = smov 0   ;;  %s941_s0 = inlined_call_operand.vmem [shape: bf16[512,8], index: 0, kind: input, shape index: {}]   ;;  %s942_s1 = inlined_call_operand.vmem [shape: bf16[8,8], index: 1, kind: input, shape index: {}]   ;;  %s943_s2 = inlined_call_operand.vmem [shape: f32[1,8], index: 2, kind: input, shape index: {}]   ;;  %s944_s3 = inlined_call_operand.vmem [shape: f32[512,8], index: 3, kind: output, shape index: {}]  }
   0x1 LB: > { %s629_s13 = sadd.s32 4294967295, %s758_s12   ;;  %p633_p0 = scmp.ge.s32.totalorder %s758_s12, 1  ;;  %s758_s12 = sphi %s780_s12, %s13_s12  }
   0x2   : > { %p138_p1 = scmp.lt.s32.totalorder %s758_s12, 3 }
   0x4   : > { %p139_p2 = pnand %p633_p0, %p138_p1 }
   0x5   : > { %s634_s16 = sshll.u32 (!%p139_p2), %s629_s13, 5 }
   0x6   : > { %142 = sbr.rel (%p139_p2) target bundleno = 245 (0xf5), region = 32  ;;  %p163_p3 = scmp.lt.s32.totalorder (!%p139_p2), %s634_s16, 63 }
   0xb   : > { %v207_v0 = vld [vmem:[%s942_s1] sm:$0xf]  ;;  %vm344_vm0 = vcmask 1043456   ;;  %s946_s16 = smov (!%p163_p3, %s634_s16), 63  ;;  %vm295_vm1 = vcmask 64512  }
   0xc   : > { %726 = vmatprep.subr.msk.bf16.mxu0 %vm344_vm0, %v207_v0  ;;  %727 = vmatprep.subr.msk.bf16.mxu1 %vm344_vm0, %v207_v0  ;;  %v346_v1 = vsel %vm344_vm0, %v207_v0, 0  ;;  %s635_s17 = sshll.u32 %s946_s16, 2  ;;  %v834_v18 = vld [vmem:[%s943_s2] ss:$0 sm:$0xff]  ;;  %s637_s23 = sshll.u32 %s946_s16, 3 }
   0xd   : > { %691 = vmatpush3.bf16.msra.mxu0 %v346_v1  ;;  %725 = vmatpush3.bf16.msra.mxu1 %v346_v1  ;;  %s797_s20 = scalar_lea.vmem %s941_s0, %s635_s17  ;;  %s841_s26 = scalar_lea.vmem %s944_s3, %s637_s23 }
   0xe   : > { %v736_v2 = vld [vmem:[%s797_s20] sm:$0xff]   ;;  %v738_v4 = vld [vmem:[%s797_s20 + $0x8] sm:$0xff]   ;;  %v740_v6 = vld [vmem:[%s797_s20 + $0x10] sm:$0xff]  }
   0xf   : > { %v737_v3 = vld [vmem:[%s797_s20 + $0x40] sm:$0xff]   ;;  %692 = vmatprep.mubr.msk.bf16.mxu0 %vm295_vm1, %v736_v2  ;;  %v739_v5 = vld [vmem:[%s797_s20 + $0x48] sm:$0xff]   ;;  %v741_v7 = vld [vmem:[%s797_s20 + $0x50] sm:$0xff]  }
  0x10   : > { %708 = vmatprep.mubr.msk.bf16.mxu1 %vm295_vm1, %v737_v3  ;;  %693 = vmatmul.mubr.msk.bf16.vlgmr.msra.gmra.mxu0 %vm295_vm1, %v738_v4  ;;  %v742_v8 = vld [vmem:[%s797_s20 + $0x18] sm:$0xff]   ;;  %v744_v10 = vld [vmem:[%s797_s20 + $0x20] sm:$0xff]   ;;  %v746_v12 = vld [vmem:[%s797_s20 + $0x28] sm:$0xff]  }
  0x11   : > { %709 = vmatmul.mubr.msk.bf16.vlgmr.msra.gmra.mxu1 %vm295_vm1, %v739_v5  ;;  %696 = vmatprep.mubr.msk.bf16.mxu0 %vm295_vm1, %v740_v6  ;;  %v743_v9 = vld [vmem:[%s797_s20 + $0x58] sm:$0xff]   ;;  %v745_v11 = vld [vmem:[%s797_s20 + $0x60] sm:$0xff]   ;;  %v747_v13 = vld [vmem:[%s797_s20 + $0x68] sm:$0xff]  }
  0x12   : > { %712 = vmatprep.mubr.msk.bf16.mxu1 %vm295_vm1, %v741_v7  ;;  %v748_v14 = vld [vmem:[%s797_s20 + $0x30] sm:$0xff]   ;;  %v750_v16 = vld [vmem:[%s797_s20 + $0x38] sm:$0xff]  }
  0x13   : > { %v749_v15 = vld [vmem:[%s797_s20 + $0x70] sm:$0xff]   ;;  %v751_v17 = vld [vmem:[%s797_s20 + $0x78] sm:$0xff]  }
  0x18   : > { %697 = vmatmul.mubr.msk.bf16.gmra.mxu0 %vm295_vm1, %v742_v8 }
  0x19   : > { %713 = vmatmul.mubr.msk.bf16.gmra.mxu1 %vm295_vm1, %v743_v9  ;;  %700 = vmatprep.mubr.msk.bf16.mxu0 %vm295_vm1, %v744_v10 }
  0x1a   : > { %716 = vmatprep.mubr.msk.bf16.mxu1 %vm295_vm1, %v745_v11 }
  0x20   : > { %701 = vmatmul.mubr.msk.bf16.gmra.mxu0 %vm295_vm1, %v746_v12 }
  0x21   : > { %717 = vmatmul.mubr.msk.bf16.gmra.mxu1 %vm295_vm1, %v747_v13  ;;  %704 = vmatprep.mubr.msk.bf16.mxu0 %vm295_vm1, %v748_v14 }
  0x22   : > { %720 = vmatprep.mubr.msk.bf16.mxu1 %vm295_vm1, %v749_v15 }
  0x28   : > { %705 = vmatmul.mubr.msk.bf16.gmra.mxu0 %vm295_vm1, %v750_v16 }
  0x29   : > { %721 = vmatmul.mubr.msk.bf16.gmra.mxu1 %vm295_vm1, %v751_v17 }
  0xd0   : > { %v694_v19 = vpop.f32.mrf.mxu0 }
  0xd1   : > { %v391_v20 = vadd.f32 %v694_v19, %v834_v18  ;;  %v710_v21 = vpop.f32.mrf.mxu1 }
  0xd2   : > { %v455_v22 = vadd.f32 %v710_v21, %v834_v18  ;;  %v382_v23 = vpop.f32.mrf.mxu0 }
  0xd3   : > { %v511_v24 = vmax.f32 %v391_v20, 0.0  ;;  %v383_v25 = vadd.f32 %v834_v18, %v382_v23  ;;  %v446_v26 = vpop.f32.mrf.mxu1 }
  0xd4   : > { %v527_v27 = vmax.f32 %v455_v22, 0.0  ;;  %v447_v28 = vadd.f32 %v834_v18, %v446_v26  ;;  %v695_v29 = vpop.f32.mrf.mxu0 }
  0xd5   : > { %543 = vst.msk [vmem:[%s841_s26 + $0x10] sm:$0xff] %vm295_vm1, %v511_v24  ;;  %v509_v30 = vmax.f32 %v383_v25, 0.0  ;;  %v394_v31 = vadd.f32 %v695_v29, %v834_v18  ;;  %v711_v32 = vpop.f32.mrf.mxu1 }
  0xd6   : > { %559 = vst.msk [vmem:[%s841_s26 + $0x90] sm:$0xff] %vm295_vm1, %v527_v27  ;;  %v525_v33 = vmax.f32 %v447_v28, 0.0  ;;  %v458_v34 = vadd.f32 %v711_v32, %v834_v18  ;;  %v385_v35 = vpop.f32.mrf.mxu0 }
  0xd7   : > { %541 = vst.msk [vmem:[%s841_s26] sm:$0xff] %vm295_vm1, %v509_v30  ;;  %v512_v36 = vmax.f32 %v394_v31, 0.0  ;;  %v386_v37 = vadd.f32 %v834_v18, %v385_v35  ;;  %v449_v38 = vpop.f32.mrf.mxu1 }
  0xd8   : > { %557 = vst.msk [vmem:[%s841_s26 + $0x80] sm:$0xff] %vm295_vm1, %v525_v33  ;;  %v528_v39 = vmax.f32 %v458_v34, 0.0  ;;  %v450_v40 = vadd.f32 %v834_v18, %v449_v38  ;;  %v698_v41 = vpop.f32.mrf.mxu0 }
  0xd9   : > { %544 = vst.msk [vmem:[%s841_s26 + $0x18] sm:$0xff] %vm295_vm1, %v512_v36  ;;  %v510_v42 = vmax.f32 %v386_v37, 0.0  ;;  %v407_v43 = vadd.f32 %v698_v41, %v834_v18  ;;  %v714_v44 = vpop.f32.mrf.mxu1 }
  0xda   : > { %560 = vst.msk [vmem:[%s841_s26 + $0x98] sm:$0xff] %vm295_vm1, %v528_v39  ;;  %v526_v45 = vmax.f32 %v450_v40, 0.0  ;;  %v471_v46 = vadd.f32 %v714_v44, %v834_v18  ;;  %v398_v47 = vpop.f32.mrf.mxu0 }
  0xdb   : > { %542 = vst.msk [vmem:[%s841_s26 + $0x8] sm:$0xff] %vm295_vm1, %v510_v42  ;;  %v515_v48 = vmax.f32 %v407_v43, 0.0  ;;  %v399_v49 = vadd.f32 %v834_v18, %v398_v47  ;;  %v462_v50 = vpop.f32.mrf.mxu1 }
  0xdc   : > { %558 = vst.msk [vmem:[%s841_s26 + $0x88] sm:$0xff] %vm295_vm1, %v526_v45  ;;  %v531_v51 = vmax.f32 %v471_v46, 0.0  ;;  %v463_v52 = vadd.f32 %v834_v18, %v462_v50  ;;  %v699_v53 = vpop.f32.mrf.mxu0 }
  0xdd   : > { %547 = vst.msk [vmem:[%s841_s26 + $0x30] sm:$0xff] %vm295_vm1, %v515_v48  ;;  %v513_v54 = vmax.f32 %v399_v49, 0.0  ;;  %v410_v55 = vadd.f32 %v699_v53, %v834_v18  ;;  %v715_v56 = vpop.f32.mrf.mxu1 }
  0xde   : > { %563 = vst.msk [vmem:[%s841_s26 + $0xb0] sm:$0xff] %vm295_vm1, %v531_v51  ;;  %v529_v57 = vmax.f32 %v463_v52, 0.0  ;;  %v474_v58 = vadd.f32 %v715_v56, %v834_v18  ;;  %v401_v59 = vpop.f32.mrf.mxu0 }
  0xdf   : > { %545 = vst.msk [vmem:[%s841_s26 + $0x20] sm:$0xff] %vm295_vm1, %v513_v54  ;;  %v516_v60 = vmax.f32 %v410_v55, 0.0  ;;  %v402_v61 = vadd.f32 %v834_v18, %v401_v59  ;;  %v465_v62 = vpop.f32.mrf.mxu1 }
  0xe0   : > { %561 = vst.msk [vmem:[%s841_s26 + $0xa0] sm:$0xff] %vm295_vm1, %v529_v57  ;;  %v532_v63 = vmax.f32 %v474_v58, 0.0  ;;  %v466_v0 = vadd.f32 %v834_v18, %v465_v62  ;;  %v702_v1 = vpop.f32.mrf.mxu0 }
  0xe1   : > { %548 = vst.msk [vmem:[%s841_s26 + $0x38] sm:$0xff] %vm295_vm1, %v516_v60  ;;  %v514_v2 = vmax.f32 %v402_v61, 0.0  ;;  %v423_v3 = vadd.f32 %v702_v1, %v834_v18  ;;  %v718_v4 = vpop.f32.mrf.mxu1 }
  0xe2   : > { %564 = vst.msk [vmem:[%s841_s26 + $0xb8] sm:$0xff] %vm295_vm1, %v532_v63  ;;  %v530_v5 = vmax.f32 %v466_v0, 0.0  ;;  %v487_v6 = vadd.f32 %v718_v4, %v834_v18  ;;  %v414_v7 = vpop.f32.mrf.mxu0 }
  0xe3   : > { %546 = vst.msk [vmem:[%s841_s26 + $0x28] sm:$0xff] %vm295_vm1, %v514_v2  ;;  %v519_v8 = vmax.f32 %v423_v3, 0.0  ;;  %v415_v9 = vadd.f32 %v834_v18, %v414_v7  ;;  %v478_v10 = vpop.f32.mrf.mxu1 }
  0xe4   : > { %562 = vst.msk [vmem:[%s841_s26 + $0xa8] sm:$0xff] %vm295_vm1, %v530_v5  ;;  %v535_v11 = vmax.f32 %v487_v6, 0.0  ;;  %v479_v12 = vadd.f32 %v834_v18, %v478_v10  ;;  %v703_v13 = vpop.f32.mrf.mxu0 }
  0xe5   : > { %551 = vst.msk [vmem:[%s841_s26 + $0x50] sm:$0xff] %vm295_vm1, %v519_v8  ;;  %v517_v14 = vmax.f32 %v415_v9, 0.0  ;;  %v426_v15 = vadd.f32 %v703_v13, %v834_v18  ;;  %v719_v16 = vpop.f32.mrf.mxu1 }
  0xe6   : > { %567 = vst.msk [vmem:[%s841_s26 + $0xd0] sm:$0xff] %vm295_vm1, %v535_v11  ;;  %v533_v17 = vmax.f32 %v479_v12, 0.0  ;;  %v490_v19 = vadd.f32 %v719_v16, %v834_v18  ;;  %v417_v20 = vpop.f32.mrf.mxu0 }
  0xe7   : > { %549 = vst.msk [vmem:[%s841_s26 + $0x40] sm:$0xff] %vm295_vm1, %v517_v14  ;;  %v520_v21 = vmax.f32 %v426_v15, 0.0  ;;  %v418_v22 = vadd.f32 %v834_v18, %v417_v20  ;;  %v481_v23 = vpop.f32.mrf.mxu1 }
  0xe8   : > { %565 = vst.msk [vmem:[%s841_s26 + $0xc0] sm:$0xff] %vm295_vm1, %v533_v17  ;;  %v536_v24 = vmax.f32 %v490_v19, 0.0  ;;  %v482_v25 = vadd.f32 %v834_v18, %v481_v23  ;;  %v706_v26 = vpop.f32.mrf.mxu0 }
  0xe9   : > { %552 = vst.msk [vmem:[%s841_s26 + $0x58] sm:$0xff] %vm295_vm1, %v520_v21  ;;  %v518_v27 = vmax.f32 %v418_v22, 0.0  ;;  %v439_v28 = vadd.f32 %v706_v26, %v834_v18  ;;  %v722_v29 = vpop.f32.mrf.mxu1 }
  0xea   : > { %568 = vst.msk [vmem:[%s841_s26 + $0xd8] sm:$0xff] %vm295_vm1, %v536_v24  ;;  %v534_v30 = vmax.f32 %v482_v25, 0.0  ;;  %v503_v31 = vadd.f32 %v722_v29, %v834_v18  ;;  %v430_v32 = vpop.f32.mrf.mxu0 }
  0xeb   : > { %550 = vst.msk [vmem:[%s841_s26 + $0x48] sm:$0xff] %vm295_vm1, %v518_v27  ;;  %v523_v33 = vmax.f32 %v439_v28, 0.0  ;;  %v431_v34 = vadd.f32 %v834_v18, %v430_v32  ;;  %v494_v35 = vpop.f32.mrf.mxu1 }
  0xec   : > { %566 = vst.msk [vmem:[%s841_s26 + $0xc8] sm:$0xff] %vm295_vm1, %v534_v30  ;;  %v539_v36 = vmax.f32 %v503_v31, 0.0  ;;  %v495_v37 = vadd.f32 %v834_v18, %v494_v35  ;;  %v707_v38 = vpop.f32.mrf.mxu0 }
  0xed   : > { %555 = vst.msk [vmem:[%s841_s26 + $0x70] sm:$0xff] %vm295_vm1, %v523_v33  ;;  %v521_v39 = vmax.f32 %v431_v34, 0.0  ;;  %v442_v40 = vadd.f32 %v707_v38, %v834_v18  ;;  %v723_v41 = vpop.f32.mrf.mxu1 }
  0xee   : > { %571 = vst.msk [vmem:[%s841_s26 + $0xf0] sm:$0xff] %vm295_vm1, %v539_v36  ;;  %v537_v42 = vmax.f32 %v495_v37, 0.0  ;;  %v506_v43 = vadd.f32 %v723_v41, %v834_v18  ;;  %v433_v44 = vpop.f32.mrf.mxu0 }
  0xef   : > { %553 = vst.msk [vmem:[%s841_s26 + $0x60] sm:$0xff] %vm295_vm1, %v521_v39  ;;  %v524_v45 = vmax.f32 %v442_v40, 0.0  ;;  %v434_v46 = vadd.f32 %v834_v18, %v433_v44  ;;  %v497_v47 = vpop.f32.mrf.mxu1 }
  0xf0   : > { %569 = vst.msk [vmem:[%s841_s26 + $0xe0] sm:$0xff] %vm295_vm1, %v537_v42  ;;  %v540_v48 = vmax.f32 %v506_v43, 0.0  ;;  %v498_v49 = vadd.f32 %v834_v18, %v497_v47 }
  0xf1   : > { %556 = vst.msk [vmem:[%s841_s26 + $0x78] sm:$0xff] %vm295_vm1, %v524_v45  ;;  %v522_v50 = vmax.f32 %v434_v46, 0.0 }
  0xf2   : > { %572 = vst.msk [vmem:[%s841_s26 + $0xf8] sm:$0xff] %vm295_vm1, %v540_v48  ;;  %v538_v51 = vmax.f32 %v498_v49, 0.0 }
  0xf3   : > { %554 = vst.msk [vmem:[%s841_s26 + $0x68] sm:$0xff] %vm295_vm1, %v522_v50 }
  0xf4   : > { %570 = vst.msk [vmem:[%s841_s26 + $0xe8] sm:$0xff] %vm295_vm1, %v538_v51 }
  0xf5 PF: > { %s13_s12 = sadd.s32 1, %s758_s12  }
  0xf6   : > { %p10_p4 = scmp.ge.s32.totalorder %s13_s12, 4  }
  0xf8   :  { %12 = sbr.rel (!%p10_p4) target bundleno = 1 (0x1), region = 62 }

// kernel: forward.23
= control target key start
LH: loop header
LB: loop body
LE: loop exit
PB: predicated region body
PF: predicated region fallthrough
CT: control target
= control target key end

     0   :  { %s965_s12 = smov 0   ;;  %s1172_s0 = inlined_call_operand.vmem [shape: bf16[512,147], index: 0, kind: input, shape index: {}]   ;;  %s1173_s1 = inlined_call_operand.vmem [shape: bf16[147,8], index: 1, kind: input, shape index: {}]   ;;  %s1174_s2 = inlined_call_operand.vmem [shape: f32[1,8], index: 2, kind: input, shape index: {}]   ;;  %s1175_s3 = inlined_call_operand.vmem [shape: f32[512,8], index: 3, kind: output, shape index: {}]  }
   0x1 LB: > { %s775_s13 = sadd.s32 4294967295, %s941_s12   ;;  %p779_p0 = scmp.ge.s32.totalorder %s941_s12, 1  ;;  %s941_s12 = sphi %s965_s12, %s13_s12  }
   0x2   : > { %p139_p1 = scmp.lt.s32.totalorder %s941_s12, 3 }
   0x4   : > { %p140_p2 = pnand %p779_p0, %p139_p1 }
   0x5   : > { %s780_s20 = sshll.u32 (!%p140_p2), %s775_s13, 5 }
   0x6   : > { %143 = sbr.rel (%p140_p2) target bundleno = 310 (0x136), region = 32  ;;  %p165_p3 = scmp.lt.s32.totalorder (!%p140_p2), %s780_s20, 63 }
   0xb   : > { %v877_v0 = vld [vmem:[%s1173_s1 + $0x38] sm:$0xff]   ;;  %v943_v1 = vmov 0   ;;  %v878_v2 = vld [vmem:[%s1173_s1 + $0x30] sm:$0xff]   ;;  %v879_v3 = vld [vmem:[%s1173_s1 + $0x28] sm:$0xff]   ;;  %s1177_s20 = smov (!%p165_p3, %s780_s20), 63  ;;  %vm437_vm0 = vcmask 154624  }
   0xc   : > { %493 = vmatprep.subr.bf16.mxu0 %v943_v1  ;;  %847 = vmatprep.subr.bf16.mxu1 %v943_v1  ;;  %v880_v4 = vld [vmem:[%s1173_s1 + $0x20] sm:$0xff]   ;;  %s846_s23 = sshll.u32 %s1177_s20, 3  ;;  %v881_v5 = vld [vmem:[%s1173_s1 + $0x18] sm:$0xff]   ;;  %v882_v8 = vld [vmem:[%s1173_s1 + $0x10] sm:$0xff]   ;;  %vm486_vm1 = vcmask 1040384   ;;  %vm487_vm2 = vcmask 1041408  }
   0xd   : > { %494 = vmatpush1.bf16.msra.mxu0 %v877_v0  ;;  %857 = vmatpush1.bf16.msra.mxu1 %v877_v0  ;;  %s993_s26 = scalar_lea.vmem %s1172_s0, %s846_s23  ;;  %v883_v9 = vld [vmem:[%s1173_s1 + $0x8] sm:$0xff]   ;;  %v944_v10 = vmov 65535   ;;  %v884_v12 = vld [vmem:[%s1173_s1] sm:$0xff]   ;;  %s1073_s17 = scalar_lea.vmem %s1175_s3, %s846_s23  ;;  %vm686_vm3 = vcmask 64512  }
   0xe   : > { %495 = vmatprep.subr.bf16.mxu0 %v943_v1  ;;  %848 = vmatprep.subr.bf16.mxu1 %v943_v1  ;;  %v889_v6 = vld [vmem:[%s993_s26 + $0x4] ss:$8 sps:$4 sm:$0xff]   ;;  %v488_v11 = vsel %vm486_vm1, 4294967295, %v944_v10  ;;  %v885_v13 = vld [vmem:[%s1173_s1 + $0x48] ss:$0 sps:$4 sm:$0x33]  }
   0xf   : > { %v892_v7 = vld [vmem:[%s993_s26 + $0x84] ss:$8 sps:$4 sm:$0xff]   ;;  %828 = vmatprep.mubr.msk.bf16.mxu0 %vm437_vm0, %v889_v6  ;;  %v489_v14 = vsel %vm487_vm2, %v488_v11, 0  ;;  %v887_v17 = vld [vmem:[%s993_s26] ss:$8 sps:$4 sm:$0xff]  }
  0x10   : > { %836 = vmatprep.mubr.msk.bf16.mxu1 %vm437_vm0, %v892_v7  ;;  %v491_v15 = vand.u32 %v885_v13, %v489_v14  ;;  %v886_v16 = vld [vmem:[%s1173_s1 + $0x40] sm:$0xff]   ;;  %v893_v19 = vld [vmem:[%s993_s26 + $0x14] ss:$8 sps:$4 sm:$0xff]   ;;  %v897_v21 = vld [vmem:[%s993_s26 + $0x10] ss:$8 sps:$4 sm:$0xff]  }
  0x11   : > { %496 = vmatpush1.bf16.msra.mxu0 %v878_v2  ;;  %858 = vmatpush1.bf16.msra.mxu1 %v878_v2  ;;  %v890_v18 = vld [vmem:[%s993_s26 + $0x80] ss:$8 sps:$4 sm:$0xff]   ;;  %v895_v20 = vld [vmem:[%s993_s26 + $0x94] ss:$8 sps:$4 sm:$0xff]   ;;  %v898_v22 = vld [vmem:[%s993_s26 + $0x90] ss:$8 sps:$4 sm:$0xff]  }
  0x12   : > { %497 = vmatprep.subr.bf16.mxu0 %v943_v1  ;;  %849 = vmatprep.subr.bf16.mxu1 %v943_v1  ;;  %v899_v23 = vld [vmem:[%s993_s26 + $0x24] ss:$8 sps:$4 sm:$0xff]   ;;  %v903_v25 = vld [vmem:[%s993_s26 + $0x20] ss:$8 sps:$4 sm:$0xff]   ;;  %v905_v27 = vld [vmem:[%s993_s26 + $0x34] ss:$8 sps:$4 sm:$0xff]  }
  0x13   : > { %v901_v24 = vld [vmem:[%s993_s26 + $0xa4] ss:$8 sps:$4 sm:$0xff]   ;;  %v904_v26 = vld [vmem:[%s993_s26 + $0xa0] ss:$8 sps:$4 sm:$0xff]   ;;  %v907_v28 = vld [vmem:[%s993_s26 + $0xb4] ss:$8 sps:$4 sm:$0xff]  }
  0x14   : > { %v909_v29 = vld [vmem:[%s993_s26 + $0x30] ss:$8 sps:$4 sm:$0xff]   ;;  %v911_v31 = vld [vmem:[%s993_s26 + $0x44] ss:$8 sps:$4 sm:$0xff]   ;;  %v915_v33 = vld [vmem:[%s993_s26 + $0x40] ss:$8 sps:$4 sm:$0xff]  }
  0x15   : > { %498 = vmatpush1.bf16.msra.mxu0 %v879_v3  ;;  %859 = vmatpush1.bf16.msra.mxu1 %v879_v3  ;;  %v910_v30 = vld [vmem:[%s993_s26 + $0xb0] ss:$8 sps:$4 sm:$0xff]   ;;  %v913_v32 = vld [vmem:[%s993_s26 + $0xc4] ss:$8 sps:$4 sm:$0xff]   ;;  %v916_v34 = vld [vmem:[%s993_s26 + $0xc0] ss:$8 sps:$4 sm:$0xff]  }
  0x16   : > { %499 = vmatprep.subr.bf16.mxu0 %v943_v1  ;;  %850 = vmatprep.subr.bf16.mxu1 %v943_v1  ;;  %v917_v35 = vld [vmem:[%s993_s26 + $0x54] ss:$8 sps:$4 sm:$0xff]   ;;  %v921_v37 = vld [vmem:[%s993_s26 + $0x50] ss:$8 sps:$4 sm:$0xff]   ;;  %v923_v39 = vld [vmem:[%s993_s26 + $0x64] ss:$8 sps:$4 sm:$0xff]  }
  0x17   : > { %v919_v36 = vld [vmem:[%s993_s26 + $0xd4] ss:$8 sps:$4 sm:$0xff]   ;;  %v922_v38 = vld [vmem:[%s993_s26 + $0xd0] ss:$8 sps:$4 sm:$0xff]   ;;  %v925_v40 = vld [vmem:[%s993_s26 + $0xe4] ss:$8 sps:$4 sm:$0xff]  }
  0x18   : > { %v927_v41 = vld [vmem:[%s993_s26 + $0x60] ss:$8 sps:$4 sm:$0xff]   ;;  %v929_v43 = vld [vmem:[%s993_s26 + $0x74] ss:$8 sps:$4 sm:$0xff]   ;;  %v933_v45 = vld [vmem:[%s993_s26 + $0x70] ss:$8 sps:$4 sm:$0xff]  }
  0x19   : > { %500 = vmatpush1.bf16.msra.mxu0 %v880_v4  ;;  %860 = vmatpush1.bf16.msra.mxu1 %v880_v4  ;;  %v928_v42 = vld [vmem:[%s993_s26 + $0xe0] ss:$8 sps:$4 sm:$0xff]   ;;  %v931_v44 = vld [vmem:[%s993_s26 + $0xf4] ss:$8 sps:$4 sm:$0xff]   ;;  %v934_v46 = vld [vmem:[%s993_s26 + $0xf0] ss:$8 sps:$4 sm:$0xff]  }
  0x1a   : > { %501 = vmatprep.subr.bf16.mxu0 %v943_v1  ;;  %851 = vmatprep.subr.bf16.mxu1 %v943_v1  ;;  %v1064_v47 = vld [vmem:[%s1174_s2] ss:$0 sm:$0xff] }
  0x1d   : > { %502 = vmatpush1.bf16.msra.mxu0 %v881_v5  ;;  %861 = vmatpush1.bf16.msra.mxu1 %v881_v5 }
  0x1e   : > { %503 = vmatprep.subr.bf16.mxu0 %v943_v1  ;;  %852 = vmatprep.subr.bf16.mxu1 %v943_v1 }
  0x21   : > { %504 = vmatpush1.bf16.msra.mxu0 %v882_v8  ;;  %862 = vmatpush1.bf16.msra.mxu1 %v882_v8 }
  0x22   : > { %505 = vmatprep.subr.bf16.mxu0 %v943_v1  ;;  %853 = vmatprep.subr.bf16.mxu1 %v943_v1 }
  0x25   : > { %506 = vmatpush1.bf16.msra.mxu0 %v883_v9  ;;  %863 = vmatpush1.bf16.msra.mxu1 %v883_v9 }
  0x26   : > { %507 = vmatprep.subr.bf16.mxu0 %v943_v1  ;;  %854 = vmatprep.subr.bf16.mxu1 %v943_v1 }
  0x29   : > { %508 = vmatpush1.bf16.msra.mxu0 %v884_v12  ;;  %864 = vmatpush1.bf16.msra.mxu1 %v884_v12 }
  0x2a   : > { %521 = vmatprep.subr.bf16.mxu0 %v943_v1  ;;  %855 = vmatprep.subr.bf16.mxu1 %v943_v1 }
  0x2d   : > { %522 = vmatpush2.bf16.msra.mxu0 %v491_v15  ;;  %865 = vmatpush2.bf16.msra.mxu1 %v491_v15 }
  0x2e   : > { %523 = vmatprep.subr.bf16.mxu0 %v943_v1  ;;  %856 = vmatprep.subr.bf16.mxu1 %v943_v1 }
  0x31   : > { %524 = vmatpush2.bf16.msra.mxu0 %v886_v16  ;;  %866 = vmatpush2.bf16.msra.mxu1 %v886_v16 }
  0x34   : > { %526 = vmatmul.mubr.bf16.vlgmr.msra.gmra.mxu0 %v887_v17  ;;  %590 = vmatmul.mubr.bf16.vlgmr.msra.gmra.mxu1 %v890_v18 }
  0x35   : > { %829 = vmatprep.mubr.msk.bf16.mxu0 %vm437_vm0, %v893_v19  ;;  %837 = vmatprep.mubr.msk.bf16.mxu1 %vm437_vm0, %v895_v20 }
  0x3c   : > { %534 = vmatmul.mubr.bf16.gmra.mxu0 %v897_v21  ;;  %598 = vmatmul.mubr.bf16.gmra.mxu1 %v898_v22 }
  0x3d   : > { %830 = vmatprep.mubr.msk.bf16.mxu0 %vm437_vm0, %v899_v23  ;;  %838 = vmatprep.mubr.msk.bf16.mxu1 %vm437_vm0, %v901_v24 }
  0x44   : > { %542 = vmatmul.mubr.bf16.gmra.mxu0 %v903_v25  ;;  %606 = vmatmul.mubr.bf16.gmra.mxu1 %v904_v26 }
  0x45   : > { %831 = vmatprep.mubr.msk.bf16.mxu0 %vm437_vm0, %v905_v27  ;;  %839 = vmatprep.mubr.msk.bf16.mxu1 %vm437_vm0, %v907_v28 }
  0x4c   : > { %550 = vmatmul.mubr.bf16.gmra.mxu0 %v909_v29  ;;  %614 = vmatmul.mubr.bf16.gmra.mxu1 %v910_v30 }
  0x4d   : > { %832 = vmatprep.mubr.msk.bf16.mxu0 %vm437_vm0, %v911_v31  ;;  %840 = vmatprep.mubr.msk.bf16.mxu1 %vm437_vm0, %v913_v32 }
  0x54   : > { %558 = vmatmul.mubr.bf16.gmra.mxu0 %v915_v33  ;;  %622 = vmatmul.mubr.bf16.gmra.mxu1 %v916_v34 }
  0x55   : > { %833 = vmatprep.mubr.msk.bf16.mxu0 %vm437_vm0, %v917_v35  ;;  %841 = vmatprep.mubr.msk.bf16.mxu1 %vm437_vm0, %v919_v36 }
  0x5c   : > { %566 = vmatmul.mubr.bf16.gmra.mxu0 %v921_v37  ;;  %630 = vmatmul.mubr.bf16.gmra.mxu1 %v922_v38 }
  0x5d   : > { %834 = vmatprep.mubr.msk.bf16.mxu0 %vm437_vm0, %v923_v39  ;;  %842 = vmatprep.mubr.msk.bf16.mxu1 %vm437_vm0, %v925_v40 }
  0x64   : > { %574 = vmatmul.mubr.bf16.gmra.mxu0 %v927_v41  ;;  %638 = vmatmul.mubr.bf16.gmra.mxu1 %v928_v42 }
  0x65   : > { %835 = vmatprep.mubr.msk.bf16.mxu0 %vm437_vm0, %v929_v43  ;;  %843 = vmatprep.mubr.msk.bf16.mxu1 %vm437_vm0, %v931_v44 }
  0x6c   : > { %582 = vmatmul.mubr.bf16.gmra.mxu0 %v933_v45  ;;  %646 = vmatmul.mubr.bf16.gmra.mxu1 %v934_v46 }
  0xf4   : > { %v527_v48 = vpop.f32.mrf.mxu0  ;;  %v591_v49 = vpop.f32.mrf.mxu1 }
  0xf5   : > { %v528_v50 = vadd.f32 %v1064_v47, %v527_v48  ;;  %v592_v51 = vadd.f32 %v1064_v47, %v591_v49 }
  0xf6   : > { %v529_v52 = vpop.f32.mrf.mxu0  ;;  %v593_v53 = vpop.f32.mrf.mxu1 }
  0xf7   : > { %v654_v54 = vmax.f32 %v528_v50, 0.0  ;;  %v670_v55 = vmax.f32 %v592_v51, 0.0 }
  0xf8   : > { %v530_v56 = vpop.f32.mrf.mxu0  ;;  %v594_v57 = vpop.f32.mrf.mxu1 }
  0xf9   : > { %687 = vst.msk [vmem:[%s1073_s17] sm:$0xff] %vm686_vm3, %v654_v54  ;;  %703 = vst.msk [vmem:[%s1073_s17 + $0x80] sm:$0xff] %vm686_vm3, %v670_v55  ;;  %v531_v58 = vadd.f32 %v1064_v47, %v530_v56  ;;  %v595_v59 = vadd.f32 %v1064_v47, %v594_v57 }
  0xfa   : > { %v532_v60 = vpop.f32.mrf.mxu0  ;;  %v596_v61 = vpop.f32.mrf.mxu1 }
  0xfb   : > { %v655_v62 = vmax.f32 %v531_v58, 0.0  ;;  %v671_v63 = vmax.f32 %v595_v59, 0.0 }
  0xfc   : > { %v535_v0 = vpop.f32.mrf.mxu0  ;;  %v599_v1 = vpop.f32.mrf.mxu1 }
  0xfd   : > { %688 = vst.msk [vmem:[%s1073_s17 + $0x8] sm:$0xff] %vm686_vm3, %v655_v62  ;;  %704 = vst.msk [vmem:[%s1073_s17 + $0x88] sm:$0xff] %vm686_vm3, %v671_v63  ;;  %v536_v2 = vadd.f32 %v1064_v47, %v535_v0  ;;  %v600_v3 = vadd.f32 %v1064_v47, %v599_v1 }
  0xfe   : > { %v537_v4 = vpop.f32.mrf.mxu0  ;;  %v601_v5 = vpop.f32.mrf.mxu1 }
  0xff   : > { %v656_v6 = vmax.f32 %v536_v2, 0.0  ;;  %v672_v7 = vmax.f32 %v600_v3, 0.0 }
 0x100   : > { %v538_v8 = vpop.f32.mrf.mxu0  ;;  %v602_v9 = vpop.f32.mrf.mxu1 }
 0x101   : > { %689 = vst.msk [vmem:[%s1073_s17 + $0x10] sm:$0xff] %vm686_vm3, %v656_v6  ;;  %705 = vst.msk [vmem:[%s1073_s17 + $0x90] sm:$0xff] %vm686_vm3, %v672_v7  ;;  %v539_v10 = vadd.f32 %v1064_v47, %v538_v8  ;;  %v603_v11 = vadd.f32 %v1064_v47, %v602_v9 }
 0x102   : > { %v540_v12 = vpop.f32.mrf.mxu0  ;;  %v604_v13 = vpop.f32.mrf.mxu1 }
 0x103   : > { %v657_v14 = vmax.f32 %v539_v10, 0.0  ;;  %v673_v15 = vmax.f32 %v603_v11, 0.0 }
 0x104   : > { %v543_v16 = vpop.f32.mrf.mxu0  ;;  %v607_v17 = vpop.f32.mrf.mxu1 }
 0x105   : > { %690 = vst.msk [vmem:[%s1073_s17 + $0x18] sm:$0xff] %vm686_vm3, %v657_v14  ;;  %706 = vst.msk [vmem:[%s1073_s17 + $0x98] sm:$0xff] %vm686_vm3, %v673_v15  ;;  %v544_v18 = vadd.f32 %v1064_v47, %v543_v16  ;;  %v608_v19 = vadd.f32 %v1064_v47, %v607_v17 }
 0x106   : > { %v545_v20 = vpop.f32.mrf.mxu0  ;;  %v609_v21 = vpop.f32.mrf.mxu1 }
 0x107   : > { %v658_v22 = vmax.f32 %v544_v18, 0.0  ;;  %v674_v23 = vmax.f32 %v608_v19, 0.0 }
 0x108   : > { %v546_v24 = vpop.f32.mrf.mxu0  ;;  %v610_v25 = vpop.f32.mrf.mxu1 }
 0x109   : > { %691 = vst.msk [vmem:[%s1073_s17 + $0x20] sm:$0xff] %vm686_vm3, %v658_v22  ;;  %707 = vst.msk [vmem:[%s1073_s17 + $0xa0] sm:$0xff] %vm686_vm3, %v674_v23  ;;  %v547_v26 = vadd.f32 %v1064_v47, %v546_v24  ;;  %v611_v27 = vadd.f32 %v1064_v47, %v610_v25 }
 0x10a   : > { %v548_v28 = vpop.f32.mrf.mxu0  ;;  %v612_v29 = vpop.f32.mrf.mxu1 }
 0x10b   : > { %v659_v30 = vmax.f32 %v547_v26, 0.0  ;;  %v675_v31 = vmax.f32 %v611_v27, 0.0 }
 0x10c   : > { %v551_v32 = vpop.f32.mrf.mxu0  ;;  %v615_v33 = vpop.f32.mrf.mxu1 }
 0x10d   : > { %692 = vst.msk [vmem:[%s1073_s17 + $0x28] sm:$0xff] %vm686_vm3, %v659_v30  ;;  %708 = vst.msk [vmem:[%s1073_s17 + $0xa8] sm:$0xff] %vm686_vm3, %v675_v31  ;;  %v552_v34 = vadd.f32 %v1064_v47, %v551_v32  ;;  %v616_v35 = vadd.f32 %v1064_v47, %v615_v33 }
 0x10e   : > { %v553_v36 = vpop.f32.mrf.mxu0  ;;  %v617_v37 = vpop.f32.mrf.mxu1 }
 0x10f   : > { %v660_v38 = vmax.f32 %v552_v34, 0.0  ;;  %v676_v39 = vmax.f32 %v616_v35, 0.0 }
 0x110   : > { %v554_v40 = vpop.f32.mrf.mxu0  ;;  %v618_v41 = vpop.f32.mrf.mxu1 }
 0x111   : > { %693 = vst.msk [vmem:[%s1073_s17 + $0x30] sm:$0xff] %vm686_vm3, %v660_v38  ;;  %709 = vst.msk [vmem:[%s1073_s17 + $0xb0] sm:$0xff] %vm686_vm3, %v676_v39  ;;  %v555_v42 = vadd.f32 %v1064_v47, %v554_v40  ;;  %v619_v43 = vadd.f32 %v1064_v47, %v618_v41 }
 0x112   : > { %v556_v44 = vpop.f32.mrf.mxu0  ;;  %v620_v45 = vpop.f32.mrf.mxu1 }
 0x113   : > { %v661_v46 = vmax.f32 %v555_v42, 0.0  ;;  %v677_v48 = vmax.f32 %v619_v43, 0.0 }
 0x114   : > { %v559_v49 = vpop.f32.mrf.mxu0  ;;  %v623_v50 = vpop.f32.mrf.mxu1 }
 0x115   : > { %694 = vst.msk [vmem:[%s1073_s17 + $0x38] sm:$0xff] %vm686_vm3, %v661_v46  ;;  %710 = vst.msk [vmem:[%s1073_s17 + $0xb8] sm:$0xff] %vm686_vm3, %v677_v48  ;;  %v560_v51 = vadd.f32 %v1064_v47, %v559_v49  ;;  %v624_v52 = vadd.f32 %v1064_v47, %v623_v50 }
 0x116   : > { %v561_v53 = vpop.f32.mrf.mxu0  ;;  %v625_v54 = vpop.f32.mrf.mxu1 }
 0x117   : > { %v662_v55 = vmax.f32 %v560_v51, 0.0  ;;  %v678_v56 = vmax.f32 %v624_v52, 0.0 }
 0x118   : > { %v562_v57 = vpop.f32.mrf.mxu0  ;;  %v626_v58 = vpop.f32.mrf.mxu1 }
 0x119   : > { %695 = vst.msk [vmem:[%s1073_s17 + $0x40] sm:$0xff] %vm686_vm3, %v662_v55  ;;  %711 = vst.msk [vmem:[%s1073_s17 + $0xc0] sm:$0xff] %vm686_vm3, %v678_v56  ;;  %v563_v59 = vadd.f32 %v1064_v47, %v562_v57  ;;  %v627_v60 = vadd.f32 %v1064_v47, %v626_v58 }
 0x11a   : > { %v564_v61 = vpop.f32.mrf.mxu0  ;;  %v628_v62 = vpop.f32.mrf.mxu1 }
 0x11b   : > { %v663_v63 = vmax.f32 %v563_v59, 0.0  ;;  %v679_v0 = vmax.f32 %v627_v60, 0.0 }
 0x11c   : > { %v567_v1 = vpop.f32.mrf.mxu0  ;;  %v631_v2 = vpop.f32.mrf.mxu1 }
 0x11d   : > { %696 = vst.msk [vmem:[%s1073_s17 + $0x48] sm:$0xff] %vm686_vm3, %v663_v63  ;;  %712 = vst.msk [vmem:[%s1073_s17 + $0xc8] sm:$0xff] %vm686_vm3, %v679_v0  ;;  %v568_v3 = vadd.f32 %v1064_v47, %v567_v1  ;;  %v632_v4 = vadd.f32 %v1064_v47, %v631_v2 }
 0x11e   : > { %v569_v5 = vpop.f32.mrf.mxu0  ;;  %v633_v6 = vpop.f32.mrf.mxu1 }
 0x11f   : > { %v664_v7 = vmax.f32 %v568_v3, 0.0  ;;  %v680_v8 = vmax.f32 %v632_v4, 0.0 }
 0x120   : > { %v570_v9 = vpop.f32.mrf.mxu0  ;;  %v634_v10 = vpop.f32.mrf.mxu1 }
 0x121   : > { %697 = vst.msk [vmem:[%s1073_s17 + $0x50] sm:$0xff] %vm686_vm3, %v664_v7  ;;  %713 = vst.msk [vmem:[%s1073_s17 + $0xd0] sm:$0xff] %vm686_vm3, %v680_v8  ;;  %v571_v11 = vadd.f32 %v1064_v47, %v570_v9  ;;  %v635_v12 = vadd.f32 %v1064_v47, %v634_v10 }
 0x122   : > { %v572_v13 = vpop.f32.mrf.mxu0  ;;  %v636_v14 = vpop.f32.mrf.mxu1 }
 0x123   : > { %v665_v15 = vmax.f32 %v571_v11, 0.0  ;;  %v681_v16 = vmax.f32 %v635_v12, 0.0 }
 0x124   : > { %v575_v17 = vpop.f32.mrf.mxu0  ;;  %v639_v18 = vpop.f32.mrf.mxu1 }
 0x125   : > { %698 = vst.msk [vmem:[%s1073_s17 + $0x58] sm:$0xff] %vm686_vm3, %v665_v15  ;;  %714 = vst.msk [vmem:[%s1073_s17 + $0xd8] sm:$0xff] %vm686_vm3, %v681_v16  ;;  %v576_v19 = vadd.f32 %v1064_v47, %v575_v17  ;;  %v640_v20 = vadd.f32 %v1064_v47, %v639_v18 }
 0x126   : > { %v577_v21 = vpop.f32.mrf.mxu0  ;;  %v641_v22 = vpop.f32.mrf.mxu1 }
 0x127   : > { %v666_v23 = vmax.f32 %v576_v19, 0.0  ;;  %v682_v24 = vmax.f32 %v640_v20, 0.0 }
 0x128   : > { %v578_v25 = vpop.f32.mrf.mxu0  ;;  %v642_v26 = vpop.f32.mrf.mxu1 }
 0x129   : > { %699 = vst.msk [vmem:[%s1073_s17 + $0x60] sm:$0xff] %vm686_vm3, %v666_v23  ;;  %715 = vst.msk [vmem:[%s1073_s17 + $0xe0] sm:$0xff] %vm686_vm3, %v682_v24  ;;  %v579_v27 = vadd.f32 %v1064_v47, %v578_v25  ;;  %v643_v28 = vadd.f32 %v1064_v47, %v642_v26 }
 0x12a   : > { %v580_v29 = vpop.f32.mrf.mxu0  ;;  %v644_v30 = vpop.f32.mrf.mxu1 }
 0x12b   : > { %v667_v31 = vmax.f32 %v579_v27, 0.0  ;;  %v683_v32 = vmax.f32 %v643_v28, 0.0 }
 0x12c   : > { %v583_v33 = vpop.f32.mrf.mxu0  ;;  %v647_v34 = vpop.f32.mrf.mxu1 }
 0x12d   : > { %700 = vst.msk [vmem:[%s1073_s17 + $0x68] sm:$0xff] %vm686_vm3, %v667_v31  ;;  %716 = vst.msk [vmem:[%s1073_s17 + $0xe8] sm:$0xff] %vm686_vm3, %v683_v32  ;;  %v584_v35 = vadd.f32 %v1064_v47, %v583_v33  ;;  %v648_v36 = vadd.f32 %v1064_v47, %v647_v34 }
 0x12e   : > { %v585_v37 = vpop.f32.mrf.mxu0  ;;  %v649_v38 = vpop.f32.mrf.mxu1 }
 0x12f   : > { %v668_v39 = vmax.f32 %v584_v35, 0.0  ;;  %v684_v40 = vmax.f32 %v648_v36, 0.0 }
 0x130   : > { %v586_v41 = vpop.f32.mrf.mxu0  ;;  %v650_v42 = vpop.f32.mrf.mxu1 }
 0x131   : > { %701 = vst.msk [vmem:[%s1073_s17 + $0x70] sm:$0xff] %vm686_vm3, %v668_v39  ;;  %717 = vst.msk [vmem:[%s1073_s17 + $0xf0] sm:$0xff] %vm686_vm3, %v684_v40  ;;  %v587_v43 = vadd.f32 %v1064_v47, %v586_v41  ;;  %v651_v44 = vadd.f32 %v1064_v47, %v650_v42 }
 0x132   : > { %v588_v45 = vpop.f32.mrf.mxu0  ;;  %v652_v46 = vpop.f32.mrf.mxu1 }
 0x133   : > { %v669_v48 = vmax.f32 %v587_v43, 0.0  ;;  %v685_v49 = vmax.f32 %v651_v44, 0.0 }
 0x135   : > { %702 = vst.msk [vmem:[%s1073_s17 + $0x78] sm:$0xff] %vm686_vm3, %v669_v48  ;;  %718 = vst.msk [vmem:[%s1073_s17 + $0xf8] sm:$0xff] %vm686_vm3, %v685_v49 }
 0x136 PF: > { %s13_s12 = sadd.s32 1, %s941_s12  }
 0x137   : > { %p10_p4 = scmp.ge.s32.totalorder %s13_s12, 4  }
 0x139   :  { %12 = sbr.rel (!%p10_p4) target bundleno = 1 (0x1), region = 62 }

// kernel: forward.25
= control target key start
LH: loop header
LB: loop body
LE: loop exit
PB: predicated region body
PF: predicated region fallthrough
CT: control target
= control target key end

     0   :  { %vm139_vm0 = vcmask 1043456   ;;  %vm114_vm1 = vcmask 588800   ;;  %vm256_vm2 = vcmask 64512   ;;  %s497_s1 = inlined_call_operand.vmem [shape: bf16[72,8], index: 1, kind: input, shape index: {}]   ;;  %s498_s0 = inlined_call_operand.vmem [shape: bf16[128,72], index: 0, kind: input, shape index: {}]   ;;  %s499_s2 = inlined_call_operand.vmem [shape: f32[1,8], index: 2, kind: input, shape index: {}]   ;;  %s500_s3 = inlined_call_operand.vmem [shape: f32[128,8], index: 3, kind: output, shape index: {}]  }
   0x1   :  { %v350_v0 = vld [vmem:[%s497_s1 + $0x20] ss:$0 sps:$4 sm:$0xff]   ;;  %v351_v1 = vld [vmem:[%s497_s1 + $0x18] sm:$0xff]   ;;  %v352_v3 = vld [vmem:[%s497_s1 + $0x10] sm:$0xff]  }
   0x2   :  { %348 = vmatprep.subr.msk.bf16.mxu0 %vm139_vm0, %v350_v0  ;;  %349 = vmatprep.subr.msk.bf16.mxu1 %vm139_vm0, %v350_v0  ;;  %v141_v2 = vsel %vm139_vm0, %v350_v0, 0  ;;  %v355_v4 = vld [vmem:[%s498_s0] sm:$0xff]   ;;  %v353_v6 = vld [vmem:[%s497_s1 + $0x8] sm:$0xff]   ;;  %v359_v10 = vld [vmem:[%s498_s0 + $0x10] sm:$0xff]  }
   0x3   :  { %313 = vmatpush3.bf16.msra.mxu0 %v141_v2  ;;  %343 = vmatpush3.bf16.msra.mxu1 %v141_v2  ;;  %v356_v5 = vld [vmem:[%s498_s0 + $0x20] sm:$0xff]   ;;  %v357_v8 = vld [vmem:[%s498_s0 + $0x8] sm:$0xff]   ;;  %v360_v11 = vld [vmem:[%s498_s0 + $0x30] sm:$0xff]  }
   0x4   :  { %314 = vmatprep.subr.bf16.mxu0 %v351_v1  ;;  %339 = vmatprep.subr.bf16.mxu1 %v351_v1  ;;  %v354_v7 = vld [vmem:[%s497_s1] sm:$0xff]   ;;  %v358_v9 = vld [vmem:[%s498_s0 + $0x28] sm:$0xff]   ;;  %v361_v12 = vld [vmem:[%s498_s0 + $0x18] sm:$0xff]  }
   0x5   :  { %322 = vmatprep.mubr.msk.bf16.mxu0 %vm114_vm1, %v355_v4  ;;  %330 = vmatprep.mubr.msk.bf16.mxu1 %vm114_vm1, %v356_v5  ;;  %v362_v13 = vld [vmem:[%s498_s0 + $0x38] sm:$0xff]   ;;  %v277_v14 = vld [vmem:[%s499_s2] ss:$0 sm:$0xff] }
   0x7   :  { %315 = vmatpush3.bf16.msra.mxu0 %v351_v1  ;;  %344 = vmatpush3.bf16.msra.mxu1 %v351_v1 }
   0x8   :  { %316 = vmatprep.subr.bf16.mxu0 %v352_v3  ;;  %340 = vmatprep.subr.bf16.mxu1 %v352_v3 }
   0xb   :  { %317 = vmatpush3.bf16.msra.mxu0 %v352_v3  ;;  %345 = vmatpush3.bf16.msra.mxu1 %v352_v3 }
   0xc   :  { %318 = vmatprep.subr.bf16.mxu0 %v353_v6  ;;  %341 = vmatprep.subr.bf16.mxu1 %v353_v6 }
   0xf   :  { %319 = vmatpush3.bf16.msra.mxu0 %v353_v6  ;;  %346 = vmatpush3.bf16.msra.mxu1 %v353_v6 }
  0x10   :  { %320 = vmatprep.subr.bf16.mxu0 %v354_v7  ;;  %342 = vmatprep.subr.bf16.mxu1 %v354_v7 }
  0x13   :  { %321 = vmatpush3.bf16.msra.mxu0 %v354_v7  ;;  %347 = vmatpush3.bf16.msra.mxu1 %v354_v7 }
  0x16   :  { %323 = vmatmul.mubr.msk.bf16.vlgmr.msra.gmra.mxu0 %vm114_vm1, %v357_v8  ;;  %331 = vmatmul.mubr.msk.bf16.vlgmr.msra.gmra.mxu1 %vm114_vm1, %v358_v9 }
  0x17   :  { %326 = vmatprep.mubr.msk.bf16.mxu0 %vm114_vm1, %v359_v10  ;;  %334 = vmatprep.mubr.msk.bf16.mxu1 %vm114_vm1, %v360_v11 }
  0x1e   :  { %327 = vmatmul.mubr.msk.bf16.gmra.mxu0 %vm114_vm1, %v361_v12  ;;  %335 = vmatmul.mubr.msk.bf16.gmra.mxu1 %vm114_vm1, %v362_v13 }
  0xd6   :  { %v324_v15 = vpop.f32.mrf.mxu0  ;;  %v332_v16 = vpop.f32.mrf.mxu1 }
  0xd7   :  { %v186_v17 = vadd.f32 %v324_v15, %v277_v14  ;;  %v218_v18 = vadd.f32 %v332_v16, %v277_v14 }
  0xd8   :  { %v177_v19 = vpop.f32.mrf.mxu0  ;;  %v209_v20 = vpop.f32.mrf.mxu1 }
  0xd9   :  { %v242_v21 = vmax.f32 %v186_v17, 0.0  ;;  %v250_v22 = vmax.f32 %v218_v18, 0.0  ;;  %v178_v23 = vadd.f32 %v277_v14, %v177_v19  ;;  %v210_v24 = vadd.f32 %v277_v14, %v209_v20 }
  0xda   :  { %v325_v25 = vpop.f32.mrf.mxu0  ;;  %v333_v26 = vpop.f32.mrf.mxu1 }
  0xdb   :  { %259 = vst.msk [vmem:[%s500_s3 + $0x10] sm:$0xff] %vm256_vm2, %v242_v21  ;;  %267 = vst.msk [vmem:[%s500_s3 + $0x50] sm:$0xff] %vm256_vm2, %v250_v22  ;;  %v240_v27 = vmax.f32 %v178_v23, 0.0  ;;  %v248_v28 = vmax.f32 %v210_v24, 0.0  ;;  %v189_v29 = vadd.f32 %v325_v25, %v277_v14  ;;  %v221_v30 = vadd.f32 %v333_v26, %v277_v14 }
  0xdc   :  { %v180_v31 = vpop.f32.mrf.mxu0  ;;  %v212_v32 = vpop.f32.mrf.mxu1 }
  0xdd   :  { %257 = vst.msk [vmem:[%s500_s3] sm:$0xff] %vm256_vm2, %v240_v27  ;;  %265 = vst.msk [vmem:[%s500_s3 + $0x40] sm:$0xff] %vm256_vm2, %v248_v28  ;;  %v243_v33 = vmax.f32 %v189_v29, 0.0  ;;  %v251_v34 = vmax.f32 %v221_v30, 0.0  ;;  %v181_v35 = vadd.f32 %v277_v14, %v180_v31  ;;  %v213_v36 = vadd.f32 %v277_v14, %v212_v32 }
  0xde   :  { %v328_v37 = vpop.f32.mrf.mxu0  ;;  %v336_v38 = vpop.f32.mrf.mxu1 }
  0xdf   :  { %260 = vst.msk [vmem:[%s500_s3 + $0x18] sm:$0xff] %vm256_vm2, %v243_v33  ;;  %268 = vst.msk [vmem:[%s500_s3 + $0x58] sm:$0xff] %vm256_vm2, %v251_v34  ;;  %v241_v39 = vmax.f32 %v181_v35, 0.0  ;;  %v249_v40 = vmax.f32 %v213_v36, 0.0  ;;  %v202_v41 = vadd.f32 %v328_v37, %v277_v14  ;;  %v234_v42 = vadd.f32 %v336_v38, %v277_v14 }
  0xe0   :  { %v193_v43 = vpop.f32.mrf.mxu0  ;;  %v225_v44 = vpop.f32.mrf.mxu1 }
  0xe1   :  { %258 = vst.msk [vmem:[%s500_s3 + $0x8] sm:$0xff] %vm256_vm2, %v241_v39  ;;  %266 = vst.msk [vmem:[%s500_s3 + $0x48] sm:$0xff] %vm256_vm2, %v249_v40  ;;  %v246_v45 = vmax.f32 %v202_v41, 0.0  ;;  %v254_v46 = vmax.f32 %v234_v42, 0.0  ;;  %v194_v47 = vadd.f32 %v277_v14, %v193_v43  ;;  %v226_v48 = vadd.f32 %v277_v14, %v225_v44 }
  0xe2   :  { %v329_v49 = vpop.f32.mrf.mxu0  ;;  %v337_v50 = vpop.f32.mrf.mxu1 }
  0xe3   :  { %263 = vst.msk [vmem:[%s500_s3 + $0x30] sm:$0xff] %vm256_vm2, %v246_v45  ;;  %271 = vst.msk [vmem:[%s500_s3 + $0x70] sm:$0xff] %vm256_vm2, %v254_v46  ;;  %v244_v51 = vmax.f32 %v194_v47, 0.0  ;;  %v252_v52 = vmax.f32 %v226_v48, 0.0  ;;  %v205_v53 = vadd.f32 %v329_v49, %v277_v14  ;;  %v237_v54 = vadd.f32 %v337_v50, %v277_v14 }
  0xe4   :  { %v196_v55 = vpop.f32.mrf.mxu0  ;;  %v228_v56 = vpop.f32.mrf.mxu1 }
  0xe5   :  { %261 = vst.msk [vmem:[%s500_s3 + $0x20] sm:$0xff] %vm256_vm2, %v244_v51  ;;  %269 = vst.msk [vmem:[%s500_s3 + $0x60] sm:$0xff] %vm256_vm2, %v252_v52  ;;  %v247_v57 = vmax.f32 %v205_v53, 0.0  ;;  %v255_v58 = vmax.f32 %v237_v54, 0.0  ;;  %v197_v59 = vadd.f32 %v277_v14, %v196_v55  ;;  %v229_v60 = vadd.f32 %v277_v14, %v228_v56 }
  0xe7   :  { %264 = vst.msk [vmem:[%s500_s3 + $0x38] sm:$0xff] %vm256_vm2, %v247_v57  ;;  %272 = vst.msk [vmem:[%s500_s3 + $0x78] sm:$0xff] %vm256_vm2, %v255_v58  ;;  %v245_v61 = vmax.f32 %v197_v59, 0.0  ;;  %v253_v62 = vmax.f32 %v229_v60, 0.0 }
  0xe9   :  { %262 = vst.msk [vmem:[%s500_s3 + $0x28] sm:$0xff] %vm256_vm2, %v245_v61  ;;  %270 = vst.msk [vmem:[%s500_s3 + $0x68] sm:$0xff] %vm256_vm2, %v253_v62 }

// kernel: forward.26
= control target key start
LH: loop header
LB: loop body
LE: loop exit
PB: predicated region body
PF: predicated region fallthrough
CT: control target
= control target key end

     0   :  { %vm110_vm0 = vcmask 1043456   ;;  %vm85_vm1 = vcmask 64512   ;;  %s734_s1 = inlined_call_operand.vmem [shape: bf16[8,8], index: 1, kind: input, shape index: {}]   ;;  %s735_s4 = inlined_call_operand.vmem [shape: bf16[8,8], index: 4, kind: input, shape index: {}]   ;;  %s736_s0 = inlined_call_operand.vmem [shape: bf16[128,8], index: 0, kind: input, shape index: {}]   ;;  %s737_s3 = inlined_call_operand.vmem [shape: bf16[128,8], index: 3, kind: input, shape index: {}]   ;;  %s738_s2 = inlined_call_operand.vmem [shape: f32[1,8], index: 2, kind: input, shape index: {}]   ;;  %s739_s5 = inlined_call_operand.vmem [shape: f32[128,8], index: 5, kind: output, shape index: {}]  }
   0x1   :  { %v37_v0 = vld [vmem:[%s734_s1] sm:$0xf]  ;;  %v535_v6 = vld [vmem:[%s736_s0 + $0x8] sm:$0xff]   ;;  %v537_v8 = vld [vmem:[%s736_s0 + $0x10] sm:$0xff]  }
   0x2   :  { %v227_v1 = vld [vmem:[%s735_s4] sm:$0xf]  ;;  %531 = vmatprep.subr.msk.bf16.mxu0 %vm110_vm0, %v37_v0  ;;  %v112_v2 = vsel %vm110_vm0, %v37_v0, 0  ;;  %v536_v7 = vld [vmem:[%s737_s3 + $0x8] sm:$0xff]   ;;  %v538_v9 = vld [vmem:[%s737_s3 + $0x10] sm:$0xff]  }
   0x3   :  { %532 = vmatprep.subr.msk.bf16.mxu1 %vm110_vm0, %v227_v1  ;;  %v293_v3 = vsel %vm110_vm0, %v227_v1, 0  ;;  %v533_v4 = vld [vmem:[%s736_s0] sm:$0xff]   ;;  %496 = vmatpush3.bf16.msra.mxu0 %v112_v2  ;;  %v539_v10 = vld [vmem:[%s736_s0 + $0x18] sm:$0xff]   ;;  %v543_v14 = vld [vmem:[%s736_s0 + $0x28] sm:$0xff]  }
   0x4   :  { %v534_v5 = vld [vmem:[%s737_s3] sm:$0xff]   ;;  %514 = vmatpush3.bf16.msra.mxu1 %v293_v3  ;;  %497 = vmatprep.mubr.msk.bf16.mxu0 %vm85_vm1, %v533_v4  ;;  %v540_v11 = vld [vmem:[%s737_s3 + $0x18] sm:$0xff]   ;;  %v544_v15 = vld [vmem:[%s737_s3 + $0x28] sm:$0xff]  }
   0x5   :  { %515 = vmatprep.mubr.msk.bf16.mxu1 %vm85_vm1, %v534_v5  ;;  %v541_v12 = vld [vmem:[%s736_s0 + $0x20] sm:$0xff]   ;;  %v545_v16 = vld [vmem:[%s736_s0 + $0x30] sm:$0xff]   ;;  %v547_v18 = vld [vmem:[%s736_s0 + $0x38] sm:$0xff]  }
   0x6   :  { %498 = vmatmul.mubr.msk.bf16.vlgmr.msra.gmra.mxu0 %vm85_vm1, %v535_v6  ;;  %v542_v13 = vld [vmem:[%s737_s3 + $0x20] sm:$0xff]   ;;  %v546_v17 = vld [vmem:[%s737_s3 + $0x30] sm:$0xff]   ;;  %v548_v19 = vld [vmem:[%s737_s3 + $0x38] sm:$0xff]  }
   0x7   :  { %516 = vmatmul.mubr.msk.bf16.vlgmr.msra.gmra.mxu1 %vm85_vm1, %v536_v7  ;;  %501 = vmatprep.mubr.msk.bf16.mxu0 %vm85_vm1, %v537_v8  ;;  %v652_v20 = vld [vmem:[%s738_s2] ss:$0 sm:$0xff] }
   0x8   :  { %519 = vmatprep.mubr.msk.bf16.mxu1 %vm85_vm1, %v538_v9 }
   0xe   :  { %502 = vmatmul.mubr.msk.bf16.gmra.mxu0 %vm85_vm1, %v539_v10 }
   0xf   :  { %520 = vmatmul.mubr.msk.bf16.gmra.mxu1 %vm85_vm1, %v540_v11  ;;  %505 = vmatprep.mubr.msk.bf16.mxu0 %vm85_vm1, %v541_v12 }
  0x10   :  { %523 = vmatprep.mubr.msk.bf16.mxu1 %vm85_vm1, %v542_v13 }
  0x16   :  { %506 = vmatmul.mubr.msk.bf16.gmra.mxu0 %vm85_vm1, %v543_v14 }
  0x17   :  { %524 = vmatmul.mubr.msk.bf16.gmra.mxu1 %vm85_vm1, %v544_v15  ;;  %509 = vmatprep.mubr.msk.bf16.mxu0 %vm85_vm1, %v545_v16 }
  0x18   :  { %527 = vmatprep.mubr.msk.bf16.mxu1 %vm85_vm1, %v546_v17 }
  0x1e   :  { %510 = vmatmul.mubr.msk.bf16.gmra.mxu0 %vm85_vm1, %v547_v18 }
  0x1f   :  { %528 = vmatmul.mubr.msk.bf16.gmra.mxu1 %vm85_vm1, %v548_v19 }
  0xc6   :  { %v499_v21 = vpop.f32.mrf.mxu0 }
  0xc7   :  { %v157_v22 = vadd.f32 %v499_v21, %v652_v20  ;;  %v517_v23 = vpop.f32.mrf.mxu1 }
  0xc8   :  { %v148_v24 = vpop.f32.mrf.mxu0 }
  0xc9   :  { %v394_v25 = vadd.f32 %v517_v23, %v157_v22  ;;  %v149_v26 = vadd.f32 %v652_v20, %v148_v24  ;;  %v329_v27 = vpop.f32.mrf.mxu1 }
  0xca   :  { %v500_v28 = vpop.f32.mrf.mxu0 }
  0xcb   :  { %v410_v29 = vmax.f32 %v394_v25, 0.0  ;;  %v392_v30 = vadd.f32 %v329_v27, %v149_v26  ;;  %v160_v31 = vadd.f32 %v500_v28, %v652_v20  ;;  %v518_v32 = vpop.f32.mrf.mxu1 }
  0xcc   :  { %v151_v33 = vpop.f32.mrf.mxu0 }
  0xcd   :  { %426 = vst.msk [vmem:[%s739_s5 + $0x10] sm:$0xff] %vm85_vm1, %v410_v29  ;;  %v408_v34 = vmax.f32 %v392_v30, 0.0  ;;  %v395_v35 = vadd.f32 %v518_v32, %v160_v31  ;;  %v152_v36 = vadd.f32 %v652_v20, %v151_v33  ;;  %v332_v37 = vpop.f32.mrf.mxu1 }
  0xce   :  { %v503_v38 = vpop.f32.mrf.mxu0 }
  0xcf   :  { %424 = vst.msk [vmem:[%s739_s5] sm:$0xff] %vm85_vm1, %v408_v34  ;;  %v411_v39 = vmax.f32 %v395_v35, 0.0  ;;  %v393_v40 = vadd.f32 %v332_v37, %v152_v36  ;;  %v173_v41 = vadd.f32 %v503_v38, %v652_v20  ;;  %v521_v42 = vpop.f32.mrf.mxu1 }
  0xd0   :  { %v164_v43 = vpop.f32.mrf.mxu0 }
  0xd1   :  { %427 = vst.msk [vmem:[%s739_s5 + $0x18] sm:$0xff] %vm85_vm1, %v411_v39  ;;  %v409_v44 = vmax.f32 %v393_v40, 0.0  ;;  %v398_v45 = vadd.f32 %v521_v42, %v173_v41  ;;  %v165_v46 = vadd.f32 %v652_v20, %v164_v43  ;;  %v345_v47 = vpop.f32.mrf.mxu1 }
  0xd2   :  { %v504_v48 = vpop.f32.mrf.mxu0 }
  0xd3   :  { %425 = vst.msk [vmem:[%s739_s5 + $0x8] sm:$0xff] %vm85_vm1, %v409_v44  ;;  %v414_v49 = vmax.f32 %v398_v45, 0.0  ;;  %v396_v50 = vadd.f32 %v345_v47, %v165_v46  ;;  %v176_v51 = vadd.f32 %v504_v48, %v652_v20  ;;  %v522_v52 = vpop.f32.mrf.mxu1 }
  0xd4   :  { %v167_v53 = vpop.f32.mrf.mxu0 }
  0xd5   :  { %430 = vst.msk [vmem:[%s739_s5 + $0x30] sm:$0xff] %vm85_vm1, %v414_v49  ;;  %v412_v54 = vmax.f32 %v396_v50, 0.0  ;;  %v399_v55 = vadd.f32 %v522_v52, %v176_v51  ;;  %v168_v56 = vadd.f32 %v652_v20, %v167_v53  ;;  %v348_v57 = vpop.f32.mrf.mxu1 }
  0xd6   :  { %v507_v58 = vpop.f32.mrf.mxu0 }
  0xd7   :  { %428 = vst.msk [vmem:[%s739_s5 + $0x20] sm:$0xff] %vm85_vm1, %v412_v54  ;;  %v415_v59 = vmax.f32 %v399_v55, 0.0  ;;  %v397_v60 = vadd.f32 %v348_v57, %v168_v56  ;;  %v189_v61 = vadd.f32 %v507_v58, %v652_v20  ;;  %v525_v62 = vpop.f32.mrf.mxu1 }
  0xd8   :  { %v180_v63 = vpop.f32.mrf.mxu0 }
  0xd9   :  { %431 = vst.msk [vmem:[%s739_s5 + $0x38] sm:$0xff] %vm85_vm1, %v415_v59  ;;  %v413_v0 = vmax.f32 %v397_v60, 0.0  ;;  %v402_v1 = vadd.f32 %v525_v62, %v189_v61  ;;  %v181_v2 = vadd.f32 %v652_v20, %v180_v63  ;;  %v361_v3 = vpop.f32.mrf.mxu1 }
  0xda   :  { %v508_v4 = vpop.f32.mrf.mxu0 }
  0xdb   :  { %429 = vst.msk [vmem:[%s739_s5 + $0x28] sm:$0xff] %vm85_vm1, %v413_v0  ;;  %v418_v5 = vmax.f32 %v402_v1, 0.0  ;;  %v400_v6 = vadd.f32 %v361_v3, %v181_v2  ;;  %v192_v7 = vadd.f32 %v508_v4, %v652_v20  ;;  %v526_v8 = vpop.f32.mrf.mxu1 }
  0xdc   :  { %v183_v9 = vpop.f32.mrf.mxu0 }
  0xdd   :  { %434 = vst.msk [vmem:[%s739_s5 + $0x50] sm:$0xff] %vm85_vm1, %v418_v5  ;;  %v416_v10 = vmax.f32 %v400_v6, 0.0  ;;  %v403_v11 = vadd.f32 %v526_v8, %v192_v7  ;;  %v184_v12 = vadd.f32 %v652_v20, %v183_v9  ;;  %v364_v13 = vpop.f32.mrf.mxu1 }
  0xde   :  { %v511_v14 = vpop.f32.mrf.mxu0 }
  0xdf   :  { %432 = vst.msk [vmem:[%s739_s5 + $0x40] sm:$0xff] %vm85_vm1, %v416_v10  ;;  %v419_v15 = vmax.f32 %v403_v11, 0.0  ;;  %v401_v16 = vadd.f32 %v364_v13, %v184_v12  ;;  %v205_v17 = vadd.f32 %v511_v14, %v652_v20  ;;  %v529_v18 = vpop.f32.mrf.mxu1 }
  0xe0   :  { %v196_v19 = vpop.f32.mrf.mxu0 }
  0xe1   :  { %435 = vst.msk [vmem:[%s739_s5 + $0x58] sm:$0xff] %vm85_vm1, %v419_v15  ;;  %v417_v21 = vmax.f32 %v401_v16, 0.0  ;;  %v406_v22 = vadd.f32 %v529_v18, %v205_v17  ;;  %v197_v23 = vadd.f32 %v652_v20, %v196_v19  ;;  %v377_v24 = vpop.f32.mrf.mxu1 }
  0xe2   :  { %v512_v25 = vpop.f32.mrf.mxu0 }
  0xe3   :  { %433 = vst.msk [vmem:[%s739_s5 + $0x48] sm:$0xff] %vm85_vm1, %v417_v21  ;;  %v422_v26 = vmax.f32 %v406_v22, 0.0  ;;  %v404_v27 = vadd.f32 %v377_v24, %v197_v23  ;;  %v208_v28 = vadd.f32 %v512_v25, %v652_v20  ;;  %v530_v29 = vpop.f32.mrf.mxu1 }
  0xe4   :  { %v199_v30 = vpop.f32.mrf.mxu0 }
  0xe5   :  { %438 = vst.msk [vmem:[%s739_s5 + $0x70] sm:$0xff] %vm85_vm1, %v422_v26  ;;  %v420_v31 = vmax.f32 %v404_v27, 0.0  ;;  %v407_v32 = vadd.f32 %v530_v29, %v208_v28  ;;  %v200_v33 = vadd.f32 %v652_v20, %v199_v30  ;;  %v380_v34 = vpop.f32.mrf.mxu1 }
  0xe7   :  { %436 = vst.msk [vmem:[%s739_s5 + $0x60] sm:$0xff] %vm85_vm1, %v420_v31  ;;  %v423_v35 = vmax.f32 %v407_v32, 0.0  ;;  %v405_v36 = vadd.f32 %v380_v34, %v200_v33 }
  0xe9   :  { %439 = vst.msk [vmem:[%s739_s5 + $0x78] sm:$0xff] %vm85_vm1, %v423_v35  ;;  %v421_v37 = vmax.f32 %v405_v36, 0.0 }
  0xeb   :  { %437 = vst.msk [vmem:[%s739_s5 + $0x68] sm:$0xff] %vm85_vm1, %v421_v37 }

// kernel: forward.27
= control target key start
LH: loop header
LB: loop body
LE: loop exit
PB: predicated region body
PF: predicated region fallthrough
CT: control target
= control target key end

     0   :  { %vm104_vm0 = vcmask 1043456   ;;  %vm79_vm1 = vcmask 64512   ;;  %s419_s1 = inlined_call_operand.vmem [shape: bf16[8,8], index: 1, kind: input, shape index: {}]   ;;  %s420_s0 = inlined_call_operand.vmem [shape: bf16[128,8], index: 0, kind: input, shape index: {}]   ;;  %s421_s2 = inlined_call_operand.vmem [shape: f32[1,8], index: 2, kind: input, shape index: {}]   ;;  %s422_s3 = inlined_call_operand.vmem [shape: f32[128,8], index: 3, kind: output, shape index: {}]  }
   0x1   :  { %v31_v0 = vld [vmem:[%s419_s1] sm:$0xf]  ;;  %v291_v4 = vld [vmem:[%s420_s0 + $0x8] sm:$0xff]   ;;  %v293_v6 = vld [vmem:[%s420_s0 + $0x10] sm:$0xff]  }
   0x2   :  { %287 = vmatprep.subr.msk.bf16.mxu0 %vm104_vm0, %v31_v0  ;;  %288 = vmatprep.subr.msk.bf16.mxu1 %vm104_vm0, %v31_v0  ;;  %v106_v1 = vsel %vm104_vm0, %v31_v0, 0  ;;  %v289_v2 = vld [vmem:[%s420_s0] sm:$0xff]   ;;  %v292_v5 = vld [vmem:[%s420_s0 + $0x28] sm:$0xff]   ;;  %v294_v7 = vld [vmem:[%s420_s0 + $0x30] sm:$0xff]  }
   0x3   :  { %268 = vmatpush3.bf16.msra.mxu0 %v106_v1  ;;  %286 = vmatpush3.bf16.msra.mxu1 %v106_v1  ;;  %v290_v3 = vld [vmem:[%s420_s0 + $0x20] sm:$0xff]   ;;  %v295_v8 = vld [vmem:[%s420_s0 + $0x18] sm:$0xff]  }
   0x4   :  { %269 = vmatprep.mubr.msk.bf16.mxu0 %vm79_vm1, %v289_v2  ;;  %277 = vmatprep.mubr.msk.bf16.mxu1 %vm79_vm1, %v290_v3  ;;  %v296_v9 = vld [vmem:[%s420_s0 + $0x38] sm:$0xff]   ;;  %v241_v10 = vld [vmem:[%s421_s2] ss:$0 sm:$0xff] }
   0x6   :  { %270 = vmatmul.mubr.msk.bf16.vlgmr.msra.gmra.mxu0 %vm79_vm1, %v291_v4  ;;  %278 = vmatmul.mubr.msk.bf16.vlgmr.msra.gmra.mxu1 %vm79_vm1, %v292_v5 }
   0x7   :  { %273 = vmatprep.mubr.msk.bf16.mxu0 %vm79_vm1, %v293_v6  ;;  %281 = vmatprep.mubr.msk.bf16.mxu1 %vm79_vm1, %v294_v7 }
   0xe   :  { %274 = vmatmul.mubr.msk.bf16.gmra.mxu0 %vm79_vm1, %v295_v8  ;;  %282 = vmatmul.mubr.msk.bf16.gmra.mxu1 %vm79_vm1, %v296_v9 }
  0xc6   :  { %v271_v11 = vpop.f32.mrf.mxu0  ;;  %v279_v13 = vpop.f32.mrf.mxu1 }
  0xc7   :  { %v151_v12 = vadd.f32 %v271_v11, %v241_v10  ;;  %v183_v14 = vadd.f32 %v279_v13, %v241_v10 }
  0xc8   :  { %v142_v15 = vpop.f32.mrf.mxu0  ;;  %v174_v18 = vpop.f32.mrf.mxu1 }
  0xc9   :  { %v207_v16 = vmax.f32 %v151_v12, 0.0  ;;  %v143_v17 = vadd.f32 %v241_v10, %v142_v15  ;;  %v215_v19 = vmax.f32 %v183_v14, 0.0  ;;  %v175_v20 = vadd.f32 %v241_v10, %v174_v18 }
  0xca   :  { %v272_v21 = vpop.f32.mrf.mxu0  ;;  %v280_v24 = vpop.f32.mrf.mxu1 }
  0xcb   :  { %223 = vst.msk [vmem:[%s422_s3 + $0x10] sm:$0xff] %vm79_vm1, %v207_v16  ;;  %v205_v22 = vmax.f32 %v143_v17, 0.0  ;;  %v154_v23 = vadd.f32 %v272_v21, %v241_v10  ;;  %231 = vst.msk [vmem:[%s422_s3 + $0x50] sm:$0xff] %vm79_vm1, %v215_v19  ;;  %v213_v25 = vmax.f32 %v175_v20, 0.0  ;;  %v186_v26 = vadd.f32 %v280_v24, %v241_v10 }
  0xcc   :  { %v145_v27 = vpop.f32.mrf.mxu0  ;;  %v177_v30 = vpop.f32.mrf.mxu1 }
  0xcd   :  { %221 = vst.msk [vmem:[%s422_s3] sm:$0xff] %vm79_vm1, %v205_v22  ;;  %v208_v28 = vmax.f32 %v154_v23, 0.0  ;;  %v146_v29 = vadd.f32 %v241_v10, %v145_v27  ;;  %229 = vst.msk [vmem:[%s422_s3 + $0x40] sm:$0xff] %vm79_vm1, %v213_v25  ;;  %v216_v31 = vmax.f32 %v186_v26, 0.0  ;;  %v178_v32 = vadd.f32 %v241_v10, %v177_v30 }
  0xce   :  { %v275_v33 = vpop.f32.mrf.mxu0  ;;  %v283_v36 = vpop.f32.mrf.mxu1 }
  0xcf   :  { %224 = vst.msk [vmem:[%s422_s3 + $0x18] sm:$0xff] %vm79_vm1, %v208_v28  ;;  %v206_v34 = vmax.f32 %v146_v29, 0.0  ;;  %v167_v35 = vadd.f32 %v275_v33, %v241_v10  ;;  %232 = vst.msk [vmem:[%s422_s3 + $0x58] sm:$0xff] %vm79_vm1, %v216_v31  ;;  %v214_v37 = vmax.f32 %v178_v32, 0.0  ;;  %v199_v38 = vadd.f32 %v283_v36, %v241_v10 }
  0xd0   :  { %v158_v39 = vpop.f32.mrf.mxu0  ;;  %v190_v42 = vpop.f32.mrf.mxu1 }
  0xd1   :  { %222 = vst.msk [vmem:[%s422_s3 + $0x8] sm:$0xff] %vm79_vm1, %v206_v34  ;;  %v211_v40 = vmax.f32 %v167_v35, 0.0  ;;  %v159_v41 = vadd.f32 %v241_v10, %v158_v39  ;;  %230 = vst.msk [vmem:[%s422_s3 + $0x48] sm:$0xff] %vm79_vm1, %v214_v37  ;;  %v219_v43 = vmax.f32 %v199_v38, 0.0  ;;  %v191_v44 = vadd.f32 %v241_v10, %v190_v42 }
  0xd2   :  { %v276_v45 = vpop.f32.mrf.mxu0  ;;  %v284_v48 = vpop.f32.mrf.mxu1 }
  0xd3   :  { %227 = vst.msk [vmem:[%s422_s3 + $0x30] sm:$0xff] %vm79_vm1, %v211_v40  ;;  %v209_v46 = vmax.f32 %v159_v41, 0.0  ;;  %v170_v47 = vadd.f32 %v276_v45, %v241_v10  ;;  %235 = vst.msk [vmem:[%s422_s3 + $0x70] sm:$0xff] %vm79_vm1, %v219_v43  ;;  %v217_v49 = vmax.f32 %v191_v44, 0.0  ;;  %v202_v50 = vadd.f32 %v284_v48, %v241_v10 }
  0xd4   :  { %v161_v51 = vpop.f32.mrf.mxu0  ;;  %v193_v54 = vpop.f32.mrf.mxu1 }
  0xd5   :  { %225 = vst.msk [vmem:[%s422_s3 + $0x20] sm:$0xff] %vm79_vm1, %v209_v46  ;;  %v212_v52 = vmax.f32 %v170_v47, 0.0  ;;  %v162_v53 = vadd.f32 %v241_v10, %v161_v51  ;;  %233 = vst.msk [vmem:[%s422_s3 + $0x60] sm:$0xff] %vm79_vm1, %v217_v49  ;;  %v220_v55 = vmax.f32 %v202_v50, 0.0  ;;  %v194_v56 = vadd.f32 %v241_v10, %v193_v54 }
  0xd7   :  { %228 = vst.msk [vmem:[%s422_s3 + $0x38] sm:$0xff] %vm79_vm1, %v212_v52  ;;  %v210_v57 = vmax.f32 %v162_v53, 0.0  ;;  %236 = vst.msk [vmem:[%s422_s3 + $0x78] sm:$0xff] %vm79_vm1, %v220_v55  ;;  %v218_v58 = vmax.f32 %v194_v56, 0.0 }
  0xd9   :  { %226 = vst.msk [vmem:[%s422_s3 + $0x28] sm:$0xff] %vm79_vm1, %v210_v57  ;;  %234 = vst.msk [vmem:[%s422_s3 + $0x68] sm:$0xff] %vm79_vm1, %v218_v58 }

// kernel: forward.29
= control target key start
LH: loop header
LB: loop body
LE: loop exit
PB: predicated region body
PF: predicated region fallthrough
CT: control target
= control target key end

     0   :  { %vm107_vm0 = vcmask 1043456   ;;  %vm82_vm1 = vcmask 64512   ;;  %s525_s1 = inlined_call_operand.vmem [shape: bf16[8,8], index: 1, kind: input, shape index: {}]   ;;  %s526_s0 = inlined_call_operand.vmem [shape: bf16[128,8], index: 0, kind: input, shape index: {}]   ;;  %s527_s2 = inlined_call_operand.vmem [shape: f32[1,8], index: 2, kind: input, shape index: {}]   ;;  %s528_s3 = inlined_call_operand.vmem [shape: f32[128,8], index: 3, kind: input, shape index: {}]   ;;  %s529_s4 = inlined_call_operand.vmem [shape: f32[128,8], index: 4, kind: output, shape index: {}]  }
   0x1   :  { %v34_v0 = vld [vmem:[%s525_s1] sm:$0xf]  ;;  %v326_v4 = vld [vmem:[%s526_s0 + $0x8] sm:$0xff]   ;;  %v328_v6 = vld [vmem:[%s526_s0 + $0x10] sm:$0xff]  }
   0x2   :  { %322 = vmatprep.subr.msk.bf16.mxu0 %vm107_vm0, %v34_v0  ;;  %323 = vmatprep.subr.msk.bf16.mxu1 %vm107_vm0, %v34_v0  ;;  %v109_v1 = vsel %vm107_vm0, %v34_v0, 0  ;;  %v324_v2 = vld [vmem:[%s526_s0] sm:$0xff]   ;;  %v327_v5 = vld [vmem:[%s526_s0 + $0x28] sm:$0xff]   ;;  %v329_v7 = vld [vmem:[%s526_s0 + $0x30] sm:$0xff]  }
   0x3   :  { %303 = vmatpush3.bf16.msra.mxu0 %v109_v1  ;;  %321 = vmatpush3.bf16.msra.mxu1 %v109_v1  ;;  %v325_v3 = vld [vmem:[%s526_s0 + $0x20] sm:$0xff]   ;;  %v330_v8 = vld [vmem:[%s526_s0 + $0x18] sm:$0xff]   ;;  %v210_v12 = vld [vmem:[%s528_s3 + $0x10] sm:$0xff] }
   0x4   :  { %304 = vmatprep.mubr.msk.bf16.mxu0 %vm82_vm1, %v324_v2  ;;  %312 = vmatprep.mubr.msk.bf16.mxu1 %vm82_vm1, %v325_v3  ;;  %v331_v9 = vld [vmem:[%s526_s0 + $0x38] sm:$0xff]   ;;  %v395_v10 = vld [vmem:[%s527_s2] ss:$0 sm:$0xff]  ;;  %v218_v15 = vld [vmem:[%s528_s3 + $0x50] sm:$0xff] }
   0x5   :  { %v208_v18 = vld [vmem:[%s528_s3] sm:$0xff]  ;;  %v211_v26 = vld [vmem:[%s528_s3 + $0x18] sm:$0xff]  ;;  %v209_v36 = vld [vmem:[%s528_s3 + $0x8] sm:$0xff] }
   0x6   :  { %305 = vmatmul.mubr.msk.bf16.vlgmr.msra.gmra.mxu0 %vm82_vm1, %v326_v4  ;;  %313 = vmatmul.mubr.msk.bf16.vlgmr.msra.gmra.mxu1 %vm82_vm1, %v327_v5  ;;  %v216_v22 = vld [vmem:[%s528_s3 + $0x40] sm:$0xff]  ;;  %v219_v31 = vld [vmem:[%s528_s3 + $0x58] sm:$0xff]  ;;  %v217_v41 = vld [vmem:[%s528_s3 + $0x48] sm:$0xff] }
   0x7   :  { %308 = vmatprep.mubr.msk.bf16.mxu0 %vm82_vm1, %v328_v6  ;;  %316 = vmatprep.mubr.msk.bf16.mxu1 %vm82_vm1, %v329_v7  ;;  %v214_v46 = vld [vmem:[%s528_s3 + $0x30] sm:$0xff]  ;;  %v212_v56 = vld [vmem:[%s528_s3 + $0x20] sm:$0xff]  ;;  %v215_v2 = vld [vmem:[%s528_s3 + $0x38] sm:$0xff] }
   0x8   :  { %v222_v51 = vld [vmem:[%s528_s3 + $0x70] sm:$0xff]  ;;  %v220_v61 = vld [vmem:[%s528_s3 + $0x60] sm:$0xff]  ;;  %v223_v7 = vld [vmem:[%s528_s3 + $0x78] sm:$0xff] }
   0xe   :  { %309 = vmatmul.mubr.msk.bf16.gmra.mxu0 %vm82_vm1, %v330_v8  ;;  %317 = vmatmul.mubr.msk.bf16.gmra.mxu1 %vm82_vm1, %v331_v9 }
  0xc6   :  { %v306_v11 = vpop.f32.mrf.mxu0  ;;  %v314_v14 = vpop.f32.mrf.mxu1 }
  0xc7   :  { %v154_v13 = vadd.f32 %v306_v11, %v395_v10  ;;  %v186_v16 = vadd.f32 %v314_v14, %v395_v10 }
  0xc8   :  { %v145_v17 = vpop.f32.mrf.mxu0  ;;  %v177_v21 = vpop.f32.mrf.mxu1 }
  0xc9   :  { %v226_v19 = vadd.f32 %v210_v12, %v154_v13  ;;  %v146_v20 = vadd.f32 %v395_v10, %v145_v17  ;;  %v234_v23 = vadd.f32 %v218_v15, %v186_v16  ;;  %v178_v24 = vadd.f32 %v395_v10, %v177_v21  ;;  %v213_v13 = vld [vmem:[%s528_s3 + $0x28] sm:$0xff] }
  0xca   :  { %v307_v25 = vpop.f32.mrf.mxu0  ;;  %v315_v30 = vpop.f32.mrf.mxu1 }
  0xcb   :  { %v242_v27 = vmax.f32 %v226_v19, 0.0  ;;  %v224_v28 = vadd.f32 %v208_v18, %v146_v20  ;;  %v157_v29 = vadd.f32 %v307_v25, %v395_v10  ;;  %v250_v32 = vmax.f32 %v234_v23, 0.0  ;;  %v221_v18 = vld [vmem:[%s528_s3 + $0x68] sm:$0xff] }
  0xcc   :  { %v232_v33 = vadd.f32 %v216_v22, %v178_v24  ;;  %v189_v34 = vadd.f32 %v315_v30, %v395_v10  ;;  %v148_v35 = vpop.f32.mrf.mxu0  ;;  %v180_v40 = vpop.f32.mrf.mxu1 }
  0xcd   :  { %258 = vst.msk [vmem:[%s529_s4 + $0x10] sm:$0xff] %vm82_vm1, %v242_v27  ;;  %v240_v37 = vmax.f32 %v224_v28, 0.0  ;;  %v227_v38 = vadd.f32 %v211_v26, %v157_v29  ;;  %v149_v39 = vadd.f32 %v395_v10, %v148_v35  ;;  %266 = vst.msk [vmem:[%s529_s4 + $0x50] sm:$0xff] %vm82_vm1, %v250_v32  ;;  %v181_v44 = vadd.f32 %v395_v10, %v180_v40 }
  0xce   :  { %v248_v42 = vmax.f32 %v232_v33, 0.0  ;;  %v235_v43 = vadd.f32 %v219_v31, %v189_v34  ;;  %v310_v45 = vpop.f32.mrf.mxu0  ;;  %v318_v50 = vpop.f32.mrf.mxu1 }
  0xcf   :  { %256 = vst.msk [vmem:[%s529_s4] sm:$0xff] %vm82_vm1, %v240_v37  ;;  %v243_v47 = vmax.f32 %v227_v38, 0.0  ;;  %v225_v48 = vadd.f32 %v209_v36, %v149_v39  ;;  %v170_v49 = vadd.f32 %v310_v45, %v395_v10  ;;  %v233_v53 = vadd.f32 %v217_v41, %v181_v44 }
  0xd0   :  { %264 = vst.msk [vmem:[%s529_s4 + $0x40] sm:$0xff] %vm82_vm1, %v248_v42  ;;  %v251_v52 = vmax.f32 %v235_v43, 0.0  ;;  %v202_v54 = vadd.f32 %v318_v50, %v395_v10  ;;  %v161_v55 = vpop.f32.mrf.mxu0  ;;  %v193_v60 = vpop.f32.mrf.mxu1 }
  0xd1   :  { %259 = vst.msk [vmem:[%s529_s4 + $0x18] sm:$0xff] %vm82_vm1, %v243_v47  ;;  %v241_v57 = vmax.f32 %v225_v48, 0.0  ;;  %v230_v58 = vadd.f32 %v214_v46, %v170_v49  ;;  %v162_v59 = vadd.f32 %v395_v10, %v161_v55  ;;  %v249_v62 = vmax.f32 %v233_v53, 0.0 }
  0xd2   :  { %267 = vst.msk [vmem:[%s529_s4 + $0x58] sm:$0xff] %vm82_vm1, %v251_v52  ;;  %v238_v63 = vadd.f32 %v222_v51, %v202_v54  ;;  %v194_v0 = vadd.f32 %v395_v10, %v193_v60  ;;  %v311_v1 = vpop.f32.mrf.mxu0  ;;  %v319_v6 = vpop.f32.mrf.mxu1 }
  0xd3   :  { %257 = vst.msk [vmem:[%s529_s4 + $0x8] sm:$0xff] %vm82_vm1, %v241_v57  ;;  %v246_v3 = vmax.f32 %v230_v58, 0.0  ;;  %v228_v4 = vadd.f32 %v212_v56, %v162_v59  ;;  %v173_v5 = vadd.f32 %v311_v1, %v395_v10  ;;  %265 = vst.msk [vmem:[%s529_s4 + $0x48] sm:$0xff] %vm82_vm1, %v249_v62  ;;  %v205_v11 = vadd.f32 %v319_v6, %v395_v10 }
  0xd4   :  { %v254_v8 = vmax.f32 %v238_v63, 0.0  ;;  %v236_v9 = vadd.f32 %v220_v61, %v194_v0  ;;  %v164_v12 = vpop.f32.mrf.mxu0  ;;  %v196_v17 = vpop.f32.mrf.mxu1 }
  0xd5   :  { %262 = vst.msk [vmem:[%s529_s4 + $0x30] sm:$0xff] %vm82_vm1, %v246_v3  ;;  %v244_v14 = vmax.f32 %v228_v4, 0.0  ;;  %v231_v15 = vadd.f32 %v215_v2, %v173_v5  ;;  %v165_v16 = vadd.f32 %v395_v10, %v164_v12  ;;  %v239_v20 = vadd.f32 %v223_v7, %v205_v11 }
  0xd6   :  { %270 = vst.msk [vmem:[%s529_s4 + $0x70] sm:$0xff] %vm82_vm1, %v254_v8  ;;  %v252_v19 = vmax.f32 %v236_v9, 0.0  ;;  %v197_v21 = vadd.f32 %v395_v10, %v196_v17 }
  0xd7   :  { %260 = vst.msk [vmem:[%s529_s4 + $0x20] sm:$0xff] %vm82_vm1, %v244_v14  ;;  %v247_v22 = vmax.f32 %v231_v15, 0.0  ;;  %v229_v23 = vadd.f32 %v213_v13, %v165_v16  ;;  %v255_v24 = vmax.f32 %v239_v20, 0.0 }
  0xd8   :  { %268 = vst.msk [vmem:[%s529_s4 + $0x60] sm:$0xff] %vm82_vm1, %v252_v19  ;;  %v237_v25 = vadd.f32 %v221_v18, %v197_v21 }
  0xd9   :  { %263 = vst.msk [vmem:[%s529_s4 + $0x38] sm:$0xff] %vm82_vm1, %v247_v22  ;;  %v245_v10 = vmax.f32 %v229_v23, 0.0  ;;  %271 = vst.msk [vmem:[%s529_s4 + $0x78] sm:$0xff] %vm82_vm1, %v255_v24 }
  0xda   :  { %v253_v26 = vmax.f32 %v237_v25, 0.0 }
  0xdb   :  { %261 = vst.msk [vmem:[%s529_s4 + $0x28] sm:$0xff] %vm82_vm1, %v245_v10 }
  0xdc   :  { %269 = vst.msk [vmem:[%s529_s4 + $0x68] sm:$0xff] %vm82_vm1, %v253_v26 }

// kernel: forward.30
= control target key start
LH: loop header
LB: loop body
LE: loop exit
PB: predicated region body
PF: predicated region fallthrough
CT: control target
= control target key end

     0   :  { %vm104_vm0 = vcmask 1043456   ;;  %vm79_vm1 = vcmask 64512   ;;  %vm221_vm2 = vcmask 130048   ;;  %s420_s1 = inlined_call_operand.vmem [shape: bf16[8,16], index: 1, kind: input, shape index: {}]   ;;  %s421_s0 = inlined_call_operand.vmem [shape: bf16[128,8], index: 0, kind: input, shape index: {}]   ;;  %s422_s2 = inlined_call_operand.vmem [shape: f32[1,16], index: 2, kind: input, shape index: {}]   ;;  %s423_s3 = inlined_call_operand.vmem [shape: f32[128,16], index: 3, kind: output, shape index: {}]  }
   0x1   :  { %v31_v0 = vld [vmem:[%s420_s1] sm:$0xf]  ;;  %v292_v4 = vld [vmem:[%s421_s0 + $0x8] sm:$0xff]   ;;  %v294_v6 = vld [vmem:[%s421_s0 + $0x10] sm:$0xff]  }
   0x2   :  { %288 = vmatprep.subr.msk.bf16.mxu0 %vm104_vm0, %v31_v0  ;;  %289 = vmatprep.subr.msk.bf16.mxu1 %vm104_vm0, %v31_v0  ;;  %v106_v1 = vsel %vm104_vm0, %v31_v0, 0  ;;  %v290_v2 = vld [vmem:[%s421_s0] sm:$0xff]   ;;  %v293_v5 = vld [vmem:[%s421_s0 + $0x28] sm:$0xff]   ;;  %v295_v7 = vld [vmem:[%s421_s0 + $0x30] sm:$0xff]  }
   0x3   :  { %269 = vmatpush3.bf16.msra.mxu0 %v106_v1  ;;  %287 = vmatpush3.bf16.msra.mxu1 %v106_v1  ;;  %v291_v3 = vld [vmem:[%s421_s0 + $0x20] sm:$0xff]   ;;  %v296_v8 = vld [vmem:[%s421_s0 + $0x18] sm:$0xff]  }
   0x4   :  { %270 = vmatprep.mubr.msk.bf16.mxu0 %vm79_vm1, %v290_v2  ;;  %278 = vmatprep.mubr.msk.bf16.mxu1 %vm79_vm1, %v291_v3  ;;  %v297_v9 = vld [vmem:[%s421_s0 + $0x38] sm:$0xff]   ;;  %v242_v10 = vld [vmem:[%s422_s2] ss:$0 sm:$0xff] }
   0x6   :  { %271 = vmatmul.mubr.msk.bf16.vlgmr.msra.gmra.mxu0 %vm79_vm1, %v292_v4  ;;  %279 = vmatmul.mubr.msk.bf16.vlgmr.msra.gmra.mxu1 %vm79_vm1, %v293_v5 }
   0x7   :  { %274 = vmatprep.mubr.msk.bf16.mxu0 %vm79_vm1, %v294_v6  ;;  %282 = vmatprep.mubr.msk.bf16.mxu1 %vm79_vm1, %v295_v7 }
   0xe   :  { %275 = vmatmul.mubr.msk.bf16.gmra.mxu0 %vm79_vm1, %v296_v8  ;;  %283 = vmatmul.mubr.msk.bf16.gmra.mxu1 %vm79_vm1, %v297_v9 }
  0xc6   :  { %v272_v11 = vpop.f32.mrf.mxu0  ;;  %v280_v13 = vpop.f32.mrf.mxu1 }
  0xc7   :  { %v151_v12 = vadd.f32 %v272_v11, %v242_v10  ;;  %v183_v14 = vadd.f32 %v280_v13, %v242_v10 }
  0xc8   :  { %v142_v15 = vpop.f32.mrf.mxu0  ;;  %v174_v18 = vpop.f32.mrf.mxu1 }
  0xc9   :  { %v207_v16 = vmax.f32 %v151_v12, 0.0  ;;  %v143_v17 = vadd.f32 %v242_v10, %v142_v15  ;;  %v215_v19 = vmax.f32 %v183_v14, 0.0  ;;  %v175_v20 = vadd.f32 %v242_v10, %v174_v18 }
  0xca   :  { %v273_v21 = vpop.f32.mrf.mxu0  ;;  %v281_v24 = vpop.f32.mrf.mxu1 }
  0xcb   :  { %224 = vst.msk [vmem:[%s423_s3 + $0x10] sm:$0xff] %vm221_vm2, %v207_v16  ;;  %v205_v22 = vmax.f32 %v143_v17, 0.0  ;;  %v154_v23 = vadd.f32 %v273_v21, %v242_v10  ;;  %232 = vst.msk [vmem:[%s423_s3 + $0x50] sm:$0xff] %vm221_vm2, %v215_v19  ;;  %v213_v25 = vmax.f32 %v175_v20, 0.0  ;;  %v186_v26 = vadd.f32 %v281_v24, %v242_v10 }
  0xcc   :  { %v145_v27 = vpop.f32.mrf.mxu0  ;;  %v177_v30 = vpop.f32.mrf.mxu1 }
  0xcd   :  { %222 = vst.msk [vmem:[%s423_s3] sm:$0xff] %vm221_vm2, %v205_v22  ;;  %v208_v28 = vmax.f32 %v154_v23, 0.0  ;;  %v146_v29 = vadd.f32 %v242_v10, %v145_v27  ;;  %230 = vst.msk [vmem:[%s423_s3 + $0x40] sm:$0xff] %vm221_vm2, %v213_v25  ;;  %v216_v31 = vmax.f32 %v186_v26, 0.0  ;;  %v178_v32 = vadd.f32 %v242_v10, %v177_v30 }
  0xce   :  { %v276_v33 = vpop.f32.mrf.mxu0  ;;  %v284_v36 = vpop.f32.mrf.mxu1 }
  0xcf   :  { %225 = vst.msk [vmem:[%s423_s3 + $0x18] sm:$0xff] %vm221_vm2, %v208_v28  ;;  %v206_v34 = vmax.f32 %v146_v29, 0.0  ;;  %v167_v35 = vadd.f32 %v276_v33, %v242_v10  ;;  %233 = vst.msk [vmem:[%s423_s3 + $0x58] sm:$0xff] %vm221_vm2, %v216_v31  ;;  %v214_v37 = vmax.f32 %v178_v32, 0.0  ;;  %v199_v38 = vadd.f32 %v284_v36, %v242_v10 }
  0xd0   :  { %v158_v39 = vpop.f32.mrf.mxu0  ;;  %v190_v42 = vpop.f32.mrf.mxu1 }
  0xd1   :  { %223 = vst.msk [vmem:[%s423_s3 + $0x8] sm:$0xff] %vm221_vm2, %v206_v34  ;;  %v211_v40 = vmax.f32 %v167_v35, 0.0  ;;  %v159_v41 = vadd.f32 %v242_v10, %v158_v39  ;;  %231 = vst.msk [vmem:[%s423_s3 + $0x48] sm:$0xff] %vm221_vm2, %v214_v37  ;;  %v219_v43 = vmax.f32 %v199_v38, 0.0  ;;  %v191_v44 = vadd.f32 %v242_v10, %v190_v42 }
  0xd2   :  { %v277_v45 = vpop.f32.mrf.mxu0  ;;  %v285_v48 = vpop.f32.mrf.mxu1 }
  0xd3   :  { %228 = vst.msk [vmem:[%s423_s3 + $0x30] sm:$0xff] %vm221_vm2, %v211_v40  ;;  %v209_v46 = vmax.f32 %v159_v41, 0.0  ;;  %v170_v47 = vadd.f32 %v277_v45, %v242_v10  ;;  %236 = vst.msk [vmem:[%s423_s3 + $0x70] sm:$0xff] %vm221_vm2, %v219_v43  ;;  %v217_v49 = vmax.f32 %v191_v44, 0.0  ;;  %v202_v50 = vadd.f32 %v285_v48, %v242_v10 }
  0xd4   :  { %v161_v51 = vpop.f32.mrf.mxu0  ;;  %v193_v54 = vpop.f32.mrf.mxu1 }
  0xd5   :  { %226 = vst.msk [vmem:[%s423_s3 + $0x20] sm:$0xff] %vm221_vm2, %v209_v46  ;;  %v212_v52 = vmax.f32 %v170_v47, 0.0  ;;  %v162_v53 = vadd.f32 %v242_v10, %v161_v51  ;;  %234 = vst.msk [vmem:[%s423_s3 + $0x60] sm:$0xff] %vm221_vm2, %v217_v49  ;;  %v220_v55 = vmax.f32 %v202_v50, 0.0  ;;  %v194_v56 = vadd.f32 %v242_v10, %v193_v54 }
  0xd7   :  { %229 = vst.msk [vmem:[%s423_s3 + $0x38] sm:$0xff] %vm221_vm2, %v212_v52  ;;  %v210_v57 = vmax.f32 %v162_v53, 0.0  ;;  %237 = vst.msk [vmem:[%s423_s3 + $0x78] sm:$0xff] %vm221_vm2, %v220_v55  ;;  %v218_v58 = vmax.f32 %v194_v56, 0.0 }
  0xd9   :  { %227 = vst.msk [vmem:[%s423_s3 + $0x28] sm:$0xff] %vm221_vm2, %v210_v57  ;;  %235 = vst.msk [vmem:[%s423_s3 + $0x68] sm:$0xff] %vm221_vm2, %v218_v58 }

// kernel: forward.31
= control target key start
LH: loop header
LB: loop body
LE: loop exit
PB: predicated region body
PF: predicated region fallthrough
CT: control target
= control target key end

     0   :  { %v234_v0 = vmov 0   ;;  %vm116_vm0 = vcmask 130048   ;;  %s315_s1 = inlined_call_operand.vmem [shape: bf16[144,16], index: 1, kind: input, shape index: {}]   ;;  %s316_s0 = inlined_call_operand.vmem [shape: bf16[32,144], index: 0, kind: input, shape index: {}]   ;;  %s317_s2 = inlined_call_operand.vmem [shape: f32[1,16], index: 2, kind: input, shape index: {}]   ;;  %s318_s3 = inlined_call_operand.vmem [shape: f32[32,16], index: 3, kind: output, shape index: {}]  }
   0x1   :  { %123 = vmatprep.subr.bf16.mxu0 %v234_v0  ;;  %200 = vmatprep.subr.bf16.mxu1 %v234_v0  ;;  %v219_v1 = vld [vmem:[%s315_s1 + $0x38] sm:$0xff]   ;;  %v220_v2 = vld [vmem:[%s315_s1 + $0x30] sm:$0xff]   ;;  %v221_v3 = vld [vmem:[%s315_s1 + $0x28] sm:$0xff]  }
   0x2   :  { %124 = vmatpush1.bf16.msra.mxu0 %v219_v1  ;;  %209 = vmatpush1.bf16.msra.mxu1 %v219_v1  ;;  %v222_v4 = vld [vmem:[%s315_s1 + $0x20] sm:$0xff]   ;;  %v233_v6 = vld [vmem:[%s316_s0 + $0x14] ss:$8 sps:$4 sm:$0xff]   ;;  %v225_v9 = vld [vmem:[%s315_s1 + $0x8] sm:$0xff]  }
   0x3   :  { %125 = vmatprep.subr.bf16.mxu0 %v234_v0  ;;  %201 = vmatprep.subr.bf16.mxu1 %v234_v0  ;;  %v230_v5 = vld [vmem:[%s316_s0 + $0x4] ss:$8 sps:$4 sm:$0xff]   ;;  %v223_v7 = vld [vmem:[%s315_s1 + $0x18] sm:$0xff]   ;;  %v224_v8 = vld [vmem:[%s315_s1 + $0x10] sm:$0xff]  }
   0x4   :  { %198 = vmatprep.mubr.msk.bf16.mxu0 %vm116_vm0, %v230_v5  ;;  %199 = vmatprep.mubr.msk.bf16.mxu1 %vm116_vm0, %v233_v6  ;;  %v226_v10 = vld [vmem:[%s315_s1] sm:$0xff]   ;;  %v231_v13 = vld [vmem:[%s316_s0 + $0x10] ss:$8 sps:$4 sm:$0xff]  }
   0x5   :  { %v227_v11 = vld [vmem:[%s315_s1 + $0x40] sm:$0xff]  }
   0x6   :  { %126 = vmatpush1.bf16.msra.mxu0 %v220_v2  ;;  %210 = vmatpush1.bf16.msra.mxu1 %v220_v2  ;;  %v228_v12 = vld [vmem:[%s316_s0] ss:$8 sps:$4 sm:$0xff]  }
   0x7   :  { %127 = vmatprep.subr.bf16.mxu0 %v234_v0  ;;  %202 = vmatprep.subr.bf16.mxu1 %v234_v0  ;;  %v184_v14 = vld [vmem:[%s317_s2] ss:$0 sm:$0xff] }
   0xa   :  { %128 = vmatpush1.bf16.msra.mxu0 %v221_v3  ;;  %211 = vmatpush1.bf16.msra.mxu1 %v221_v3 }
   0xb   :  { %129 = vmatprep.subr.bf16.mxu0 %v234_v0  ;;  %203 = vmatprep.subr.bf16.mxu1 %v234_v0 }
   0xe   :  { %130 = vmatpush1.bf16.msra.mxu0 %v222_v4  ;;  %212 = vmatpush1.bf16.msra.mxu1 %v222_v4 }
   0xf   :  { %131 = vmatprep.subr.bf16.mxu0 %v234_v0  ;;  %204 = vmatprep.subr.bf16.mxu1 %v234_v0 }
  0x12   :  { %132 = vmatpush1.bf16.msra.mxu0 %v223_v7  ;;  %213 = vmatpush1.bf16.msra.mxu1 %v223_v7 }
  0x13   :  { %133 = vmatprep.subr.bf16.mxu0 %v234_v0  ;;  %205 = vmatprep.subr.bf16.mxu1 %v234_v0 }
  0x16   :  { %134 = vmatpush1.bf16.msra.mxu0 %v224_v8  ;;  %214 = vmatpush1.bf16.msra.mxu1 %v224_v8 }
  0x17   :  { %135 = vmatprep.subr.bf16.mxu0 %v234_v0  ;;  %206 = vmatprep.subr.bf16.mxu1 %v234_v0 }
  0x1a   :  { %136 = vmatpush1.bf16.msra.mxu0 %v225_v9  ;;  %215 = vmatpush1.bf16.msra.mxu1 %v225_v9 }
  0x1b   :  { %137 = vmatprep.subr.bf16.mxu0 %v234_v0  ;;  %207 = vmatprep.subr.bf16.mxu1 %v234_v0 }
  0x1e   :  { %138 = vmatpush1.bf16.msra.mxu0 %v226_v10  ;;  %216 = vmatpush1.bf16.msra.mxu1 %v226_v10 }
  0x1f   :  { %153 = vmatprep.subr.bf16.mxu0 %v234_v0  ;;  %208 = vmatprep.subr.bf16.mxu1 %v234_v0 }
  0x22   :  { %154 = vmatpush2.bf16.msra.mxu0 %v227_v11  ;;  %217 = vmatpush2.bf16.msra.mxu1 %v227_v11 }
  0x25   :  { %156 = vmatmul.mubr.bf16.vlgmr.msra.gmra.mxu0 %v228_v12  ;;  %164 = vmatmul.mubr.bf16.vlgmr.msra.gmra.mxu1 %v231_v13 }
  0xe5   :  { %v157_v15 = vpop.f32.mrf.mxu0  ;;  %v165_v16 = vpop.f32.mrf.mxu1 }
  0xe6   :  { %v158_v17 = vadd.f32 %v184_v14, %v157_v15  ;;  %v166_v18 = vadd.f32 %v184_v14, %v165_v16 }
  0xe7   :  { %v159_v19 = vpop.f32.mrf.mxu0  ;;  %v167_v20 = vpop.f32.mrf.mxu1 }
  0xe8   :  { %v172_v21 = vmax.f32 %v158_v17, 0.0  ;;  %v174_v22 = vmax.f32 %v166_v18, 0.0 }
  0xe9   :  { %v160_v23 = vpop.f32.mrf.mxu0  ;;  %v168_v24 = vpop.f32.mrf.mxu1 }
  0xea   :  { %176 = vst.msk [vmem:[%s318_s3] sm:$0xff] %vm116_vm0, %v172_v21  ;;  %178 = vst.msk [vmem:[%s318_s3 + $0x10] sm:$0xff] %vm116_vm0, %v174_v22  ;;  %v161_v25 = vadd.f32 %v184_v14, %v160_v23  ;;  %v169_v26 = vadd.f32 %v184_v14, %v168_v24 }
  0xeb   :  { %v162_v27 = vpop.f32.mrf.mxu0  ;;  %v170_v28 = vpop.f32.mrf.mxu1 }
  0xec   :  { %v173_v29 = vmax.f32 %v161_v25, 0.0  ;;  %v175_v30 = vmax.f32 %v169_v26, 0.0 }
  0xee   :  { %177 = vst.msk [vmem:[%s318_s3 + $0x8] sm:$0xff] %vm116_vm0, %v173_v29  ;;  %179 = vst.msk [vmem:[%s318_s3 + $0x18] sm:$0xff] %vm116_vm0, %v175_v30 }

// kernel: forward.32
= control target key start
LH: loop header
LB: loop body
LE: loop exit
PB: predicated region body
PF: predicated region fallthrough
CT: control target
= control target key end

     0   :  { %vm128_vm0 = vcmask 1043456   ;;  %vm121_vm1 = vcmask 64512   ;;  %vm50_vm2 = vcmask 130048   ;;  %s300_s4 = inlined_call_operand.vmem [shape: bf16[8,16], index: 4, kind: input, shape index: {}]   ;;  %s301_s1 = inlined_call_operand.vmem [shape: bf16[16,16], index: 1, kind: input, shape index: {}]   ;;  %s302_s3 = inlined_call_operand.vmem [shape: bf16[32,8], index: 3, kind: input, shape index: {}]   ;;  %s303_s0 = inlined_call_operand.vmem [shape: bf16[32,16], index: 0, kind: input, shape index: {}]   ;;  %s304_s2 = inlined_call_operand.vmem [shape: f32[1,16], index: 2, kind: input, shape index: {}]   ;;  %s305_s5 = inlined_call_operand.vmem [shape: f32[32,16], index: 5, kind: output, shape index: {}]  }
   0x1   :  { %v110_v0 = vld [vmem:[%s300_s4] sm:$0xf]  ;;  %v228_v4 = vld [vmem:[%s302_s3 + $0x8] sm:$0xff]  }
   0x2   :  { %225 = vmatprep.subr.msk.bf16.mxu1 %vm128_vm0, %v110_v0  ;;  %v130_v1 = vsel %vm128_vm0, %v110_v0, 0  ;;  %v226_v2 = vld [vmem:[%s301_s1] sm:$0xff]   ;;  %v230_v6 = vld [vmem:[%s303_s0 + $0x8] sm:$0xff]  }
   0x3   :  { %220 = vmatpush3.bf16.msra.mxu1 %v130_v1  ;;  %v227_v3 = vld [vmem:[%s302_s3] sm:$0xff]   ;;  %213 = vmatprep.subr.bf16.mxu0 %v226_v2 }
   0x4   :  { %214 = vmatpush3.bf16.msra.mxu0 %v226_v2  ;;  %221 = vmatprep.mubr.msk.bf16.mxu1 %vm121_vm1, %v227_v3  ;;  %v229_v5 = vld [vmem:[%s303_s0] sm:$0xff]  }
   0x5   :  { %215 = vmatprep.mubr.msk.bf16.mxu0 %vm50_vm2, %v229_v5  ;;  %v197_v8 = vld [vmem:[%s304_s2] ss:$0 sm:$0xff] }
   0x6   :  { %222 = vmatmul.mubr.msk.bf16.vlgmr.msra.gmra.mxu1 %vm121_vm1, %v228_v4 }
   0x7   :  { %216 = vmatmul.mubr.msk.bf16.vlgmr.msra.gmra.mxu0 %vm50_vm2, %v230_v6 }
  0xc6   :  { %v223_v7 = vpop.f32.mrf.mxu1 }
  0xc7   :  { %v217_v9 = vpop.f32.mrf.mxu0 }
  0xc8   :  { %v166_v10 = vpop.f32.mrf.mxu1  ;;  %v100_v11 = vadd.f32 %v217_v9, %v197_v8 }
  0xc9   :  { %v91_v12 = vpop.f32.mrf.mxu0 }
  0xca   :  { %v183_v13 = vadd.f32 %v223_v7, %v100_v11  ;;  %v92_v14 = vadd.f32 %v197_v8, %v91_v12  ;;  %v224_v15 = vpop.f32.mrf.mxu1 }
  0xcb   :  { %v218_v16 = vpop.f32.mrf.mxu0 }
  0xcc   :  { %v187_v17 = vmax.f32 %v183_v13, 0.0  ;;  %v181_v18 = vadd.f32 %v166_v10, %v92_v14  ;;  %v103_v19 = vadd.f32 %v218_v16, %v197_v8  ;;  %v169_v24 = vpop.f32.mrf.mxu1 }
  0xcd   :  { %v94_v20 = vpop.f32.mrf.mxu0 }
  0xce   :  { %191 = vst.msk [vmem:[%s305_s5 + $0x10] sm:$0xff] %vm50_vm2, %v187_v17  ;;  %v185_v21 = vmax.f32 %v181_v18, 0.0  ;;  %v184_v22 = vadd.f32 %v224_v15, %v103_v19  ;;  %v95_v23 = vadd.f32 %v197_v8, %v94_v20 }
  0xd0   :  { %189 = vst.msk [vmem:[%s305_s5] sm:$0xff] %vm50_vm2, %v185_v21  ;;  %v188_v25 = vmax.f32 %v184_v22, 0.0  ;;  %v182_v26 = vadd.f32 %v169_v24, %v95_v23 }
  0xd2   :  { %192 = vst.msk [vmem:[%s305_s5 + $0x18] sm:$0xff] %vm50_vm2, %v188_v25  ;;  %v186_v27 = vmax.f32 %v182_v26, 0.0 }
  0xd4   :  { %190 = vst.msk [vmem:[%s305_s5 + $0x8] sm:$0xff] %vm50_vm2, %v186_v27 }

// kernel: forward.33
= control target key start
LH: loop header
LB: loop body
LE: loop exit
PB: predicated region body
PF: predicated region fallthrough
CT: control target
= control target key end

     0   :  { %vm44_vm0 = vcmask 130048   ;;  %s180_s1 = inlined_call_operand.vmem [shape: bf16[16,16], index: 1, kind: input, shape index: {}]   ;;  %s181_s0 = inlined_call_operand.vmem [shape: bf16[32,16], index: 0, kind: input, shape index: {}]   ;;  %s182_s2 = inlined_call_operand.vmem [shape: f32[1,16], index: 2, kind: input, shape index: {}]   ;;  %s183_s3 = inlined_call_operand.vmem [shape: f32[32,16], index: 3, kind: output, shape index: {}]  }
   0x1   :  { %v127_v0 = vld [vmem:[%s180_s1] sm:$0xff]   ;;  %v129_v2 = vld [vmem:[%s181_s0 + $0x8] sm:$0xff]  }
   0x2   :  { %v128_v1 = vld [vmem:[%s181_s0] sm:$0xff]   ;;  %121 = vmatprep.subr.bf16.mxu0 %v127_v0 }
   0x3   :  { %122 = vmatpush3.bf16.msra.mxu0 %v127_v0  ;;  %123 = vmatprep.mubr.msk.bf16.mxu0 %vm44_vm0, %v128_v1  ;;  %v112_v3 = vld [vmem:[%s182_s2] ss:$0 sm:$0xff] }
   0x6   :  { %124 = vmatmul.mubr.msk.bf16.vlgmr.msra.gmra.mxu0 %vm44_vm0, %v129_v2 }
  0xc6   :  { %v125_v4 = vpop.f32.mrf.mxu0 }
  0xc7   :  { %v94_v5 = vadd.f32 %v125_v4, %v112_v3 }
  0xc8   :  { %v85_v6 = vpop.f32.mrf.mxu0 }
  0xc9   :  { %v102_v7 = vmax.f32 %v94_v5, 0.0  ;;  %v86_v8 = vadd.f32 %v112_v3, %v85_v6 }
  0xca   :  { %v126_v9 = vpop.f32.mrf.mxu0 }
  0xcb   :  { %106 = vst.msk [vmem:[%s183_s3 + $0x10] sm:$0xff] %vm44_vm0, %v102_v7  ;;  %v100_v10 = vmax.f32 %v86_v8, 0.0  ;;  %v97_v11 = vadd.f32 %v126_v9, %v112_v3 }
  0xcc   :  { %v88_v12 = vpop.f32.mrf.mxu0 }
  0xcd   :  { %104 = vst.msk [vmem:[%s183_s3] sm:$0xff] %vm44_vm0, %v100_v10  ;;  %v103_v13 = vmax.f32 %v97_v11, 0.0  ;;  %v89_v14 = vadd.f32 %v112_v3, %v88_v12 }
  0xcf   :  { %107 = vst.msk [vmem:[%s183_s3 + $0x18] sm:$0xff] %vm44_vm0, %v103_v13  ;;  %v101_v15 = vmax.f32 %v89_v14, 0.0 }
  0xd1   :  { %105 = vst.msk [vmem:[%s183_s3 + $0x8] sm:$0xff] %vm44_vm0, %v101_v15 }

// kernel: forward.36
= control target key start
LH: loop header
LB: loop body
LE: loop exit
PB: predicated region body
PF: predicated region fallthrough
CT: control target
= control target key end

     0   :  { %vm44_vm0 = vcmask 130048   ;;  %vm104_vm1 = vcmask 392192   ;;  %s175_s1 = inlined_call_operand.vmem [shape: bf16[16,48], index: 1, kind: input, shape index: {}]   ;;  %s176_s0 = inlined_call_operand.vmem [shape: bf16[32,16], index: 0, kind: input, shape index: {}]   ;;  %s177_s2 = inlined_call_operand.vmem [shape: f32[1,48], index: 2, kind: input, shape index: {}]   ;;  %s178_s3 = inlined_call_operand.vmem [shape: f32[32,48], index: 3, kind: output, shape index: {}]  }
   0x1   :  { %v128_v0 = vld [vmem:[%s175_s1] sm:$0xff]   ;;  %v130_v2 = vld [vmem:[%s176_s0 + $0x8] sm:$0xff]  }
   0x2   :  { %v129_v1 = vld [vmem:[%s176_s0] sm:$0xff]   ;;  %122 = vmatprep.subr.bf16.mxu0 %v128_v0 }
   0x3   :  { %123 = vmatpush3.bf16.msra.mxu0 %v128_v0  ;;  %124 = vmatprep.mubr.msk.bf16.mxu0 %vm44_vm0, %v129_v1  ;;  %v113_v3 = vld [vmem:[%s177_s2] ss:$0 sm:$0xff] }
   0x6   :  { %125 = vmatmul.mubr.msk.bf16.vlgmr.msra.gmra.mxu0 %vm44_vm0, %v130_v2 }
  0xc6   :  { %v126_v4 = vpop.f32.mrf.mxu0 }
  0xc7   :  { %v94_v5 = vadd.f32 %v126_v4, %v113_v3 }
  0xc8   :  { %v85_v6 = vpop.f32.mrf.mxu0 }
  0xc9   :  { %v102_v7 = vmax.f32 %v94_v5, 0.0  ;;  %v86_v8 = vadd.f32 %v113_v3, %v85_v6 }
  0xca   :  { %v127_v9 = vpop.f32.mrf.mxu0 }
  0xcb   :  { %107 = vst.msk [vmem:[%s178_s3 + $0x10] sm:$0xff] %vm104_vm1, %v102_v7  ;;  %v100_v10 = vmax.f32 %v86_v8, 0.0  ;;  %v97_v11 = vadd.f32 %v127_v9, %v113_v3 }
  0xcc   :  { %v88_v12 = vpop.f32.mrf.mxu0 }
  0xcd   :  { %105 = vst.msk [vmem:[%s178_s3] sm:$0xff] %vm104_vm1, %v100_v10  ;;  %v103_v13 = vmax.f32 %v97_v11, 0.0  ;;  %v89_v14 = vadd.f32 %v113_v3, %v88_v12 }
  0xcf   :  { %108 = vst.msk [vmem:[%s178_s3 + $0x18] sm:$0xff] %vm104_vm1, %v103_v13  ;;  %v101_v15 = vmax.f32 %v89_v14, 0.0 }
  0xd1   :  { %106 = vst.msk [vmem:[%s178_s3 + $0x8] sm:$0xff] %vm104_vm1, %v101_v15 }

// kernel: forward.35
= control target key start
LH: loop header
LB: loop body
LE: loop exit
PB: predicated region body
PF: predicated region fallthrough
CT: control target
= control target key end

     0   :  { %vm47_vm0 = vcmask 130048   ;;  %s208_s1 = inlined_call_operand.vmem [shape: bf16[16,16], index: 1, kind: input, shape index: {}]   ;;  %s209_s0 = inlined_call_operand.vmem [shape: bf16[32,16], index: 0, kind: input, shape index: {}]   ;;  %s210_s2 = inlined_call_operand.vmem [shape: f32[1,16], index: 2, kind: input, shape index: {}]   ;;  %s211_s3 = inlined_call_operand.vmem [shape: f32[32,16], index: 3, kind: input, shape index: {}]   ;;  %s212_s4 = inlined_call_operand.vmem [shape: f32[32,16], index: 4, kind: output, shape index: {}]  }
   0x1   :  { %v138_v0 = vld [vmem:[%s208_s1] sm:$0xff]   ;;  %v140_v2 = vld [vmem:[%s209_s0 + $0x8] sm:$0xff]   ;;  %v105_v5 = vld [vmem:[%s211_s3 + $0x10] sm:$0xff] }
   0x2   :  { %v139_v1 = vld [vmem:[%s209_s0] sm:$0xff]   ;;  %132 = vmatprep.subr.bf16.mxu0 %v138_v0  ;;  %v106_v12 = vld [vmem:[%s211_s3 + $0x18] sm:$0xff]  ;;  %v104_v17 = vld [vmem:[%s211_s3 + $0x8] sm:$0xff] }
   0x3   :  { %133 = vmatpush3.bf16.msra.mxu0 %v138_v0  ;;  %134 = vmatprep.mubr.msk.bf16.mxu0 %vm47_vm0, %v139_v1  ;;  %v123_v3 = vld [vmem:[%s210_s2] ss:$0 sm:$0xff] }
   0x4   :  { %v103_v8 = vld [vmem:[%s211_s3] sm:$0xff] }
   0x6   :  { %135 = vmatmul.mubr.msk.bf16.vlgmr.msra.gmra.mxu0 %vm47_vm0, %v140_v2 }
  0xc6   :  { %v136_v4 = vpop.f32.mrf.mxu0 }
  0xc7   :  { %v97_v6 = vadd.f32 %v136_v4, %v123_v3 }
  0xc8   :  { %v88_v7 = vpop.f32.mrf.mxu0 }
  0xc9   :  { %v109_v9 = vadd.f32 %v105_v5, %v97_v6  ;;  %v89_v10 = vadd.f32 %v123_v3, %v88_v7 }
  0xca   :  { %v137_v11 = vpop.f32.mrf.mxu0 }
  0xcb   :  { %v113_v13 = vmax.f32 %v109_v9, 0.0  ;;  %v107_v14 = vadd.f32 %v103_v8, %v89_v10  ;;  %v100_v15 = vadd.f32 %v137_v11, %v123_v3 }
  0xcc   :  { %v91_v16 = vpop.f32.mrf.mxu0 }
  0xcd   :  { %117 = vst.msk [vmem:[%s212_s4 + $0x10] sm:$0xff] %vm47_vm0, %v113_v13  ;;  %v111_v18 = vmax.f32 %v107_v14, 0.0  ;;  %v110_v19 = vadd.f32 %v106_v12, %v100_v15  ;;  %v92_v20 = vadd.f32 %v123_v3, %v91_v16 }
  0xcf   :  { %115 = vst.msk [vmem:[%s212_s4] sm:$0xff] %vm47_vm0, %v111_v18  ;;  %v114_v21 = vmax.f32 %v110_v19, 0.0  ;;  %v108_v22 = vadd.f32 %v104_v17, %v92_v20 }
  0xd1   :  { %118 = vst.msk [vmem:[%s212_s4 + $0x18] sm:$0xff] %vm47_vm0, %v114_v21  ;;  %v112_v23 = vmax.f32 %v108_v22, 0.0 }
  0xd3   :  { %116 = vst.msk [vmem:[%s212_s4 + $0x8] sm:$0xff] %vm47_vm0, %v112_v23 }

// kernel: forward.37
= control target key start
LH: loop header
LB: loop body
LE: loop exit
PB: predicated region body
PF: predicated region fallthrough
CT: control target
= control target key end

     0   :  { %v430_v0 = vmov 0   ;;  %vm253_vm0 = vcmask 392192   ;;  %s557_s1 = inlined_call_operand.vmem [shape: bf16[432,48], index: 1, kind: input, shape index: {}]   ;;  %s558_s0 = inlined_call_operand.vmem [shape: bf16[8,432], index: 0, kind: input, shape index: {}]   ;;  %s559_s2 = inlined_call_operand.vmem [shape: f32[1,48], index: 2, kind: input, shape index: {}]   ;;  %s560_s3 = inlined_call_operand.vmem [shape: f32[8,48], index: 3, kind: output, shape index: {}]  }
   0x1   :  { %297 = vmatprep.subr.bf16.mxu1 %v430_v0  ;;  %v399_v1 = vld [vmem:[%s557_s1 + $0x78] sm:$0xff]   ;;  %v402_v4 = vld [vmem:[%s557_s1 + $0x70] sm:$0xff]   ;;  %v405_v7 = vld [vmem:[%s557_s1 + $0x68] sm:$0xff]  }
   0x2   :  { %v400_v2 = vld [vmem:[%s557_s1 + $0xb8] sm:$0xff]   ;;  %376 = vmatprep.subr.bf16.mxu0 %v399_v1  ;;  %v403_v5 = vld [vmem:[%s557_s1 + $0xb0] sm:$0xff]   ;;  %v406_v8 = vld [vmem:[%s557_s1 + $0xa8] sm:$0xff]  }
   0x3   :  { %v401_v3 = vld [vmem:[%s557_s1 + $0x38] sm:$0xff]   ;;  %298 = vmatpush1.bf16.msra.mxu1 %v400_v2  ;;  %v404_v6 = vld [vmem:[%s557_s1 + $0x30] sm:$0xff]   ;;  %v407_v9 = vld [vmem:[%s557_s1 + $0x28] sm:$0xff]  }
   0x4   :  { %377 = vmatpush3.bf16.msra.mxu0 %v401_v3  ;;  %299 = vmatprep.subr.bf16.mxu1 %v430_v0  ;;  %v408_v10 = vld [vmem:[%s557_s1 + $0x60] sm:$0xff]   ;;  %v411_v13 = vld [vmem:[%s557_s1 + $0x58] sm:$0xff]   ;;  %v414_v16 = vld [vmem:[%s557_s1 + $0x50] sm:$0xff]  }
   0x5   :  { %378 = vmatprep.subr.bf16.mxu0 %v402_v4  ;;  %v409_v11 = vld [vmem:[%s557_s1 + $0xa0] sm:$0xff]   ;;  %v412_v14 = vld [vmem:[%s557_s1 + $0x98] sm:$0xff]   ;;  %v415_v17 = vld [vmem:[%s557_s1 + $0x90] sm:$0xff]  }
   0x6   :  { %v410_v12 = vld [vmem:[%s557_s1 + $0x20] sm:$0xff]   ;;  %v413_v15 = vld [vmem:[%s557_s1 + $0x18] sm:$0xff]   ;;  %v416_v18 = vld [vmem:[%s557_s1 + $0x10] sm:$0xff]  }
   0x7   :  { %300 = vmatpush1.bf16.msra.mxu1 %v403_v5  ;;  %v417_v19 = vld [vmem:[%s557_s1 + $0x48] sm:$0xff]   ;;  %v15_v22 = vld [vmem:[%s558_s0] sm:$0xff]  ;;  %v425_v30 = vld [vmem:[%s557_s1 + $0xd0] sm:$0xff]  }
   0x8   :  { %379 = vmatpush3.bf16.msra.mxu0 %v404_v6  ;;  %301 = vmatprep.subr.bf16.mxu1 %v430_v0  ;;  %v418_v20 = vld [vmem:[%s557_s1 + $0x88] sm:$0xff]   ;;  %v420_v23 = vld [vmem:[%s557_s1 + $0x40] sm:$0xff]   ;;  %v345_v24 = vcombine.high %v15_v22, %v15_v22  ;;  %v344_v29 = vcombine.low %v15_v22, %v15_v22 }
   0x9   :  { %380 = vmatprep.subr.bf16.mxu0 %v405_v7  ;;  %v419_v21 = vld [vmem:[%s557_s1 + $0x8] sm:$0xff]   ;;  %v421_v25 = vld [vmem:[%s557_s1 + $0x80] sm:$0xff]  }
   0xa   :  { %289 = vmatprep.mubr.bf16.mxu0 %v345_v24  ;;  %v16_v26 = vld [vmem:[%s558_s0 + $0x8] sm:$0xff]  ;;  %v422_v27 = vld [vmem:[%s557_s1] sm:$0xff]  }
   0xb   :  { %302 = vmatpush1.bf16.msra.mxu1 %v406_v8  ;;  %v347_v28 = vcombine.high %v16_v26, %v16_v26  ;;  %v426_v31 = vld [vmem:[%s557_s1 + $0xc8] sm:$0xff]   ;;  %v427_v32 = vld [vmem:[%s557_s1 + $0xc0] sm:$0xff]   ;;  %v346_v33 = vcombine.low %v16_v26, %v16_v26 }
   0xc   :  { %381 = vmatpush3.bf16.msra.mxu0 %v407_v9  ;;  %303 = vmatprep.subr.bf16.mxu1 %v430_v0  ;;  %v343_v38 = vld [vmem:[%s559_s2] ss:$0 sm:$0xff] }
   0xd   :  { %382 = vmatprep.subr.bf16.mxu0 %v408_v10  ;;  %375 = vmatprep.mubr.msk.bf16.mxu1 %vm253_vm0, %v347_v28 }
   0xf   :  { %304 = vmatpush1.bf16.msra.mxu1 %v409_v11 }
  0x10   :  { %383 = vmatpush3.bf16.msra.mxu0 %v410_v12  ;;  %305 = vmatprep.subr.bf16.mxu1 %v430_v0 }
  0x11   :  { %384 = vmatprep.subr.bf16.mxu0 %v411_v13 }
  0x13   :  { %306 = vmatpush1.bf16.msra.mxu1 %v412_v14 }
  0x14   :  { %385 = vmatpush3.bf16.msra.mxu0 %v413_v15  ;;  %307 = vmatprep.subr.bf16.mxu1 %v430_v0 }
  0x15   :  { %386 = vmatprep.subr.bf16.mxu0 %v414_v16 }
  0x17   :  { %308 = vmatpush1.bf16.msra.mxu1 %v415_v17 }
  0x18   :  { %387 = vmatpush3.bf16.msra.mxu0 %v416_v18  ;;  %309 = vmatprep.subr.bf16.mxu1 %v430_v0 }
  0x19   :  { %388 = vmatprep.subr.bf16.mxu0 %v417_v19 }
  0x1b   :  { %310 = vmatpush1.bf16.msra.mxu1 %v418_v20 }
  0x1c   :  { %389 = vmatpush3.bf16.msra.mxu0 %v419_v21  ;;  %311 = vmatprep.subr.bf16.mxu1 %v430_v0 }
  0x1d   :  { %390 = vmatprep.subr.bf16.mxu0 %v420_v23 }
  0x1f   :  { %312 = vmatpush1.bf16.msra.mxu1 %v421_v25 }
  0x20   :  { %391 = vmatpush3.bf16.msra.mxu0 %v422_v27  ;;  %323 = vmatprep.subr.bf16.mxu1 %v430_v0 }
  0x23   :  { %290 = vmatmul.mubr.bf16.vlgmr.msra.gmra.mxu0 %v344_v29  ;;  %324 = vmatpush2.bf16.msra.mxu1 %v425_v30 }
  0x24   :  { %325 = vmatprep.subr.bf16.mxu1 %v430_v0 }
  0x27   :  { %326 = vmatpush2.bf16.msra.mxu1 %v426_v31 }
  0x28   :  { %327 = vmatprep.subr.bf16.mxu1 %v430_v0 }
  0x2b   :  { %328 = vmatpush2.bf16.msra.mxu1 %v427_v32 }
  0x2e   :  { %330 = vmatmul.mubr.bf16.vlgmr.msra.gmra.mxu1 %v346_v33 }
  0xe3   :  { %v392_v34 = vpop.f32.mrf.mxu0 }
  0xe5   :  { %v393_v35 = vpop.f32.mrf.mxu0 }
  0xe6   :  { %v394_v36 = vadd.f32 %v393_v35, %v392_v34 }
  0xe7   :  { %v395_v37 = vpop.f32.mrf.mxu0 }
  0xe8   :  { %v292_v40 = vadd.f32 %v394_v36, %v343_v38 }
  0xe9   :  { %v396_v39 = vpop.f32.mrf.mxu0 }
  0xee   :  { %v331_v41 = vpop.f32.mrf.mxu1 }
  0xef   :  { %v332_v42 = vadd.f32 %v331_v41, %v292_v40 }
  0xf0   :  { %v333_v43 = vpop.f32.mrf.mxu1 }
  0xf1   :  { %v337_v44 = vmax.f32 %v332_v42, 0.0 }
  0xf2   :  { %v334_v45 = vpop.f32.mrf.mxu1 }
  0xf3   :  { %338 = vst.msk [vmem:[%s560_s3] sm:$0xff] %vm253_vm0, %v337_v44 }
  0xf4   :  { %v335_v46 = vpop.f32.mrf.mxu1 }

// kernel: forward.38
= control target key start
LH: loop header
LB: loop body
LE: loop exit
PB: predicated region body
PF: predicated region fallthrough
CT: control target
= control target key end

     0   :  { %v192_v0 = vmov 0.0   ;;  %vm193_vm0 = vmmov 0   ;;  %vm106_vm1 = vcmask 130048   ;;  %vm53_vm2 = vcmask 392192   ;;  %s250_s1 = inlined_call_operand.vmem [shape: bf16[48,48], index: 1, kind: input, shape index: {}]   ;;  %s251_s4 = inlined_call_operand.vmem [shape: bf16[16,48], index: 4, kind: input, shape index: {}]   ;;  %s252_s3 = inlined_call_operand.vmem [shape: bf16[8,16], index: 3, kind: input, shape index: {}]   ;;  %s253_s0 = inlined_call_operand.vmem [shape: bf16[8,48], index: 0, kind: input, shape index: {}]   ;;  %s254_s2 = inlined_call_operand.vmem [shape: f32[1,48], index: 2, kind: input, shape index: {}]   ;;  %s255_s5 = inlined_call_operand.vmem [shape: f32[8,48], index: 5, kind: output, shape index: {}]  }
   0x1   :  { %170 = vmatprep.subr.bf16.mxu0 %v192_v0  ;;  %v188_v1 = vld [vmem:[%s250_s1 + $0x10] sm:$0xff]   ;;  %180 = vmatprep.subr.bf16.mxu1 %v192_v0  ;;  %v189_v2 = vld [vmem:[%s251_s4] sm:$0xff]   ;;  %v190_v3 = vld [vmem:[%s250_s1 + $0x8] sm:$0xff]  }
   0x2   :  { %182 = vmatprep.mubr.msk.bf16.mxu1 %vm193_vm0, %v192_v0  ;;  %176 = vmatprep.mubr.msk.bf16.mxu0 %vm193_vm0, %v192_v0  ;;  %v97_v4 = vld [vmem:[%s252_s3] sm:$0xf] }
   0x3   :  { %171 = vmatpush3.bf16.msra.mxu0 %v188_v1  ;;  %181 = vmatpush3.bf16.msra.mxu1 %v189_v2  ;;  %v191_v5 = vld [vmem:[%s250_s1] sm:$0xff]  }
   0x4   :  { %172 = vmatprep.subr.bf16.mxu0 %v192_v0  ;;  %v21_v6 = vld [vmem:[%s253_s0] sm:$0xf] }
   0x5   :  { %v157_v10 = vld [vmem:[%s254_s2] ss:$0 sm:$0xff] }
   0x6   :  { %183 = vmatmul.mubr.msk.bf16.vlgmr.msra.gmra.mxu1 %vm106_vm1, %v97_v4 }
   0x7   :  { %173 = vmatpush3.bf16.msra.mxu0 %v190_v3 }
   0x8   :  { %174 = vmatprep.subr.bf16.mxu0 %v192_v0 }
   0xb   :  { %175 = vmatpush3.bf16.msra.mxu0 %v191_v5 }
   0xe   :  { %177 = vmatmul.mubr.msk.bf16.vlgmr.msra.gmra.mxu0 %vm53_vm2, %v21_v6 }
  0xc6   :  { %v144_v7 = vpop.f32.mrf.mxu1 }
  0xc8   :  { %v184_v8 = vpop.f32.mrf.mxu1 }
  0xca   :  { %v147_v9 = vpop.f32.mrf.mxu1 }
  0xcc   :  { %v185_v11 = vpop.f32.mrf.mxu1 }
  0xce   :  { %v91_v12 = vpop.f32.mrf.mxu0 }
  0xcf   :  { %v92_v13 = vadd.f32 %v157_v10, %v91_v12 }
  0xd0   :  { %v178_v14 = vpop.f32.mrf.mxu0 }
  0xd1   :  { %v150_v15 = vadd.f32 %v144_v7, %v92_v13 }
  0xd2   :  { %v94_v16 = vpop.f32.mrf.mxu0 }
  0xd3   :  { %v151_v17 = vmax.f32 %v150_v15, 0.0 }
  0xd4   :  { %v179_v18 = vpop.f32.mrf.mxu0 }
  0xd5   :  { %152 = vst.msk [vmem:[%s255_s5] sm:$0xff] %vm53_vm2, %v151_v17 }

// kernel: forward.39
= control target key start
LH: loop header
LB: loop body
LE: loop exit
PB: predicated region body
PF: predicated region fallthrough
CT: control target
= control target key end

     0   :  { %v135_v1 = vmov 0   ;;  %vm64_vm0 = vcmask 392192   ;;  %v24_v8 = vlaneseq  ;;  %vm112_vm1 = vcmask 785408   ;;  %s186_s1 = inlined_call_operand.vmem [shape: bf16[48,224], index: 1, kind: input, shape index: {}]   ;;  %s187_s0 = inlined_call_operand.vmem [shape: bf16[8,48], index: 0, kind: input, shape index: {}]   ;;  %s188_s2 = inlined_call_operand.vmem [shape: f32[1,224], index: 2, kind: input, shape index: {}]   ;;  %s189_s3 = inlined_call_operand.vmem [shape: f32[8,224], index: 3, kind: output, shape index: {}]  }
   0x1   :  { %v126_v0 = vld [vmem:[%s186_s1 + $0x24] ss:$8 sps:$4 sm:$0xff]   ;;  %100 = vmatprep.mubr.bf16.mxu0 %v135_v1  ;;  %v128_v2 = vld [vmem:[%s186_s1 + $0x20] ss:$8 sps:$4 sm:$0xff]   ;;  %v129_v3 = vld [vmem:[%s186_s1 + $0x14] ss:$8 sps:$4 sm:$0xff]  }
   0x2   :  { %78 = vmatprep.subr.bf16.mxu0 %v126_v0  ;;  %v131_v4 = vld [vmem:[%s186_s1 + $0x10] ss:$8 sps:$4 sm:$0xff]   ;;  %v132_v5 = vld [vmem:[%s186_s1 + $0x4] ss:$8 sps:$4 sm:$0xff]   ;;  %v134_v6 = vld [vmem:[%s186_s1] ss:$8 sps:$4 sm:$0xff]  }
   0x3   :  { %79 = vmatpush1.bf16.msra.mxu0 %v128_v2  ;;  %v15_v7 = vld [vmem:[%s187_s0] sm:$0xf]  ;;  %v25_v9 = vshrl.u32 %v24_v8, 7 }
   0x4   :  { %80 = vmatprep.subr.bf16.mxu0 %v129_v3  ;;  %v22_v11 = vld [vmem:[%s188_s2] sm:$0x3] }
   0x5   :  { %v26_v10 = vsub.s32 0, %v25_v9  ;;  %v30_v12 = vsub.s32 1, %v25_v9 }
   0x7   :  { %81 = vmatpush1.bf16.msra.mxu0 %v131_v4  ;;  %v27_v13 = vrot.slane %v22_v11, %v26_v10  ;;  %v31_v14 = vrot.slane %v22_v11, %v30_v12 }
   0x8   :  { %82 = vmatprep.subr.bf16.mxu0 %v132_v5 }
   0xb   :  { %83 = vmatpush1.bf16.msra.mxu0 %v134_v6 }
   0xe   :  { %124 = vmatmul.mubr.msk.bf16.vlgmr.msra.gmra.mxu0 %vm64_vm0, %v15_v7 }
  0xce   :  { %v102_v15 = vpop.f32.mrf.mxu0 }
  0xcf   :  { %v103_v16 = vadd.f32 %v102_v15, %v27_v13 }
  0xd0   :  { %v104_v17 = vpop.f32.mrf.mxu0 }
  0xd1   :  { %v109_v18 = vmax.f32 %v103_v16, 0.0  ;;  %v105_v19 = vadd.f32 %v104_v17, %v31_v14 }
  0xd2   :  { %v106_v20 = vpop.f32.mrf.mxu0 }
  0xd3   :  { %111 = vst [vmem:[%s189_s3] sm:$0xff] %v109_v18  ;;  %v110_v21 = vmax.f32 %v105_v19, 0.0 }
  0xd4   :  { %v107_v22 = vpop.f32.mrf.mxu0 }
  0xd5   :  { %113 = vst.msk [vmem:[%s189_s3 + $0x8] sm:$0xff] %vm112_vm1, %v110_v21 }

// kernel: forward.41
= control target key start
LH: loop header
LB: loop body
LE: loop exit
PB: predicated region body
PF: predicated region fallthrough
CT: control target
= control target key end

     0   :  { %v467_v1 = vmov 0   ;;  %v52_v10 = vlaneseq  ;;  %v468_v11 = vmov 1966171168   ;;  %vm226_vm0 = vcmask 785408   ;;  %s620_s1 = inlined_call_operand.vmem [shape: bf16[224,224], index: 1, kind: input, shape index: {}]   ;;  %s621_s4 = inlined_call_operand.vmem [shape: bf16[48,224], index: 4, kind: input, shape index: {}]   ;;  %s622_s0 = inlined_call_operand.vmem [shape: bf16[2,224], index: 0, kind: input, shape index: {}]   ;;  %s623_s3 = inlined_call_operand.vmem [shape: bf16[2,48], index: 3, kind: input, shape index: {}]   ;;  %s624_s2 = inlined_call_operand.vmem [shape: f32[1,224], index: 2, kind: input, shape index: {}]   ;;  %s625_s5 = inlined_call_operand.vmem [shape: f32[2,224], index: 5, kind: output, shape index: {}]  }
   0x1   :  { %v416_v0 = vld [vmem:[%s620_s1 + $0x74] ss:$8 sps:$4 sm:$0xff]   ;;  %344 = vmatprep.mubr.bf16.mxu1 %v467_v1  ;;  %v418_v2 = vld [vmem:[%s620_s1 + $0x70] ss:$8 sps:$4 sm:$0xff]   ;;  %v419_v3 = vld [vmem:[%s620_s1 + $0x64] ss:$8 sps:$4 sm:$0xff]   ;;  %v72_v12 = vunpack.c.l.s4 %v468_v11 }
   0x2   :  { %230 = vmatprep.subr.bf16.mxu0 %v416_v0  ;;  %v421_v4 = vld [vmem:[%s620_s1 + $0x60] ss:$8 sps:$4 sm:$0xff]   ;;  %v422_v5 = vld [vmem:[%s620_s1 + $0x54] ss:$8 sps:$4 sm:$0xff]   ;;  %v424_v6 = vld [vmem:[%s620_s1 + $0x50] ss:$8 sps:$4 sm:$0xff]  }
   0x3   :  { %231 = vmatpush1.bf16.msra.mxu0 %v418_v2  ;;  %v425_v7 = vld [vmem:[%s620_s1 + $0x44] ss:$8 sps:$4 sm:$0xff]   ;;  %v427_v8 = vld [vmem:[%s620_s1 + $0x40] ss:$8 sps:$4 sm:$0xff]   ;;  %v428_v9 = vld [vmem:[%s620_s1 + $0x34] ss:$8 sps:$4 sm:$0xff]   ;;  %v73_v20 = vunpack.c.0.s8 %v72_v12 }
   0x4   :  { %232 = vmatprep.subr.bf16.mxu0 %v419_v3  ;;  %v430_v13 = vld [vmem:[%s620_s1 + $0x30] ss:$8 sps:$4 sm:$0xff]   ;;  %v448_v14 = vld [vmem:[%s621_s4 + $0x24] ss:$8 sps:$4 sm:$0xff]   ;;  %v451_v15 = vld [vmem:[%s621_s4 + $0x20] ss:$8 sps:$4 sm:$0xff]  }
   0x5   :  { %v431_v16 = vld [vmem:[%s620_s1 + $0x24] ss:$8 sps:$4 sm:$0xff]   ;;  %322 = vmatprep.subr.bf16.mxu1 %v448_v14  ;;  %v454_v17 = vld [vmem:[%s621_s4 + $0x14] ss:$8 sps:$4 sm:$0xff]   ;;  %v457_v18 = vld [vmem:[%s621_s4 + $0x10] ss:$8 sps:$4 sm:$0xff]  }
   0x6   :  { %323 = vmatpush1.bf16.msra.mxu1 %v451_v15  ;;  %v545_v19 = vshrl.u32 %v52_v10, 7  ;;  %v433_v21 = vld [vmem:[%s620_s1 + $0x20] ss:$8 sps:$4 sm:$0xff]   ;;  %v434_v22 = vld [vmem:[%s620_s1 + $0x14] ss:$8 sps:$4 sm:$0xff]   ;;  %vm308_vm1 = vcmask 392192  }
   0x7   :  { %233 = vmatpush1.bf16.msra.mxu0 %v421_v4  ;;  %324 = vmatprep.subr.bf16.mxu1 %v454_v17  ;;  %v460_v23 = vld [vmem:[%s621_s4 + $0x4] ss:$8 sps:$4 sm:$0xff]   ;;  %v463_v24 = vld [vmem:[%s621_s4] ss:$8 sps:$4 sm:$0xff]   ;;  %v436_v26 = vld [vmem:[%s620_s1 + $0x10] ss:$8 sps:$4 sm:$0xff]  }
   0x8   :  { %234 = vmatprep.subr.bf16.mxu0 %v422_v5  ;;  %v76_v25 = vsub.s32 %v73_v20, %v545_v19  ;;  %v376_v27 = vld.sshfl [vmem:[%s622_s0] sm:$0x11 pattern:$0x75316420]  ;;  %v437_v28 = vld [vmem:[%s620_s1 + $0x4] ss:$8 sps:$4 sm:$0xff]  }
   0x9   :  { %v70_v29 = vcombine.high %v376_v27, %v376_v27  ;;  %v271_v30 = vld [vmem:[%s623_s3] sm:$0x1]  ;;  %v440_v33 = vld [vmem:[%s620_s1 + $0xd4] ss:$8 sps:$4 sm:$0xff]   ;;  %v442_v34 = vld [vmem:[%s620_s1 + $0xd0] ss:$8 sps:$4 sm:$0xff]  }
   0xa   :  { %325 = vmatpush1.bf16.msra.mxu1 %v457_v18  ;;  %v439_v32 = vld [vmem:[%s620_s1] ss:$8 sps:$4 sm:$0xff]   ;;  %v443_v35 = vld [vmem:[%s620_s1 + $0xc4] ss:$8 sps:$4 sm:$0xff]   ;;  %v446_v37 = vld [vmem:[%s620_s1 + $0xb4] ss:$8 sps:$4 sm:$0xff]   ;;  %v77_v45 = vrot.slane %v376_v27, %v76_v25 }
   0xb   :  { %235 = vmatpush1.bf16.msra.mxu0 %v424_v6  ;;  %326 = vmatprep.subr.bf16.mxu1 %v460_v23  ;;  %v84_v31 = vrot.slane %v70_v29, %v76_v25  ;;  %v445_v36 = vld [vmem:[%s620_s1 + $0xc0] ss:$8 sps:$4 sm:$0xff]   ;;  %v450_v38 = vld [vmem:[%s620_s1 + $0xb0] ss:$8 sps:$4 sm:$0xff]   ;;  %v452_v39 = vld [vmem:[%s620_s1 + $0xa4] ss:$8 sps:$4 sm:$0xff]  }
   0xc   :  { %236 = vmatprep.subr.bf16.mxu0 %v425_v7  ;;  %v456_v40 = vld [vmem:[%s620_s1 + $0xa0] ss:$8 sps:$4 sm:$0xff]   ;;  %v458_v41 = vld [vmem:[%s620_s1 + $0x94] ss:$8 sps:$4 sm:$0xff]   ;;  %v462_v42 = vld [vmem:[%s620_s1 + $0x90] ss:$8 sps:$4 sm:$0xff]  }
   0xd   :  { %405 = vmatprep.mubr.msk.bf16.mxu0 %vm226_vm0, %v84_v31  ;;  %v464_v43 = vld [vmem:[%s620_s1 + $0x84] ss:$8 sps:$4 sm:$0xff]   ;;  %v466_v44 = vld [vmem:[%s620_s1 + $0x80] ss:$8 sps:$4 sm:$0xff]   ;;  %v54_v50 = vsub.s32 0, %v545_v19  ;;  %v58_v52 = vsub.s32 1, %v545_v19 }
   0xe   :  { %327 = vmatpush1.bf16.msra.mxu1 %v463_v24  ;;  %v50_v51 = vld [vmem:[%s624_s2] sm:$0x3]  ;;  %v469_v54 = vmov 1983009808   ;;  %vm368_vm2 = vcmask 1041408   ;;  %vm369_vm3 = vcmask 781314  }
   0xf   :  { %237 = vmatpush1.bf16.msra.mxu0 %v427_v8  ;;  %v55_v53 = vrot.slane %v50_v51, %v54_v50  ;;  %v361_v55 = vunpack.c.l.s4 %v469_v54  ;;  %v59_v56 = vrot.slane %v50_v51, %v58_v52  ;;  %vm370_vm4 = vmor %vm369_vm3, %vm368_vm2 }
  0x10   :  { %238 = vmatprep.subr.bf16.mxu0 %v428_v9 }
  0x11   :  { %412 = vmatmul.mubr.msk.bf16.vlgmr.msra.gmra.mxu1 %vm308_vm1, %v271_v30  ;;  %v362_v60 = vunpack.c.0.s8 %v361_v55 }
  0x13   :  { %239 = vmatpush1.bf16.msra.mxu0 %v430_v13  ;;  %v365_v1 = vsub.s32 %v362_v60, %v545_v19 }
  0x14   :  { %240 = vmatprep.subr.bf16.mxu0 %v431_v16 }
  0x17   :  { %241 = vmatpush1.bf16.msra.mxu0 %v433_v21 }
  0x18   :  { %242 = vmatprep.subr.bf16.mxu0 %v434_v22 }
  0x1b   :  { %243 = vmatpush1.bf16.msra.mxu0 %v436_v26 }
  0x1c   :  { %244 = vmatprep.subr.bf16.mxu0 %v437_v28 }
  0x1f   :  { %245 = vmatpush1.bf16.msra.mxu0 %v439_v32 }
  0x20   :  { %250 = vmatprep.subr.bf16.mxu0 %v440_v33 }
  0x23   :  { %251 = vmatpush2.bf16.msra.mxu0 %v442_v34 }
  0x24   :  { %252 = vmatprep.subr.bf16.mxu0 %v443_v35 }
  0x27   :  { %253 = vmatpush2.bf16.msra.mxu0 %v445_v36 }
  0x28   :  { %254 = vmatprep.subr.bf16.mxu0 %v446_v37 }
  0x2b   :  { %255 = vmatpush2.bf16.msra.mxu0 %v450_v38 }
  0x2c   :  { %256 = vmatprep.subr.bf16.mxu0 %v452_v39 }
  0x2f   :  { %257 = vmatpush2.bf16.msra.mxu0 %v456_v40 }
  0x30   :  { %258 = vmatprep.subr.bf16.mxu0 %v458_v41 }
  0x33   :  { %259 = vmatpush2.bf16.msra.mxu0 %v462_v42 }
  0x34   :  { %260 = vmatprep.subr.bf16.mxu0 %v464_v43 }
  0x37   :  { %261 = vmatpush2.bf16.msra.mxu0 %v466_v44 }
  0x3a   :  { %263 = vmatmul.mubr.bf16.vlgmr.msra.gmra.mxu0 %v77_v45 }
  0xd1   :  { %v346_v46 = vpop.f32.mrf.mxu1 }
  0xd3   :  { %v348_v47 = vpop.f32.mrf.mxu1 }
  0xd5   :  { %v350_v48 = vpop.f32.mrf.mxu1 }
  0xd7   :  { %v351_v49 = vpop.f32.mrf.mxu1 }
  0xfa   :  { %v264_v57 = vpop.f32.mrf.mxu0 }
  0xfb   :  { %v265_v58 = vadd.f32 %v264_v57, %v55_v53 }
  0xfc   :  { %v266_v59 = vpop.f32.mrf.mxu0 }
  0xfd   :  { %v353_v61 = vadd.f32 %v346_v46, %v265_v58  ;;  %v267_v62 = vadd.f32 %v266_v59, %v59_v56 }
  0xfe   :  { %v268_v63 = vpop.f32.mrf.mxu0 }
  0xff   :  { %v354_v0 = vadd.f32 %v348_v47, %v267_v62  ;;  %v355_v3 = vmax.f32 %v353_v61, 0.0 }
 0x100   :  { %v269_v2 = vpop.f32.mrf.mxu0 }
 0x101   :  { %v356_v4 = vmax.f32 %v354_v0, 0.0 }
 0x103   :  { %v359_v5 = vcombine.low %v355_v3, %v356_v4 }
 0x105   :  { %v366_v6 = vrot.slane %v359_v5, %v365_v1 }
 0x107   :  { %371 = vst.msk [vmem:[%s625_s5] sm:$0xf] %vm370_vm4, %v366_v6 }

// kernel: forward.40
= control target key start
LH: loop header
LB: loop body
LE: loop exit
PB: predicated region body
PF: predicated region fallthrough
CT: control target
= control target key end

     0   :  { %v271_v35 = vlaneseq  ;;  %v2644_v36 = vmov 1966171168   ;;  %vm1656_vm0 = vcmask 785408   ;;  %vm2001_vm1 = vcmask 1041408   ;;  %s3474_s1 = inlined_call_operand.vmem [shape: bf16[2016,224], index: 1, kind: input, shape index: {}]   ;;  %s3475_s0 = inlined_call_operand.vmem [shape: bf16[2,2016], index: 0, kind: input, shape index: {}]   ;;  %s3476_s2 = inlined_call_operand.vmem [shape: f32[1,224], index: 2, kind: input, shape index: {}]   ;;  %s3477_s3 = inlined_call_operand.vmem [shape: f32[2,224], index: 3, kind: output, shape index: {}]  }
   0x1   :  { %v2264_v0 = vld [vmem:[%s3474_s1 + $0x74] ss:$8 sps:$4 sm:$0xff]   ;;  %v2266_v1 = vld [vmem:[%s3474_s1 + $0x70] ss:$8 sps:$4 sm:$0xff]   ;;  %v2270_v4 = vld [vmem:[%s3474_s1 + $0x64] ss:$8 sps:$4 sm:$0xff]   ;;  %v285_v37 = vunpack.c.l.s4 %v2644_v36 }
   0x2   :  { %1660 = vmatprep.subr.bf16.mxu0 %v2264_v0  ;;  %v2267_v2 = vld [vmem:[%s3474_s1 + $0x174] ss:$8 sps:$4 sm:$0xff]   ;;  %v2269_v3 = vld [vmem:[%s3474_s1 + $0x170] ss:$8 sps:$4 sm:$0xff]   ;;  %v2272_v5 = vld [vmem:[%s3474_s1 + $0x60] ss:$8 sps:$4 sm:$0xff]  }
   0x3   :  { %1661 = vmatpush1.bf16.msra.mxu0 %v2266_v1  ;;  %1701 = vmatprep.subr.bf16.mxu1 %v2267_v2  ;;  %v2273_v6 = vld [vmem:[%s3474_s1 + $0x164] ss:$8 sps:$4 sm:$0xff]   ;;  %v2275_v7 = vld [vmem:[%s3474_s1 + $0x160] ss:$8 sps:$4 sm:$0xff]   ;;  %v2276_v8 = vld [vmem:[%s3474_s1 + $0x54] ss:$8 sps:$4 sm:$0xff]   ;;  %v286_v43 = vunpack.c.0.s8 %v285_v37 }
   0x4   :  { %1702 = vmatpush1.bf16.msra.mxu1 %v2269_v3  ;;  %1662 = vmatprep.subr.bf16.mxu0 %v2270_v4  ;;  %v2278_v9 = vld [vmem:[%s3474_s1 + $0x50] ss:$8 sps:$4 sm:$0xff]   ;;  %v2279_v10 = vld [vmem:[%s3474_s1 + $0x154] ss:$8 sps:$4 sm:$0xff]   ;;  %v2282_v11 = vld [vmem:[%s3474_s1 + $0x44] ss:$8 sps:$4 sm:$0xff]  }
   0x5   :  { %1703 = vmatprep.subr.bf16.mxu1 %v2273_v6  ;;  %v2281_v12 = vld [vmem:[%s3474_s1 + $0x150] ss:$8 sps:$4 sm:$0xff]   ;;  %v2285_v13 = vld [vmem:[%s3474_s1 + $0x144] ss:$8 sps:$4 sm:$0xff]   ;;  %v2284_v14 = vld [vmem:[%s3474_s1 + $0x40] ss:$8 sps:$4 sm:$0xff]  }
   0x6   :  { %v2288_v15 = vld [vmem:[%s3474_s1 + $0x34] ss:$8 sps:$4 sm:$0xff]   ;;  %v2287_v16 = vld [vmem:[%s3474_s1 + $0x140] ss:$8 sps:$4 sm:$0xff]   ;;  %v2290_v18 = vld [vmem:[%s3474_s1 + $0x30] ss:$8 sps:$4 sm:$0xff]  }
   0x7   :  { %1663 = vmatpush1.bf16.msra.mxu0 %v2272_v5  ;;  %v2291_v17 = vld [vmem:[%s3474_s1 + $0x134] ss:$8 sps:$4 sm:$0xff]   ;;  %v2294_v19 = vld [vmem:[%s3474_s1 + $0x24] ss:$8 sps:$4 sm:$0xff]   ;;  %v2293_v20 = vld [vmem:[%s3474_s1 + $0x130] ss:$8 sps:$4 sm:$0xff]  }
   0x8   :  { %1664 = vmatprep.subr.bf16.mxu0 %v2276_v8  ;;  %1704 = vmatpush1.bf16.msra.mxu1 %v2275_v7  ;;  %v2297_v21 = vld [vmem:[%s3474_s1 + $0x124] ss:$8 sps:$4 sm:$0xff]   ;;  %v2296_v22 = vld [vmem:[%s3474_s1 + $0x20] ss:$8 sps:$4 sm:$0xff]   ;;  %v2300_v23 = vld [vmem:[%s3474_s1 + $0x14] ss:$8 sps:$4 sm:$0xff]  }
   0x9   :  { %1705 = vmatprep.subr.bf16.mxu1 %v2279_v10  ;;  %v2299_v24 = vld [vmem:[%s3474_s1 + $0x120] ss:$8 sps:$4 sm:$0xff]   ;;  %v2303_v25 = vld [vmem:[%s3474_s1 + $0x114] ss:$8 sps:$4 sm:$0xff]   ;;  %v2302_v26 = vld [vmem:[%s3474_s1 + $0x10] ss:$8 sps:$4 sm:$0xff]  }
   0xa   :  { %v2306_v27 = vld [vmem:[%s3474_s1 + $0x4] ss:$8 sps:$4 sm:$0xff]   ;;  %v2305_v28 = vld [vmem:[%s3474_s1 + $0x110] ss:$8 sps:$4 sm:$0xff]   ;;  %v2308_v30 = vld [vmem:[%s3474_s1] ss:$8 sps:$4 sm:$0xff]  }
   0xb   :  { %1665 = vmatpush1.bf16.msra.mxu0 %v2278_v9  ;;  %v2309_v29 = vld [vmem:[%s3474_s1 + $0x104] ss:$8 sps:$4 sm:$0xff]   ;;  %v2312_v31 = vld [vmem:[%s3474_s1 + $0xf4] ss:$8 sps:$4 sm:$0xff]   ;;  %v2311_v32 = vld [vmem:[%s3474_s1 + $0x100] ss:$8 sps:$4 sm:$0xff]  }
   0xc   :  { %1666 = vmatprep.subr.bf16.mxu0 %v2282_v11  ;;  %1706 = vmatpush1.bf16.msra.mxu1 %v2281_v12  ;;  %v2315_v33 = vld [vmem:[%s3474_s1 + $0x1f4] ss:$8 sps:$4 sm:$0xff]   ;;  %v2314_v34 = vld [vmem:[%s3474_s1 + $0xf0] ss:$8 sps:$4 sm:$0xff]   ;;  %v2318_v38 = vld [vmem:[%s3474_s1 + $0xe4] ss:$8 sps:$4 sm:$0xff]  }
   0xd   :  { %1707 = vmatprep.subr.bf16.mxu1 %v2285_v13  ;;  %v2317_v39 = vld [vmem:[%s3474_s1 + $0x1f0] ss:$8 sps:$4 sm:$0xff]   ;;  %v2321_v40 = vld [vmem:[%s3474_s1 + $0x1e4] ss:$8 sps:$4 sm:$0xff]   ;;  %v2320_v41 = vld [vmem:[%s3474_s1 + $0xe0] ss:$8 sps:$4 sm:$0xff]  }
   0xe   :  { %v2783_v42 = vshrl.u32 %v271_v35, 7  ;;  %v2324_v44 = vld [vmem:[%s3474_s1 + $0xd4] ss:$8 sps:$4 sm:$0xff]   ;;  %v2323_v45 = vld [vmem:[%s3474_s1 + $0x1e0] ss:$8 sps:$4 sm:$0xff]   ;;  %vm2002_vm2 = vcmask 781314  }
   0xf   :  { %1667 = vmatpush1.bf16.msra.mxu0 %v2284_v14  ;;  %v2327_v46 = vld [vmem:[%s3474_s1 + $0x1d4] ss:$8 sps:$4 sm:$0xff]   ;;  %v2326_v47 = vld [vmem:[%s3474_s1 + $0xd0] ss:$8 sps:$4 sm:$0xff]   ;;  %v2330_v49 = vld [vmem:[%s3474_s1 + $0xc4] ss:$8 sps:$4 sm:$0xff]  }
  0x10   :  { %1668 = vmatprep.subr.bf16.mxu0 %v2288_v15  ;;  %1708 = vmatpush1.bf16.msra.mxu1 %v2287_v16  ;;  %v2798_v48 = vsub.s32 %v286_v43, %v2783_v42  ;;  %v2329_v50 = vld [vmem:[%s3474_s1 + $0x1d0] ss:$8 sps:$4 sm:$0xff]   ;;  %v2333_v51 = vld [vmem:[%s3474_s1 + $0x1c4] ss:$8 sps:$4 sm:$0xff]   ;;  %v2332_v53 = vld [vmem:[%s3474_s1 + $0xc0] ss:$8 sps:$4 sm:$0xff]  }
  0x11   :  { %1709 = vmatprep.subr.bf16.mxu1 %v2291_v17  ;;  %v15_v52 = vld [vmem:[%s3475_s0] sm:$0xff]  ;;  %v2336_v55 = vld [vmem:[%s3474_s1 + $0xb4] ss:$8 sps:$4 sm:$0xff]   ;;  %v2338_v59 = vld [vmem:[%s3474_s1 + $0xb0] ss:$8 sps:$4 sm:$0xff]  }
  0x12   :  { %v290_v54 = vrot.slane %v15_v52, %v2798_v48  ;;  %v2335_v56 = vld [vmem:[%s3474_s1 + $0x1c0] ss:$8 sps:$4 sm:$0xff]   ;;  %v2339_v58 = vld [vmem:[%s3474_s1 + $0x1b4] ss:$8 sps:$4 sm:$0xff]   ;;  %v2342_v61 = vld [vmem:[%s3474_s1 + $0xa4] ss:$8 sps:$4 sm:$0xff]   ;;  %v283_v63 = vcombine.high %v15_v52, %v15_v52 }
  0x13   :  { %1669 = vmatpush1.bf16.msra.mxu0 %v2290_v18  ;;  %v2341_v62 = vld [vmem:[%s3474_s1 + $0x1b0] ss:$8 sps:$4 sm:$0xff]   ;;  %v2345_v1 = vld [vmem:[%s3474_s1 + $0x1a4] ss:$8 sps:$4 sm:$0xff]   ;;  %v2344_v2 = vld [vmem:[%s3474_s1 + $0xa0] ss:$8 sps:$4 sm:$0xff]  }
  0x14   :  { %1670 = vmatprep.subr.bf16.mxu0 %v2294_v19  ;;  %1710 = vmatpush1.bf16.msra.mxu1 %v2293_v20  ;;  %v298_v57 = vcombine.high %v290_v54, %v290_v54  ;;  %v2348_v3 = vld [vmem:[%s3474_s1 + $0x94] ss:$8 sps:$4 sm:$0xff]   ;;  %v2347_v4 = vld [vmem:[%s3474_s1 + $0x1a0] ss:$8 sps:$4 sm:$0xff]   ;;  %v2848_v5 = vrot.slane %v283_v63, %v2798_v48  ;;  %v2350_v7 = vld [vmem:[%s3474_s1 + $0x90] ss:$8 sps:$4 sm:$0xff]   ;;  %v306_v13 = vrot.slane %v290_v54, %v2798_v48 }
  0x15   :  { %1711 = vmatprep.subr.bf16.mxu1 %v2297_v21  ;;  %v2351_v6 = vld [vmem:[%s3474_s1 + $0x194] ss:$8 sps:$4 sm:$0xff]   ;;  %v2354_v8 = vld [vmem:[%s3474_s1 + $0x84] ss:$8 sps:$4 sm:$0xff]   ;;  %v2353_v9 = vld [vmem:[%s3474_s1 + $0x190] ss:$8 sps:$4 sm:$0xff]  }
  0x16   :  { %v320_v60 = vrot.slane %v298_v57, %v2798_v48  ;;  %v299_v10 = vcombine.high %v2848_v5, %v2848_v5  ;;  %v2357_v11 = vld [vmem:[%s3474_s1 + $0x184] ss:$8 sps:$4 sm:$0xff]   ;;  %v2356_v12 = vld [vmem:[%s3474_s1 + $0x80] ss:$8 sps:$4 sm:$0xff]   ;;  %v2364_v14 = vld [vmem:[%s3474_s1 + $0x274] ss:$8 sps:$4 sm:$0xff]   ;;  %v328_v19 = vcombine.high %v306_v13, %v306_v13 }
  0x17   :  { %1671 = vmatpush1.bf16.msra.mxu0 %v2296_v22  ;;  %v2361_v15 = vld [vmem:[%s3474_s1 + $0x180] ss:$8 sps:$4 sm:$0xff]   ;;  %v2367_v17 = vld [vmem:[%s3474_s1 + $0x374] ss:$8 sps:$4 sm:$0xff]   ;;  %v2362_v18 = vld [vmem:[%s3474_s1 + $0x270] ss:$8 sps:$4 sm:$0xff]  }
  0x18   :  { %1672 = vmatprep.subr.bf16.mxu0 %v2300_v23  ;;  %1712 = vmatpush1.bf16.msra.mxu1 %v2299_v24  ;;  %v330_v0 = vcombine.high %v320_v60, %v320_v60  ;;  %v327_v16 = vrot.slane %v299_v10, %v2798_v48  ;;  %v2370_v20 = vld [vmem:[%s3474_s1 + $0x264] ss:$8 sps:$4 sm:$0xff]   ;;  %v2365_v21 = vld [vmem:[%s3474_s1 + $0x370] ss:$8 sps:$4 sm:$0xff]   ;;  %v2368_v24 = vld [vmem:[%s3474_s1 + $0x260] ss:$8 sps:$4 sm:$0xff]  }
  0x19   :  { %1713 = vmatprep.subr.bf16.mxu1 %v2303_v25  ;;  %1692 = vmatprep.mubr.bf16.mxu0 %v320_v60  ;;  %v2373_v23 = vld [vmem:[%s3474_s1 + $0x364] ss:$8 sps:$4 sm:$0xff]   ;;  %v2376_v25 = vld [vmem:[%s3474_s1 + $0x254] ss:$8 sps:$4 sm:$0xff]   ;;  %v2386_v36 = vld [vmem:[%s3474_s1 + $0x230] ss:$8 sps:$4 sm:$0xff]  }
  0x1a   :  { %1733 = vmatprep.mubr.bf16.mxu1 %v330_v0  ;;  %v331_v22 = vcombine.high %v327_v16, %v327_v16  ;;  %v2391_v35 = vld [vmem:[%s3474_s1 + $0x334] ss:$8 sps:$4 sm:$0xff]   ;;  %v2394_v37 = vld [vmem:[%s3474_s1 + $0x224] ss:$8 sps:$4 sm:$0xff]   ;;  %v2395_v43 = vld [vmem:[%s3474_s1 + $0x320] ss:$8 sps:$4 sm:$0xff]  }
  0x1b   :  { %1673 = vmatpush1.bf16.msra.mxu0 %v2302_v26  ;;  %v2371_v26 = vld [vmem:[%s3474_s1 + $0x360] ss:$8 sps:$4 sm:$0xff]   ;;  %v2410_v54 = vld [vmem:[%s3474_s1 + $0x2f0] ss:$8 sps:$4 sm:$0xff]   ;;  %v2421_v57 = vld [vmem:[%s3474_s1 + $0x3e4] ss:$8 sps:$4 sm:$0xff]  }
  0x1c   :  { %1674 = vmatprep.subr.bf16.mxu0 %v2306_v27  ;;  %1714 = vmatpush1.bf16.msra.mxu1 %v2305_v28  ;;  %v2379_v27 = vld [vmem:[%s3474_s1 + $0x354] ss:$8 sps:$4 sm:$0xff]   ;;  %v2374_v28 = vld [vmem:[%s3474_s1 + $0x250] ss:$8 sps:$4 sm:$0xff]   ;;  %v2407_v52 = vld [vmem:[%s3474_s1 + $0x300] ss:$8 sps:$4 sm:$0xff]  }
  0x1d   :  { %1715 = vmatprep.subr.bf16.mxu1 %v2309_v29  ;;  %v2382_v29 = vld [vmem:[%s3474_s1 + $0x244] ss:$8 sps:$4 sm:$0xff]   ;;  %v2419_v60 = vld [vmem:[%s3474_s1 + $0x3e0] ss:$8 sps:$4 sm:$0xff]   ;;  %v2425_v0 = vld [vmem:[%s3474_s1 + $0x3d0] ss:$8 sps:$4 sm:$0xff]  }
  0x1e   :  { %v2430_v63 = vld [vmem:[%s3474_s1 + $0x2c4] ss:$8 sps:$4 sm:$0xff]   ;;  %v2437_v10 = vld [vmem:[%s3474_s1 + $0x3b0] ss:$8 sps:$4 sm:$0xff]   ;;  %vm2003_vm3 = vmor %vm2002_vm2, %vm2001_vm1 }
  0x1f   :  { %1675 = vmatpush1.bf16.msra.mxu0 %v2308_v30  ;;  %v2377_v30 = vld [vmem:[%s3474_s1 + $0x350] ss:$8 sps:$4 sm:$0xff]  }
  0x20   :  { %1676 = vmatprep.subr.bf16.mxu0 %v2312_v31  ;;  %1716 = vmatpush1.bf16.msra.mxu1 %v2311_v32  ;;  %v2385_v31 = vld [vmem:[%s3474_s1 + $0x344] ss:$8 sps:$4 sm:$0xff]   ;;  %v2380_v32 = vld [vmem:[%s3474_s1 + $0x240] ss:$8 sps:$4 sm:$0xff]  }
  0x21   :  { %1717 = vmatprep.subr.bf16.mxu1 %v2315_v33  ;;  %v2388_v33 = vld [vmem:[%s3474_s1 + $0x234] ss:$8 sps:$4 sm:$0xff]  }
  0x23   :  { %1677 = vmatpush2.bf16.msra.mxu0 %v2314_v34  ;;  %v2383_v34 = vld [vmem:[%s3474_s1 + $0x340] ss:$8 sps:$4 sm:$0xff]  }
  0x24   :  { %1678 = vmatprep.subr.bf16.mxu0 %v2318_v38  ;;  %1718 = vmatpush2.bf16.msra.mxu1 %v2317_v39  ;;  %v2389_v38 = vld [vmem:[%s3474_s1 + $0x330] ss:$8 sps:$4 sm:$0xff]   ;;  %v2397_v39 = vld [vmem:[%s3474_s1 + $0x324] ss:$8 sps:$4 sm:$0xff]  }
  0x25   :  { %1719 = vmatprep.subr.bf16.mxu1 %v2321_v40  ;;  %v2392_v40 = vld [vmem:[%s3474_s1 + $0x220] ss:$8 sps:$4 sm:$0xff]  }
  0x27   :  { %1679 = vmatpush2.bf16.msra.mxu0 %v2320_v41  ;;  %v2400_v41 = vld [vmem:[%s3474_s1 + $0x214] ss:$8 sps:$4 sm:$0xff]  }
  0x28   :  { %1680 = vmatprep.subr.bf16.mxu0 %v2324_v44  ;;  %1720 = vmatpush2.bf16.msra.mxu1 %v2323_v45  ;;  %v2403_v44 = vld [vmem:[%s3474_s1 + $0x314] ss:$8 sps:$4 sm:$0xff]   ;;  %v2398_v45 = vld [vmem:[%s3474_s1 + $0x210] ss:$8 sps:$4 sm:$0xff]  }
  0x29   :  { %1721 = vmatprep.subr.bf16.mxu1 %v2327_v46  ;;  %v2406_v46 = vld [vmem:[%s3474_s1 + $0x204] ss:$8 sps:$4 sm:$0xff]  }
  0x2b   :  { %1681 = vmatpush2.bf16.msra.mxu0 %v2326_v47  ;;  %v2401_v47 = vld [vmem:[%s3474_s1 + $0x310] ss:$8 sps:$4 sm:$0xff]  }
  0x2c   :  { %1682 = vmatprep.subr.bf16.mxu0 %v2330_v49  ;;  %1722 = vmatpush2.bf16.msra.mxu1 %v2329_v50  ;;  %v2409_v49 = vld [vmem:[%s3474_s1 + $0x304] ss:$8 sps:$4 sm:$0xff]   ;;  %v2404_v50 = vld [vmem:[%s3474_s1 + $0x200] ss:$8 sps:$4 sm:$0xff]  }
  0x2d   :  { %1723 = vmatprep.subr.bf16.mxu1 %v2333_v51  ;;  %v2412_v51 = vld [vmem:[%s3474_s1 + $0x2f4] ss:$8 sps:$4 sm:$0xff]  }
  0x2f   :  { %1683 = vmatpush2.bf16.msra.mxu0 %v2332_v53  ;;  %v2415_v53 = vld [vmem:[%s3474_s1 + $0x3f4] ss:$8 sps:$4 sm:$0xff]  }
  0x30   :  { %1684 = vmatprep.subr.bf16.mxu0 %v2336_v55  ;;  %1724 = vmatpush2.bf16.msra.mxu1 %v2335_v56  ;;  %v2418_v55 = vld [vmem:[%s3474_s1 + $0x2e4] ss:$8 sps:$4 sm:$0xff]   ;;  %v2413_v56 = vld [vmem:[%s3474_s1 + $0x3f0] ss:$8 sps:$4 sm:$0xff]  }
  0x31   :  { %1725 = vmatprep.subr.bf16.mxu1 %v2339_v58  ;;  %v2416_v58 = vld [vmem:[%s3474_s1 + $0x2e0] ss:$8 sps:$4 sm:$0xff]  }
  0x33   :  { %1685 = vmatpush2.bf16.msra.mxu0 %v2338_v59  ;;  %v2424_v59 = vld [vmem:[%s3474_s1 + $0x2d4] ss:$8 sps:$4 sm:$0xff]  }
  0x34   :  { %1686 = vmatprep.subr.bf16.mxu0 %v2342_v61  ;;  %1726 = vmatpush2.bf16.msra.mxu1 %v2341_v62  ;;  %v2427_v61 = vld [vmem:[%s3474_s1 + $0x3d4] ss:$8 sps:$4 sm:$0xff]   ;;  %v2422_v62 = vld [vmem:[%s3474_s1 + $0x2d0] ss:$8 sps:$4 sm:$0xff]  }
  0x35   :  { %1727 = vmatprep.subr.bf16.mxu1 %v2345_v1  ;;  %v2433_v1 = vld [vmem:[%s3474_s1 + $0x3c4] ss:$8 sps:$4 sm:$0xff]  }
  0x37   :  { %1687 = vmatpush2.bf16.msra.mxu0 %v2344_v2  ;;  %v2428_v2 = vld [vmem:[%s3474_s1 + $0x2c0] ss:$8 sps:$4 sm:$0xff]  }
  0x38   :  { %1688 = vmatprep.subr.bf16.mxu0 %v2348_v3  ;;  %1728 = vmatpush2.bf16.msra.mxu1 %v2347_v4  ;;  %v2436_v3 = vld [vmem:[%s3474_s1 + $0x2b4] ss:$8 sps:$4 sm:$0xff]   ;;  %v2431_v4 = vld [vmem:[%s3474_s1 + $0x3c0] ss:$8 sps:$4 sm:$0xff]  }
  0x39   :  { %1729 = vmatprep.subr.bf16.mxu1 %v2351_v6  ;;  %v2439_v6 = vld [vmem:[%s3474_s1 + $0x3b4] ss:$8 sps:$4 sm:$0xff]  }
  0x3b   :  { %1689 = vmatpush2.bf16.msra.mxu0 %v2350_v7  ;;  %v2434_v7 = vld [vmem:[%s3474_s1 + $0x2b0] ss:$8 sps:$4 sm:$0xff]  }
  0x3c   :  { %1690 = vmatprep.subr.bf16.mxu0 %v2354_v8  ;;  %1730 = vmatpush2.bf16.msra.mxu1 %v2353_v9  ;;  %v2442_v8 = vld [vmem:[%s3474_s1 + $0x2a4] ss:$8 sps:$4 sm:$0xff]  }
  0x3d   :  { %1731 = vmatprep.subr.bf16.mxu1 %v2357_v11  ;;  %v3034_v9 = vld [vmem:[%s3475_s0 + $0x8] sm:$0xff] }
  0x3e   :  { %v2445_v11 = vld [vmem:[%s3474_s1 + $0x3a4] ss:$8 sps:$4 sm:$0xff]  }
  0x3f   :  { %1691 = vmatpush2.bf16.msra.mxu0 %v2356_v12  ;;  %v2440_v12 = vld [vmem:[%s3474_s1 + $0x2a0] ss:$8 sps:$4 sm:$0xff]  }
  0x40   :  { %1742 = vmatprep.subr.bf16.mxu0 %v2364_v14  ;;  %1732 = vmatpush2.bf16.msra.mxu1 %v2361_v15  ;;  %v2443_v14 = vld [vmem:[%s3474_s1 + $0x3a0] ss:$8 sps:$4 sm:$0xff]   ;;  %v3053_v15 = vrot.slane %v3034_v9, %v2798_v48 }
  0x41   :  { %1783 = vmatprep.subr.bf16.mxu1 %v2367_v17  ;;  %v2446_v17 = vld [vmem:[%s3474_s1 + $0x290] ss:$8 sps:$4 sm:$0xff]  }
  0x42   :  { %1693 = vmatmul.mubr.bf16.vlgmr.msra.gmra.mxu0 %v306_v13  ;;  %v2448_v13 = vld [vmem:[%s3474_s1 + $0x294] ss:$8 sps:$4 sm:$0xff]  }
  0x43   :  { %1743 = vmatpush1.bf16.msra.mxu0 %v2362_v18  ;;  %1774 = vmatprep.mubr.bf16.mxu0 %v327_v16  ;;  %v2451_v16 = vld [vmem:[%s3474_s1 + $0x394] ss:$8 sps:$4 sm:$0xff]   ;;  %v2454_v18 = vld [vmem:[%s3474_s1 + $0x284] ss:$8 sps:$4 sm:$0xff]  }
  0x44   :  { %1734 = vmatmul.mubr.bf16.vlgmr.msra.gmra.mxu1 %v328_v19  ;;  %1744 = vmatprep.subr.bf16.mxu0 %v2370_v20  ;;  %v2449_v19 = vld [vmem:[%s3474_s1 + $0x390] ss:$8 sps:$4 sm:$0xff]   ;;  %v347_v20 = vcombine.high %v3053_v15, %v3053_v15 }
  0x45   :  { %1784 = vmatpush1.bf16.msra.mxu1 %v2365_v21  ;;  %1815 = vmatprep.mubr.bf16.mxu1 %v331_v22  ;;  %v2457_v21 = vld [vmem:[%s3474_s1 + $0x384] ss:$8 sps:$4 sm:$0xff]   ;;  %v2452_v22 = vld [vmem:[%s3474_s1 + $0x280] ss:$8 sps:$4 sm:$0xff]  }
  0x46   :  { %1785 = vmatprep.subr.bf16.mxu1 %v2373_v23  ;;  %v313_v23 = vrot.slane %v2848_v5, %v2798_v48  ;;  %v2458_v5 = vld [vmem:[%s3474_s1 + $0x470] ss:$8 sps:$4 sm:$0xff]  }
  0x47   :  { %1745 = vmatpush1.bf16.msra.mxu0 %v2368_v24  ;;  %v2460_v24 = vld [vmem:[%s3474_s1 + $0x474] ss:$8 sps:$4 sm:$0xff]  }
  0x48   :  { %1746 = vmatprep.subr.bf16.mxu0 %v2376_v25  ;;  %v2455_v25 = vld [vmem:[%s3474_s1 + $0x380] ss:$8 sps:$4 sm:$0xff]  }
  0x49   :  { %1786 = vmatpush1.bf16.msra.mxu1 %v2371_v26  ;;  %v369_v26 = vrot.slane %v347_v20, %v2798_v48  ;;  %v332_v20 = vcombine.high %v3034_v9, %v3034_v9  ;;  %v2544_v9 = vld [vmem:[%s3474_s1 + $0x494] ss:$8 sps:$4 sm:$0xff]  }
  0x4a   :  { %1787 = vmatprep.subr.bf16.mxu1 %v2379_v27  ;;  %v2463_v27 = vld [vmem:[%s3474_s1 + $0x574] ss:$8 sps:$4 sm:$0xff]  }
  0x4b   :  { %1747 = vmatpush1.bf16.msra.mxu0 %v2374_v28  ;;  %v329_v28 = vcombine.high %v313_v23, %v313_v23 }
  0x4c   :  { %1748 = vmatprep.subr.bf16.mxu0 %v2382_v29  ;;  %v2466_v29 = vld [vmem:[%s3474_s1 + $0x464] ss:$8 sps:$4 sm:$0xff]  }
  0x4d   :  { %1788 = vmatpush1.bf16.msra.mxu1 %v2377_v30  ;;  %v2461_v30 = vld [vmem:[%s3474_s1 + $0x570] ss:$8 sps:$4 sm:$0xff]  }
  0x4e   :  { %1789 = vmatprep.subr.bf16.mxu1 %v2385_v31  ;;  %v379_v31 = vcombine.high %v369_v26, %v369_v26 }
  0x4f   :  { %1749 = vmatpush1.bf16.msra.mxu0 %v2380_v32  ;;  %v2469_v32 = vld [vmem:[%s3474_s1 + $0x564] ss:$8 sps:$4 sm:$0xff]  }
  0x50   :  { %1750 = vmatprep.subr.bf16.mxu0 %v2388_v33  ;;  %v2464_v33 = vld [vmem:[%s3474_s1 + $0x460] ss:$8 sps:$4 sm:$0xff]  }
  0x51   :  { %1790 = vmatpush1.bf16.msra.mxu1 %v2383_v34  ;;  %v2472_v34 = vld [vmem:[%s3474_s1 + $0x454] ss:$8 sps:$4 sm:$0xff]  }
  0x52   :  { %1791 = vmatprep.subr.bf16.mxu1 %v2391_v35  ;;  %v2467_v35 = vld [vmem:[%s3474_s1 + $0x560] ss:$8 sps:$4 sm:$0xff]  }
  0x53   :  { %1751 = vmatpush1.bf16.msra.mxu0 %v2386_v36  ;;  %v2475_v36 = vld [vmem:[%s3474_s1 + $0x554] ss:$8 sps:$4 sm:$0xff]  }
  0x54   :  { %1752 = vmatprep.subr.bf16.mxu0 %v2394_v37  ;;  %v2470_v37 = vld [vmem:[%s3474_s1 + $0x450] ss:$8 sps:$4 sm:$0xff]  }
  0x55   :  { %1792 = vmatpush1.bf16.msra.mxu1 %v2389_v38  ;;  %v2478_v38 = vld [vmem:[%s3474_s1 + $0x444] ss:$8 sps:$4 sm:$0xff]  }
  0x56   :  { %1793 = vmatprep.subr.bf16.mxu1 %v2397_v39  ;;  %v2473_v39 = vld [vmem:[%s3474_s1 + $0x550] ss:$8 sps:$4 sm:$0xff]  }
  0x57   :  { %1753 = vmatpush1.bf16.msra.mxu0 %v2392_v40  ;;  %v2481_v40 = vld [vmem:[%s3474_s1 + $0x544] ss:$8 sps:$4 sm:$0xff]  }
  0x58   :  { %1754 = vmatprep.subr.bf16.mxu0 %v2400_v41  ;;  %v2476_v41 = vld [vmem:[%s3474_s1 + $0x440] ss:$8 sps:$4 sm:$0xff]  }
  0x59   :  { %1794 = vmatpush1.bf16.msra.mxu1 %v2395_v43  ;;  %v2484_v43 = vld [vmem:[%s3474_s1 + $0x434] ss:$8 sps:$4 sm:$0xff]  }
  0x5a   :  { %1795 = vmatprep.subr.bf16.mxu1 %v2403_v44  ;;  %v2479_v44 = vld [vmem:[%s3474_s1 + $0x540] ss:$8 sps:$4 sm:$0xff]  }
  0x5b   :  { %1755 = vmatpush1.bf16.msra.mxu0 %v2398_v45  ;;  %v2487_v45 = vld [vmem:[%s3474_s1 + $0x534] ss:$8 sps:$4 sm:$0xff]  }
  0x5c   :  { %1756 = vmatprep.subr.bf16.mxu0 %v2406_v46  ;;  %v2482_v46 = vld [vmem:[%s3474_s1 + $0x430] ss:$8 sps:$4 sm:$0xff]  }
  0x5d   :  { %1796 = vmatpush1.bf16.msra.mxu1 %v2401_v47  ;;  %v2490_v47 = vld [vmem:[%s3474_s1 + $0x424] ss:$8 sps:$4 sm:$0xff]  }
  0x5e   :  { %1797 = vmatprep.subr.bf16.mxu1 %v2409_v49  ;;  %v2485_v49 = vld [vmem:[%s3474_s1 + $0x530] ss:$8 sps:$4 sm:$0xff]  }
  0x5f   :  { %1757 = vmatpush1.bf16.msra.mxu0 %v2404_v50  ;;  %v2493_v50 = vld [vmem:[%s3474_s1 + $0x524] ss:$8 sps:$4 sm:$0xff]  }
  0x60   :  { %1758 = vmatprep.subr.bf16.mxu0 %v2412_v51  ;;  %v2488_v51 = vld [vmem:[%s3474_s1 + $0x420] ss:$8 sps:$4 sm:$0xff]  }
  0x61   :  { %1798 = vmatpush1.bf16.msra.mxu1 %v2407_v52  ;;  %v2496_v52 = vld [vmem:[%s3474_s1 + $0x414] ss:$8 sps:$4 sm:$0xff]  }
  0x62   :  { %1799 = vmatprep.subr.bf16.mxu1 %v2415_v53  ;;  %v2491_v53 = vld [vmem:[%s3474_s1 + $0x520] ss:$8 sps:$4 sm:$0xff]  }
  0x63   :  { %1759 = vmatpush2.bf16.msra.mxu0 %v2410_v54  ;;  %v2499_v54 = vld [vmem:[%s3474_s1 + $0x514] ss:$8 sps:$4 sm:$0xff]  }
  0x64   :  { %1760 = vmatprep.subr.bf16.mxu0 %v2418_v55  ;;  %v2494_v55 = vld [vmem:[%s3474_s1 + $0x410] ss:$8 sps:$4 sm:$0xff]  }
  0x65   :  { %1800 = vmatpush2.bf16.msra.mxu1 %v2413_v56  ;;  %v2502_v56 = vld [vmem:[%s3474_s1 + $0x404] ss:$8 sps:$4 sm:$0xff]  }
  0x66   :  { %1801 = vmatprep.subr.bf16.mxu1 %v2421_v57  ;;  %v2497_v57 = vld [vmem:[%s3474_s1 + $0x510] ss:$8 sps:$4 sm:$0xff]  }
  0x67   :  { %1761 = vmatpush2.bf16.msra.mxu0 %v2416_v58  ;;  %v2505_v58 = vld [vmem:[%s3474_s1 + $0x504] ss:$8 sps:$4 sm:$0xff]  }
  0x68   :  { %1762 = vmatprep.subr.bf16.mxu0 %v2424_v59  ;;  %v2500_v59 = vld [vmem:[%s3474_s1 + $0x400] ss:$8 sps:$4 sm:$0xff]  }
  0x69   :  { %1802 = vmatpush2.bf16.msra.mxu1 %v2419_v60  ;;  %v2508_v60 = vld [vmem:[%s3474_s1 + $0x4f4] ss:$8 sps:$4 sm:$0xff]  }
  0x6a   :  { %1803 = vmatprep.subr.bf16.mxu1 %v2427_v61  ;;  %v2503_v61 = vld [vmem:[%s3474_s1 + $0x500] ss:$8 sps:$4 sm:$0xff]  }
  0x6b   :  { %1763 = vmatpush2.bf16.msra.mxu0 %v2422_v62  ;;  %v2511_v62 = vld [vmem:[%s3474_s1 + $0x5f4] ss:$8 sps:$4 sm:$0xff]  }
  0x6c   :  { %1764 = vmatprep.subr.bf16.mxu0 %v2430_v63  ;;  %v2506_v63 = vld [vmem:[%s3474_s1 + $0x4f0] ss:$8 sps:$4 sm:$0xff]  }
  0x6d   :  { %1804 = vmatpush2.bf16.msra.mxu1 %v2425_v0  ;;  %v2514_v0 = vld [vmem:[%s3474_s1 + $0x4e4] ss:$8 sps:$4 sm:$0xff]  }
  0x6e   :  { %1805 = vmatprep.subr.bf16.mxu1 %v2433_v1  ;;  %v2509_v1 = vld [vmem:[%s3474_s1 + $0x5f0] ss:$8 sps:$4 sm:$0xff]  }
  0x6f   :  { %1765 = vmatpush2.bf16.msra.mxu0 %v2428_v2  ;;  %v2517_v2 = vld [vmem:[%s3474_s1 + $0x5e4] ss:$8 sps:$4 sm:$0xff]  }
  0x70   :  { %1766 = vmatprep.subr.bf16.mxu0 %v2436_v3  ;;  %v2512_v3 = vld [vmem:[%s3474_s1 + $0x4e0] ss:$8 sps:$4 sm:$0xff]  }
  0x71   :  { %1806 = vmatpush2.bf16.msra.mxu1 %v2431_v4  ;;  %v2520_v4 = vld [vmem:[%s3474_s1 + $0x4d4] ss:$8 sps:$4 sm:$0xff]  }
  0x72   :  { %1807 = vmatprep.subr.bf16.mxu1 %v2439_v6  ;;  %v2515_v6 = vld [vmem:[%s3474_s1 + $0x5e0] ss:$8 sps:$4 sm:$0xff]  }
  0x73   :  { %1767 = vmatpush2.bf16.msra.mxu0 %v2434_v7  ;;  %v2523_v7 = vld [vmem:[%s3474_s1 + $0x5d4] ss:$8 sps:$4 sm:$0xff]  }
  0x74   :  { %1768 = vmatprep.subr.bf16.mxu0 %v2442_v8  ;;  %v2518_v8 = vld [vmem:[%s3474_s1 + $0x4d0] ss:$8 sps:$4 sm:$0xff]  }
  0x75   :  { %1808 = vmatpush2.bf16.msra.mxu1 %v2437_v10  ;;  %v2526_v10 = vld [vmem:[%s3474_s1 + $0x4c4] ss:$8 sps:$4 sm:$0xff]  }
  0x76   :  { %1809 = vmatprep.subr.bf16.mxu1 %v2445_v11  ;;  %v2521_v11 = vld [vmem:[%s3474_s1 + $0x5d0] ss:$8 sps:$4 sm:$0xff]  }
  0x77   :  { %1769 = vmatpush2.bf16.msra.mxu0 %v2440_v12  ;;  %v2529_v12 = vld [vmem:[%s3474_s1 + $0x5c4] ss:$8 sps:$4 sm:$0xff]  }
  0x78   :  { %1770 = vmatprep.subr.bf16.mxu0 %v2448_v13  ;;  %v2524_v13 = vld [vmem:[%s3474_s1 + $0x4c0] ss:$8 sps:$4 sm:$0xff]  }
  0x79   :  { %1810 = vmatpush2.bf16.msra.mxu1 %v2443_v14  ;;  %v2532_v14 = vld [vmem:[%s3474_s1 + $0x4b4] ss:$8 sps:$4 sm:$0xff]  }
  0x7a   :  { %1811 = vmatprep.subr.bf16.mxu1 %v2451_v16  ;;  %v2527_v16 = vld [vmem:[%s3474_s1 + $0x5c0] ss:$8 sps:$4 sm:$0xff]  }
  0x7b   :  { %1771 = vmatpush2.bf16.msra.mxu0 %v2446_v17  ;;  %v2535_v17 = vld [vmem:[%s3474_s1 + $0x5b4] ss:$8 sps:$4 sm:$0xff]  }
  0x7c   :  { %1772 = vmatprep.subr.bf16.mxu0 %v2454_v18  ;;  %v2530_v18 = vld [vmem:[%s3474_s1 + $0x4b0] ss:$8 sps:$4 sm:$0xff]  }
  0x7d   :  { %1812 = vmatpush2.bf16.msra.mxu1 %v2449_v19  ;;  %v2538_v19 = vld [vmem:[%s3474_s1 + $0x4a4] ss:$8 sps:$4 sm:$0xff]  }
  0x7e   :  { %1813 = vmatprep.subr.bf16.mxu1 %v2457_v21  ;;  %v2533_v21 = vld [vmem:[%s3474_s1 + $0x5b0] ss:$8 sps:$4 sm:$0xff]  }
  0x7f   :  { %1773 = vmatpush2.bf16.msra.mxu0 %v2452_v22  ;;  %v2541_v22 = vld [vmem:[%s3474_s1 + $0x5a4] ss:$8 sps:$4 sm:$0xff]  }
  0x80   :  { %1824 = vmatprep.subr.bf16.mxu0 %v2460_v24  ;;  %v3252_v24 = vrot.slane %v332_v20, %v2798_v48  ;;  %v2619_v20 = vld [vmem:[%s3474_s1 + $0x6c4] ss:$8 sps:$4 sm:$0xff]  }
  0x81   :  { %1814 = vmatpush2.bf16.msra.mxu1 %v2455_v25  ;;  %v2539_v25 = vld [vmem:[%s3474_s1 + $0x5a0] ss:$8 sps:$4 sm:$0xff]  }
  0x82   :  { %1775 = vmatmul.mubr.bf16.vlgmr.msra.gmra.mxu0 %v313_v23  ;;  %1865 = vmatprep.subr.bf16.mxu1 %v2463_v27  ;;  %v2536_v23 = vld [vmem:[%s3474_s1 + $0x4a0] ss:$8 sps:$4 sm:$0xff]   ;;  %v2542_v27 = vld [vmem:[%s3474_s1 + $0x490] ss:$8 sps:$4 sm:$0xff]  }
  0x83   :  { %1825 = vmatpush1.bf16.msra.mxu0 %v2458_v5  ;;  %1856 = vmatprep.mubr.bf16.mxu0 %v369_v26  ;;  %v2547_v26 = vld [vmem:[%s3474_s1 + $0x594] ss:$8 sps:$4 sm:$0xff]   ;;  %v2550_v5 = vld [vmem:[%s3474_s1 + $0x484] ss:$8 sps:$4 sm:$0xff]  }
  0x84   :  { %1816 = vmatmul.mubr.bf16.vlgmr.msra.gmra.mxu1 %v329_v28  ;;  %1826 = vmatprep.subr.bf16.mxu0 %v2466_v29  ;;  %v2545_v28 = vld [vmem:[%s3474_s1 + $0x590] ss:$8 sps:$4 sm:$0xff]   ;;  %v348_v29 = vcombine.high %v3252_v24, %v3252_v24 }
  0x85   :  { %1866 = vmatpush1.bf16.msra.mxu1 %v2461_v30  ;;  %1897 = vmatprep.mubr.bf16.mxu1 %v379_v31  ;;  %v2553_v30 = vld [vmem:[%s3474_s1 + $0x584] ss:$8 sps:$4 sm:$0xff]   ;;  %v2548_v31 = vld [vmem:[%s3474_s1 + $0x480] ss:$8 sps:$4 sm:$0xff]  }
  0x86   :  { %1867 = vmatprep.subr.bf16.mxu1 %v2469_v32  ;;  %v355_v32 = vrot.slane %v3053_v15, %v2798_v48  ;;  %v2554_v15 = vld [vmem:[%s3474_s1 + $0x670] ss:$8 sps:$4 sm:$0xff]  }
  0x87   :  { %1827 = vmatpush1.bf16.msra.mxu0 %v2464_v33  ;;  %v2556_v33 = vld [vmem:[%s3474_s1 + $0x674] ss:$8 sps:$4 sm:$0xff]  }
  0x88   :  { %1828 = vmatprep.subr.bf16.mxu0 %v2472_v34  ;;  %v2551_v34 = vld [vmem:[%s3474_s1 + $0x580] ss:$8 sps:$4 sm:$0xff]  }
  0x89   :  { %1868 = vmatpush1.bf16.msra.mxu1 %v2467_v35  ;;  %v376_v35 = vrot.slane %v348_v29, %v2798_v48  ;;  %v2640_v29 = vld [vmem:[%s3474_s1 + $0x784] ss:$8 sps:$4 sm:$0xff]  }
  0x8a   :  { %1869 = vmatprep.subr.bf16.mxu1 %v2475_v36  ;;  %v2562_v36 = vld [vmem:[%s3474_s1 + $0x774] ss:$8 sps:$4 sm:$0xff]  }
  0x8b   :  { %1829 = vmatpush1.bf16.msra.mxu0 %v2470_v37  ;;  %v377_v37 = vcombine.high %v355_v32, %v355_v32 }
  0x8c   :  { %1830 = vmatprep.subr.bf16.mxu0 %v2478_v38  ;;  %v2559_v38 = vld [vmem:[%s3474_s1 + $0x664] ss:$8 sps:$4 sm:$0xff]  }
  0x8d   :  { %1870 = vmatpush1.bf16.msra.mxu1 %v2473_v39  ;;  %v2560_v39 = vld [vmem:[%s3474_s1 + $0x770] ss:$8 sps:$4 sm:$0xff]  }
  0x8e   :  { %1871 = vmatprep.subr.bf16.mxu1 %v2481_v40  ;;  %v380_v40 = vcombine.high %v376_v35, %v376_v35 }
  0x8f   :  { %1831 = vmatpush1.bf16.msra.mxu0 %v2476_v41  ;;  %v2568_v41 = vld [vmem:[%s3474_s1 + $0x764] ss:$8 sps:$4 sm:$0xff]  }
  0x90   :  { %1832 = vmatprep.subr.bf16.mxu0 %v2484_v43  ;;  %v2557_v43 = vld [vmem:[%s3474_s1 + $0x660] ss:$8 sps:$4 sm:$0xff]  }
  0x91   :  { %1872 = vmatpush1.bf16.msra.mxu1 %v2479_v44  ;;  %v2565_v44 = vld [vmem:[%s3474_s1 + $0x654] ss:$8 sps:$4 sm:$0xff]  }
  0x92   :  { %1873 = vmatprep.subr.bf16.mxu1 %v2487_v45  ;;  %v2566_v45 = vld [vmem:[%s3474_s1 + $0x760] ss:$8 sps:$4 sm:$0xff]  }
  0x93   :  { %1833 = vmatpush1.bf16.msra.mxu0 %v2482_v46  ;;  %v2574_v46 = vld [vmem:[%s3474_s1 + $0x754] ss:$8 sps:$4 sm:$0xff]  }
  0x94   :  { %1834 = vmatprep.subr.bf16.mxu0 %v2490_v47  ;;  %v2563_v47 = vld [vmem:[%s3474_s1 + $0x650] ss:$8 sps:$4 sm:$0xff]  }
  0x95   :  { %1874 = vmatpush1.bf16.msra.mxu1 %v2485_v49  ;;  %v2571_v49 = vld [vmem:[%s3474_s1 + $0x644] ss:$8 sps:$4 sm:$0xff]  }
  0x96   :  { %1875 = vmatprep.subr.bf16.mxu1 %v2493_v50  ;;  %v2572_v50 = vld [vmem:[%s3474_s1 + $0x750] ss:$8 sps:$4 sm:$0xff]  }
  0x97   :  { %1835 = vmatpush1.bf16.msra.mxu0 %v2488_v51  ;;  %v2580_v51 = vld [vmem:[%s3474_s1 + $0x744] ss:$8 sps:$4 sm:$0xff]  }
  0x98   :  { %1836 = vmatprep.subr.bf16.mxu0 %v2496_v52  ;;  %v2569_v52 = vld [vmem:[%s3474_s1 + $0x640] ss:$8 sps:$4 sm:$0xff]  }
  0x99   :  { %1876 = vmatpush1.bf16.msra.mxu1 %v2491_v53  ;;  %v2577_v53 = vld [vmem:[%s3474_s1 + $0x634] ss:$8 sps:$4 sm:$0xff]  }
  0x9a   :  { %1877 = vmatprep.subr.bf16.mxu1 %v2499_v54  ;;  %v2578_v54 = vld [vmem:[%s3474_s1 + $0x740] ss:$8 sps:$4 sm:$0xff]  }
  0x9b   :  { %1837 = vmatpush1.bf16.msra.mxu0 %v2494_v55  ;;  %v2586_v55 = vld [vmem:[%s3474_s1 + $0x734] ss:$8 sps:$4 sm:$0xff]  }
  0x9c   :  { %1838 = vmatprep.subr.bf16.mxu0 %v2502_v56  ;;  %v2575_v56 = vld [vmem:[%s3474_s1 + $0x630] ss:$8 sps:$4 sm:$0xff]  }
  0x9d   :  { %1878 = vmatpush1.bf16.msra.mxu1 %v2497_v57  ;;  %v2583_v57 = vld [vmem:[%s3474_s1 + $0x624] ss:$8 sps:$4 sm:$0xff]  }
  0x9e   :  { %1879 = vmatprep.subr.bf16.mxu1 %v2505_v58  ;;  %v2584_v58 = vld [vmem:[%s3474_s1 + $0x730] ss:$8 sps:$4 sm:$0xff]  }
  0x9f   :  { %1839 = vmatpush1.bf16.msra.mxu0 %v2500_v59  ;;  %v2592_v59 = vld [vmem:[%s3474_s1 + $0x724] ss:$8 sps:$4 sm:$0xff]  }
  0xa0   :  { %1840 = vmatprep.subr.bf16.mxu0 %v2508_v60  ;;  %v2581_v60 = vld [vmem:[%s3474_s1 + $0x620] ss:$8 sps:$4 sm:$0xff]  }
  0xa1   :  { %1880 = vmatpush1.bf16.msra.mxu1 %v2503_v61  ;;  %v2589_v61 = vld [vmem:[%s3474_s1 + $0x614] ss:$8 sps:$4 sm:$0xff]  }
  0xa2   :  { %1881 = vmatprep.subr.bf16.mxu1 %v2511_v62  ;;  %v2590_v62 = vld [vmem:[%s3474_s1 + $0x720] ss:$8 sps:$4 sm:$0xff]  }
  0xa3   :  { %1841 = vmatpush2.bf16.msra.mxu0 %v2506_v63  ;;  %v2598_v63 = vld [vmem:[%s3474_s1 + $0x714] ss:$8 sps:$4 sm:$0xff]  }
  0xa4   :  { %1842 = vmatprep.subr.bf16.mxu0 %v2514_v0  ;;  %v2587_v0 = vld [vmem:[%s3474_s1 + $0x610] ss:$8 sps:$4 sm:$0xff]  }
  0xa5   :  { %1882 = vmatpush2.bf16.msra.mxu1 %v2509_v1  ;;  %v2595_v1 = vld [vmem:[%s3474_s1 + $0x604] ss:$8 sps:$4 sm:$0xff]  }
  0xa6   :  { %1883 = vmatprep.subr.bf16.mxu1 %v2517_v2  ;;  %v2596_v2 = vld [vmem:[%s3474_s1 + $0x710] ss:$8 sps:$4 sm:$0xff]  }
  0xa7   :  { %1843 = vmatpush2.bf16.msra.mxu0 %v2512_v3  ;;  %v2604_v3 = vld [vmem:[%s3474_s1 + $0x704] ss:$8 sps:$4 sm:$0xff]  }
  0xa8   :  { %1844 = vmatprep.subr.bf16.mxu0 %v2520_v4  ;;  %v2593_v4 = vld [vmem:[%s3474_s1 + $0x600] ss:$8 sps:$4 sm:$0xff]  }
  0xa9   :  { %1884 = vmatpush2.bf16.msra.mxu1 %v2515_v6  ;;  %v2601_v6 = vld [vmem:[%s3474_s1 + $0x6f4] ss:$8 sps:$4 sm:$0xff]  }
  0xaa   :  { %1885 = vmatprep.subr.bf16.mxu1 %v2523_v7  ;;  %v2602_v7 = vld [vmem:[%s3474_s1 + $0x700] ss:$8 sps:$4 sm:$0xff]  }
  0xab   :  { %1845 = vmatpush2.bf16.msra.mxu0 %v2518_v8  ;;  %v2610_v8 = vld [vmem:[%s3474_s1 + $0x7d4] ss:$8 sps:$4 sm:$0xff]  }
  0xac   :  { %1846 = vmatprep.subr.bf16.mxu0 %v2526_v10  ;;  %v2599_v10 = vld [vmem:[%s3474_s1 + $0x6f0] ss:$8 sps:$4 sm:$0xff]  }
  0xad   :  { %1886 = vmatpush2.bf16.msra.mxu1 %v2521_v11  ;;  %v2607_v11 = vld [vmem:[%s3474_s1 + $0x6e4] ss:$8 sps:$4 sm:$0xff]  }
  0xae   :  { %1887 = vmatprep.subr.bf16.mxu1 %v2529_v12  ;;  %v2608_v12 = vld [vmem:[%s3474_s1 + $0x7d0] ss:$8 sps:$4 sm:$0xff]  }
  0xaf   :  { %1847 = vmatpush2.bf16.msra.mxu0 %v2524_v13  ;;  %v2616_v13 = vld [vmem:[%s3474_s1 + $0x7c4] ss:$8 sps:$4 sm:$0xff]  }
  0xb0   :  { %1848 = vmatprep.subr.bf16.mxu0 %v2532_v14  ;;  %v2605_v14 = vld [vmem:[%s3474_s1 + $0x6e0] ss:$8 sps:$4 sm:$0xff]  }
  0xb1   :  { %1888 = vmatpush2.bf16.msra.mxu1 %v2527_v16  ;;  %v2613_v16 = vld [vmem:[%s3474_s1 + $0x6d4] ss:$8 sps:$4 sm:$0xff]  }
  0xb2   :  { %1889 = vmatprep.subr.bf16.mxu1 %v2535_v17  ;;  %v2614_v17 = vld [vmem:[%s3474_s1 + $0x7c0] ss:$8 sps:$4 sm:$0xff]  }
  0xb3   :  { %1849 = vmatpush2.bf16.msra.mxu0 %v2530_v18  ;;  %v2622_v18 = vld [vmem:[%s3474_s1 + $0x7b4] ss:$8 sps:$4 sm:$0xff]  }
  0xb4   :  { %1850 = vmatprep.subr.bf16.mxu0 %v2538_v19  ;;  %v2611_v19 = vld [vmem:[%s3474_s1 + $0x6d0] ss:$8 sps:$4 sm:$0xff]  }
  0xb5   :  { %1890 = vmatpush2.bf16.msra.mxu1 %v2533_v21  ;;  %v2620_v21 = vld [vmem:[%s3474_s1 + $0x7b0] ss:$8 sps:$4 sm:$0xff]  }
  0xb6   :  { %1891 = vmatprep.subr.bf16.mxu1 %v2541_v22  ;;  %v2628_v22 = vld [vmem:[%s3474_s1 + $0x7a4] ss:$8 sps:$4 sm:$0xff]  }
  0xb7   :  { %1851 = vmatpush2.bf16.msra.mxu0 %v2536_v23  ;;  %v2617_v23 = vld [vmem:[%s3474_s1 + $0x6c0] ss:$8 sps:$4 sm:$0xff]  }
  0xb8   :  { %1852 = vmatprep.subr.bf16.mxu0 %v2544_v9  ;;  %v2625_v9 = vld [vmem:[%s3474_s1 + $0x6b4] ss:$8 sps:$4 sm:$0xff]  }
  0xb9   :  { %1892 = vmatpush2.bf16.msra.mxu1 %v2539_v25  ;;  %v2626_v25 = vld [vmem:[%s3474_s1 + $0x7a0] ss:$8 sps:$4 sm:$0xff]  }
  0xba   :  { %1893 = vmatprep.subr.bf16.mxu1 %v2547_v26  ;;  %v2634_v26 = vld [vmem:[%s3474_s1 + $0x794] ss:$8 sps:$4 sm:$0xff]  }
  0xbb   :  { %1853 = vmatpush2.bf16.msra.mxu0 %v2542_v27  ;;  %v2623_v27 = vld [vmem:[%s3474_s1 + $0x6b0] ss:$8 sps:$4 sm:$0xff]  }
  0xbc   :  { %1854 = vmatprep.subr.bf16.mxu0 %v2550_v5  ;;  %v2631_v5 = vld [vmem:[%s3474_s1 + $0x6a4] ss:$8 sps:$4 sm:$0xff]  }
  0xbd   :  { %1894 = vmatpush2.bf16.msra.mxu1 %v2545_v28  ;;  %v2632_v28 = vld [vmem:[%s3474_s1 + $0x790] ss:$8 sps:$4 sm:$0xff]  }
  0xbe   :  { %1895 = vmatprep.subr.bf16.mxu1 %v2553_v30  ;;  %v2629_v30 = vld [vmem:[%s3474_s1 + $0x6a0] ss:$8 sps:$4 sm:$0xff]  }
  0xbf   :  { %1855 = vmatpush2.bf16.msra.mxu0 %v2548_v31  ;;  %v2637_v31 = vld [vmem:[%s3474_s1 + $0x694] ss:$8 sps:$4 sm:$0xff]  }
  0xc0   :  { %1906 = vmatprep.subr.bf16.mxu0 %v2556_v33  ;;  %v2638_v33 = vld [vmem:[%s3474_s1 + $0x780] ss:$8 sps:$4 sm:$0xff]  }
  0xc1   :  { %1896 = vmatpush2.bf16.msra.mxu1 %v2551_v34  ;;  %v2635_v34 = vld [vmem:[%s3474_s1 + $0x690] ss:$8 sps:$4 sm:$0xff]  }
  0xc2   :  { %1857 = vmatmul.mubr.bf16.vlgmr.msra.gmra.mxu0 %v355_v32  ;;  %1947 = vmatprep.subr.bf16.mxu1 %v2562_v36  ;;  %v362_v32 = vrot.slane %v3252_v24, %v2798_v48  ;;  %v2641_v48 = vld [vmem:[%s3474_s1 + $0x680] ss:$8 sps:$4 sm:$0xff]   ;;  %v273_v24 = vsub.s32 0, %v2783_v42 }
  0xc3   :  { %1907 = vmatpush1.bf16.msra.mxu0 %v2554_v15  ;;  %1938 = vmatprep.mubr.bf16.mxu0 %v376_v35  ;;  %v2643_v35 = vld [vmem:[%s3474_s1 + $0x684] ss:$8 sps:$4 sm:$0xff]   ;;  %v269_v15 = vld [vmem:[%s3476_s2] sm:$0x3] }
  0xc4   :  { %1898 = vmatmul.mubr.bf16.vlgmr.msra.gmra.mxu1 %v377_v37  ;;  %1908 = vmatprep.subr.bf16.mxu0 %v2559_v38  ;;  %v378_v36 = vcombine.high %v362_v32, %v362_v32  ;;  %v277_v37 = vsub.s32 1, %v2783_v42  ;;  %v274_v38 = vrot.slane %v269_v15, %v273_v24 }
  0xc5   :  { %1948 = vmatpush1.bf16.msra.mxu1 %v2560_v39  ;;  %2261 = vmatprep.mubr.msk.bf16.mxu1 %vm1656_vm0, %v380_v40 }
  0xc6   :  { %1949 = vmatprep.subr.bf16.mxu1 %v2568_v41  ;;  %v278_v39 = vrot.slane %v269_v15, %v277_v37 }
  0xc7   :  { %1909 = vmatpush1.bf16.msra.mxu0 %v2557_v43 }
  0xc8   :  { %1910 = vmatprep.subr.bf16.mxu0 %v2565_v44 }
  0xc9   :  { %1950 = vmatpush1.bf16.msra.mxu1 %v2566_v45 }
  0xca   :  { %1951 = vmatprep.subr.bf16.mxu1 %v2574_v46 }
  0xcb   :  { %1911 = vmatpush1.bf16.msra.mxu0 %v2563_v47 }
  0xcc   :  { %1912 = vmatprep.subr.bf16.mxu0 %v2571_v49 }
  0xcd   :  { %1952 = vmatpush1.bf16.msra.mxu1 %v2572_v50 }
  0xce   :  { %1953 = vmatprep.subr.bf16.mxu1 %v2580_v51 }
  0xcf   :  { %1913 = vmatpush1.bf16.msra.mxu0 %v2569_v52 }
  0xd0   :  { %1914 = vmatprep.subr.bf16.mxu0 %v2577_v53 }
  0xd1   :  { %1954 = vmatpush1.bf16.msra.mxu1 %v2578_v54 }
  0xd2   :  { %1955 = vmatprep.subr.bf16.mxu1 %v2586_v55 }
  0xd3   :  { %1915 = vmatpush1.bf16.msra.mxu0 %v2575_v56 }
  0xd4   :  { %1916 = vmatprep.subr.bf16.mxu0 %v2583_v57 }
  0xd5   :  { %1956 = vmatpush1.bf16.msra.mxu1 %v2584_v58 }
  0xd6   :  { %1957 = vmatprep.subr.bf16.mxu1 %v2592_v59 }
  0xd7   :  { %1917 = vmatpush1.bf16.msra.mxu0 %v2581_v60 }
  0xd8   :  { %1918 = vmatprep.subr.bf16.mxu0 %v2589_v61 }
  0xd9   :  { %1958 = vmatpush1.bf16.msra.mxu1 %v2590_v62 }
  0xda   :  { %1959 = vmatprep.subr.bf16.mxu1 %v2598_v63 }
  0xdb   :  { %1919 = vmatpush1.bf16.msra.mxu0 %v2587_v0 }
  0xdc   :  { %1920 = vmatprep.subr.bf16.mxu0 %v2595_v1 }
  0xdd   :  { %1960 = vmatpush1.bf16.msra.mxu1 %v2596_v2 }
  0xde   :  { %1961 = vmatprep.subr.bf16.mxu1 %v2604_v3 }
  0xdf   :  { %1921 = vmatpush1.bf16.msra.mxu0 %v2593_v4 }
  0xe0   :  { %1922 = vmatprep.subr.bf16.mxu0 %v2601_v6 }
  0xe1   :  { %1962 = vmatpush1.bf16.msra.mxu1 %v2602_v7 }
  0xe2   :  { %1967 = vmatprep.subr.bf16.mxu1 %v2610_v8 }
  0xe3   :  { %1923 = vmatpush2.bf16.msra.mxu0 %v2599_v10 }
  0xe4   :  { %1924 = vmatprep.subr.bf16.mxu0 %v2607_v11 }
  0xe5   :  { %1968 = vmatpush2.bf16.msra.mxu1 %v2608_v12 }
  0xe6   :  { %1969 = vmatprep.subr.bf16.mxu1 %v2616_v13 }
  0xe7   :  { %1925 = vmatpush2.bf16.msra.mxu0 %v2605_v14 }
  0xe8   :  { %1926 = vmatprep.subr.bf16.mxu0 %v2613_v16 }
  0xe9   :  { %1970 = vmatpush2.bf16.msra.mxu1 %v2614_v17 }
  0xea   :  { %1971 = vmatprep.subr.bf16.mxu1 %v2622_v18  ;;  %v2645_v18 = vmov 1983009808  }
  0xeb   :  { %1927 = vmatpush2.bf16.msra.mxu0 %v2611_v19  ;;  %v1994_v19 = vunpack.c.l.s4 %v2645_v18 }
  0xec   :  { %1928 = vmatprep.subr.bf16.mxu0 %v2619_v20 }
  0xed   :  { %1972 = vmatpush2.bf16.msra.mxu1 %v2620_v21 }
  0xee   :  { %1973 = vmatprep.subr.bf16.mxu1 %v2628_v22 }
  0xef   :  { %1929 = vmatpush2.bf16.msra.mxu0 %v2617_v23 }
  0xf0   :  { %1930 = vmatprep.subr.bf16.mxu0 %v2625_v9 }
  0xf1   :  { %1974 = vmatpush2.bf16.msra.mxu1 %v2626_v25 }
  0xf2   :  { %1975 = vmatprep.subr.bf16.mxu1 %v2634_v26  ;;  %v1995_v26 = vunpack.c.0.s8 %v1994_v19 }
  0xf3   :  { %1931 = vmatpush2.bf16.msra.mxu0 %v2623_v27 }
  0xf4   :  { %1932 = vmatprep.subr.bf16.mxu0 %v2631_v5 }
  0xf5   :  { %1976 = vmatpush2.bf16.msra.mxu1 %v2632_v28 }
  0xf6   :  { %1977 = vmatprep.subr.bf16.mxu1 %v2640_v29 }
  0xf7   :  { %1933 = vmatpush2.bf16.msra.mxu0 %v2629_v30  ;;  %v1998_v30 = vsub.s32 %v1995_v26, %v2783_v42 }
  0xf8   :  { %1934 = vmatprep.subr.bf16.mxu0 %v2637_v31 }
  0xf9   :  { %1978 = vmatpush2.bf16.msra.mxu1 %v2638_v33 }
  0xfb   :  { %1935 = vmatpush2.bf16.msra.mxu0 %v2635_v34 }
  0xfc   :  { %1936 = vmatprep.subr.bf16.mxu0 %v2643_v35  ;;  %1980 = vmatmul.mubr.bf16.vlgmr.msra.gmra.mxu1 %v378_v36 }
  0xff   :  { %1937 = vmatpush2.bf16.msra.mxu0 %v2641_v48 }
 0x102   :  { %v1694_v40 = vpop.f32.mrf.mxu0  ;;  %1939 = vmatmul.mubr.bf16.vlgmr.msra.gmra.mxu0 %v362_v32 }
 0x103   :  { %v1695_v41 = vadd.f32 %v1694_v40, %v274_v38 }
 0x104   :  { %v1696_v43 = vpop.f32.mrf.mxu0  ;;  %v1735_v44 = vpop.f32.mrf.mxu1 }
 0x105   :  { %v1697_v45 = vadd.f32 %v1696_v43, %v278_v39  ;;  %v1736_v46 = vadd.f32 %v1735_v44, %v1695_v41 }
 0x106   :  { %v1698_v47 = vpop.f32.mrf.mxu0  ;;  %v1737_v49 = vpop.f32.mrf.mxu1 }
 0x107   :  { %v1738_v50 = vadd.f32 %v1737_v49, %v1697_v45 }
 0x108   :  { %v1699_v51 = vpop.f32.mrf.mxu0  ;;  %v1739_v52 = vpop.f32.mrf.mxu1 }
 0x10a   :  { %v1740_v53 = vpop.f32.mrf.mxu1 }
 0x142   :  { %v1776_v54 = vpop.f32.mrf.mxu0 }
 0x143   :  { %v1777_v55 = vadd.f32 %v1776_v54, %v1736_v46 }
 0x144   :  { %v1778_v56 = vpop.f32.mrf.mxu0  ;;  %v1817_v57 = vpop.f32.mrf.mxu1 }
 0x145   :  { %v1779_v58 = vadd.f32 %v1778_v56, %v1738_v50  ;;  %v1818_v59 = vadd.f32 %v1817_v57, %v1777_v55 }
 0x146   :  { %v1780_v60 = vpop.f32.mrf.mxu0  ;;  %v1819_v61 = vpop.f32.mrf.mxu1 }
 0x147   :  { %v1820_v62 = vadd.f32 %v1819_v61, %v1779_v58 }
 0x148   :  { %v1781_v63 = vpop.f32.mrf.mxu0  ;;  %v1821_v0 = vpop.f32.mrf.mxu1 }
 0x14a   :  { %v1822_v1 = vpop.f32.mrf.mxu1 }
 0x182   :  { %v1858_v2 = vpop.f32.mrf.mxu0 }
 0x183   :  { %v1859_v13 = vadd.f32 %v1858_v2, %v1818_v59 }
 0x184   :  { %v1860_v3 = vpop.f32.mrf.mxu0  ;;  %v1899_v4 = vpop.f32.mrf.mxu1 }
 0x185   :  { %v1861_v16 = vadd.f32 %v1860_v3, %v1820_v62  ;;  %v1900_v20 = vadd.f32 %v1899_v4, %v1859_v13 }
 0x186   :  { %v1862_v6 = vpop.f32.mrf.mxu0  ;;  %v1901_v7 = vpop.f32.mrf.mxu1 }
 0x187   :  { %v1902_v23 = vadd.f32 %v1901_v7, %v1861_v16 }
 0x188   :  { %v1863_v8 = vpop.f32.mrf.mxu0  ;;  %v1903_v10 = vpop.f32.mrf.mxu1 }
 0x18a   :  { %v1904_v11 = vpop.f32.mrf.mxu1 }
 0x1bc   :  { %v1981_v12 = vpop.f32.mrf.mxu1 }
 0x1be   :  { %v1983_v14 = vpop.f32.mrf.mxu1 }
 0x1c0   :  { %v1985_v17 = vpop.f32.mrf.mxu1 }
 0x1c2   :  { %v1940_v21 = vpop.f32.mrf.mxu0  ;;  %v1986_v22 = vpop.f32.mrf.mxu1 }
 0x1c3   :  { %v1941_v9 = vadd.f32 %v1940_v21, %v1900_v20 }
 0x1c4   :  { %v1942_v25 = vpop.f32.mrf.mxu0 }
 0x1c5   :  { %v1982_v27 = vadd.f32 %v1981_v12, %v1941_v9  ;;  %v1943_v5 = vadd.f32 %v1942_v25, %v1902_v23 }
 0x1c6   :  { %v1944_v28 = vpop.f32.mrf.mxu0 }
 0x1c7   :  { %v1984_v29 = vadd.f32 %v1983_v14, %v1943_v5  ;;  %v1988_v32 = vmax.f32 %v1982_v27, 0.0 }
 0x1c8   :  { %v1945_v31 = vpop.f32.mrf.mxu0 }
 0x1c9   :  { %v1989_v33 = vmax.f32 %v1984_v29, 0.0 }
 0x1cb   :  { %v1992_v34 = vcombine.low %v1988_v32, %v1989_v33 }
 0x1cd   :  { %v1999_v35 = vrot.slane %v1992_v34, %v1998_v30 }
 0x1cf   :  { %2004 = vst.msk [vmem:[%s3477_s3] sm:$0xf] %vm2003_vm3, %v1999_v35 }

// kernel: forward.42
= control target key start
LH: loop header
LB: loop body
LE: loop exit
PB: predicated region body
PF: predicated region fallthrough
CT: control target
= control target key end

     0   :  { %v46_v7 = vlaneseq  ;;  %v360_v8 = vmov 1966171168   ;;  %vm220_vm0 = vcmask 785408   ;;  %v361_v41 = vmov 1983009808   ;;  %s481_s1 = inlined_call_operand.vmem [shape: bf16[224,224], index: 1, kind: input, shape index: {}]   ;;  %s482_s0 = inlined_call_operand.vmem [shape: bf16[2,224], index: 0, kind: input, shape index: {}]   ;;  %s483_s2 = inlined_call_operand.vmem [shape: f32[1,224], index: 2, kind: input, shape index: {}]   ;;  %s484_s3 = inlined_call_operand.vmem [shape: f32[2,224], index: 3, kind: output, shape index: {}]  }
   0x1   :  { %v318_v0 = vld [vmem:[%s481_s1 + $0x74] ss:$8 sps:$4 sm:$0xff]   ;;  %v320_v1 = vld [vmem:[%s481_s1 + $0x70] ss:$8 sps:$4 sm:$0xff]   ;;  %v321_v2 = vld [vmem:[%s481_s1 + $0x64] ss:$8 sps:$4 sm:$0xff]   ;;  %v66_v9 = vunpack.c.l.s4 %v360_v8  ;;  %v271_v42 = vunpack.c.l.s4 %v361_v41 }
   0x2   :  { %224 = vmatprep.subr.bf16.mxu0 %v318_v0  ;;  %v323_v3 = vld [vmem:[%s481_s1 + $0x60] ss:$8 sps:$4 sm:$0xff]   ;;  %v324_v4 = vld [vmem:[%s481_s1 + $0x54] ss:$8 sps:$4 sm:$0xff]   ;;  %v326_v5 = vld [vmem:[%s481_s1 + $0x50] ss:$8 sps:$4 sm:$0xff]  }
   0x3   :  { %225 = vmatpush1.bf16.msra.mxu0 %v320_v1  ;;  %v327_v6 = vld [vmem:[%s481_s1 + $0x44] ss:$8 sps:$4 sm:$0xff]   ;;  %v329_v10 = vld [vmem:[%s481_s1 + $0x40] ss:$8 sps:$4 sm:$0xff]   ;;  %v330_v11 = vld [vmem:[%s481_s1 + $0x34] ss:$8 sps:$4 sm:$0xff]   ;;  %v67_v13 = vunpack.c.0.s8 %v66_v9  ;;  %v272_v46 = vunpack.c.0.s8 %v271_v42 }
   0x4   :  { %226 = vmatprep.subr.bf16.mxu0 %v321_v2  ;;  %v409_v12 = vshrl.u32 %v46_v7, 7  ;;  %v332_v14 = vld [vmem:[%s481_s1 + $0x30] ss:$8 sps:$4 sm:$0xff]   ;;  %v333_v15 = vld [vmem:[%s481_s1 + $0x24] ss:$8 sps:$4 sm:$0xff]   ;;  %vm278_vm1 = vcmask 1041408  }
   0x5   :  { %v335_v17 = vld [vmem:[%s481_s1 + $0x20] ss:$8 sps:$4 sm:$0xff]   ;;  %v336_v19 = vld [vmem:[%s481_s1 + $0x14] ss:$8 sps:$4 sm:$0xff]   ;;  %v338_v22 = vld [vmem:[%s481_s1 + $0x10] ss:$8 sps:$4 sm:$0xff]  }
   0x6   :  { %v70_v16 = vsub.s32 %v67_v13, %v409_v12  ;;  %v286_v18 = vld.sshfl [vmem:[%s482_s0] sm:$0x11 pattern:$0x75316420]  ;;  %v339_v23 = vld [vmem:[%s481_s1 + $0x4] ss:$8 sps:$4 sm:$0xff]   ;;  %v275_v50 = vsub.s32 %v272_v46, %v409_v12 }
   0x7   :  { %227 = vmatpush1.bf16.msra.mxu0 %v323_v3  ;;  %v64_v20 = vcombine.high %v286_v18, %v286_v18  ;;  %v341_v24 = vld [vmem:[%s481_s1] ss:$8 sps:$4 sm:$0xff]   ;;  %v342_v25 = vld [vmem:[%s481_s1 + $0xd4] ss:$8 sps:$4 sm:$0xff]   ;;  %v344_v26 = vld [vmem:[%s481_s1 + $0xd0] ss:$8 sps:$4 sm:$0xff]  }
   0x8   :  { %228 = vmatprep.subr.bf16.mxu0 %v324_v4  ;;  %v345_v27 = vld [vmem:[%s481_s1 + $0xc4] ss:$8 sps:$4 sm:$0xff]   ;;  %v347_v28 = vld [vmem:[%s481_s1 + $0xc0] ss:$8 sps:$4 sm:$0xff]   ;;  %v348_v29 = vld [vmem:[%s481_s1 + $0xb4] ss:$8 sps:$4 sm:$0xff]   ;;  %v71_v37 = vrot.slane %v286_v18, %v70_v16 }
   0x9   :  { %v78_v21 = vrot.slane %v64_v20, %v70_v16  ;;  %v350_v30 = vld [vmem:[%s481_s1 + $0xb0] ss:$8 sps:$4 sm:$0xff]   ;;  %v351_v31 = vld [vmem:[%s481_s1 + $0xa4] ss:$8 sps:$4 sm:$0xff]   ;;  %v353_v32 = vld [vmem:[%s481_s1 + $0xa0] ss:$8 sps:$4 sm:$0xff]  }
   0xa   :  { %v354_v33 = vld [vmem:[%s481_s1 + $0x94] ss:$8 sps:$4 sm:$0xff]   ;;  %v356_v34 = vld [vmem:[%s481_s1 + $0x90] ss:$8 sps:$4 sm:$0xff]   ;;  %v357_v35 = vld [vmem:[%s481_s1 + $0x84] ss:$8 sps:$4 sm:$0xff]  }
   0xb   :  { %229 = vmatpush1.bf16.msra.mxu0 %v326_v5  ;;  %315 = vmatprep.mubr.msk.bf16.mxu0 %vm220_vm0, %v78_v21  ;;  %v359_v36 = vld [vmem:[%s481_s1 + $0x80] ss:$8 sps:$4 sm:$0xff]   ;;  %v48_v38 = vsub.s32 0, %v409_v12  ;;  %v52_v40 = vsub.s32 1, %v409_v12  ;;  %vm279_vm2 = vcmask 781314  }
   0xc   :  { %230 = vmatprep.subr.bf16.mxu0 %v327_v6  ;;  %v44_v39 = vld [vmem:[%s483_s2] sm:$0x3]  ;;  %vm280_vm3 = vmor %vm279_vm2, %vm278_vm1 }
   0xd   :  { %v49_v43 = vrot.slane %v44_v39, %v48_v38  ;;  %v53_v44 = vrot.slane %v44_v39, %v52_v40 }
   0xf   :  { %231 = vmatpush1.bf16.msra.mxu0 %v329_v10 }
  0x10   :  { %232 = vmatprep.subr.bf16.mxu0 %v330_v11 }
  0x13   :  { %233 = vmatpush1.bf16.msra.mxu0 %v332_v14 }
  0x14   :  { %234 = vmatprep.subr.bf16.mxu0 %v333_v15 }
  0x17   :  { %235 = vmatpush1.bf16.msra.mxu0 %v335_v17 }
  0x18   :  { %236 = vmatprep.subr.bf16.mxu0 %v336_v19 }
  0x1b   :  { %237 = vmatpush1.bf16.msra.mxu0 %v338_v22 }
  0x1c   :  { %238 = vmatprep.subr.bf16.mxu0 %v339_v23 }
  0x1f   :  { %239 = vmatpush1.bf16.msra.mxu0 %v341_v24 }
  0x20   :  { %244 = vmatprep.subr.bf16.mxu0 %v342_v25 }
  0x23   :  { %245 = vmatpush2.bf16.msra.mxu0 %v344_v26 }
  0x24   :  { %246 = vmatprep.subr.bf16.mxu0 %v345_v27 }
  0x27   :  { %247 = vmatpush2.bf16.msra.mxu0 %v347_v28 }
  0x28   :  { %248 = vmatprep.subr.bf16.mxu0 %v348_v29 }
  0x2b   :  { %249 = vmatpush2.bf16.msra.mxu0 %v350_v30 }
  0x2c   :  { %250 = vmatprep.subr.bf16.mxu0 %v351_v31 }
  0x2f   :  { %251 = vmatpush2.bf16.msra.mxu0 %v353_v32 }
  0x30   :  { %252 = vmatprep.subr.bf16.mxu0 %v354_v33 }
  0x33   :  { %253 = vmatpush2.bf16.msra.mxu0 %v356_v34 }
  0x34   :  { %254 = vmatprep.subr.bf16.mxu0 %v357_v35 }
  0x37   :  { %255 = vmatpush2.bf16.msra.mxu0 %v359_v36 }
  0x3a   :  { %257 = vmatmul.mubr.bf16.vlgmr.msra.gmra.mxu0 %v71_v37 }
  0xfa   :  { %v258_v45 = vpop.f32.mrf.mxu0 }
  0xfb   :  { %v259_v47 = vadd.f32 %v258_v45, %v49_v43 }
  0xfc   :  { %v260_v48 = vpop.f32.mrf.mxu0 }
  0xfd   :  { %v261_v49 = vadd.f32 %v260_v48, %v53_v44  ;;  %v265_v52 = vmax.f32 %v259_v47, 0.0 }
  0xfe   :  { %v262_v51 = vpop.f32.mrf.mxu0 }
  0xff   :  { %v266_v53 = vmax.f32 %v261_v49, 0.0 }
 0x100   :  { %v263_v54 = vpop.f32.mrf.mxu0 }
 0x101   :  { %v269_v55 = vcombine.low %v265_v52, %v266_v53 }
 0x103   :  { %v276_v56 = vrot.slane %v269_v55, %v275_v50 }
 0x105   :  { %281 = vst.msk [vmem:[%s484_s3] sm:$0xf] %vm280_vm3, %v276_v56 }

// kernel: forward.44
= control target key start
LH: loop header
LB: loop body
LE: loop exit
PB: predicated region body
PF: predicated region fallthrough
CT: control target
= control target key end

     0   :  { %v49_v7 = vlaneseq  ;;  %v378_v8 = vmov 1966171168   ;;  %vm223_vm0 = vcmask 785408   ;;  %v379_v43 = vmov 1983009808   ;;  %s507_s1 = inlined_call_operand.vmem [shape: bf16[224,224], index: 1, kind: input, shape index: {}]   ;;  %s508_s0 = inlined_call_operand.vmem [shape: bf16[2,224], index: 0, kind: input, shape index: {}]   ;;  %s509_s2 = inlined_call_operand.vmem [shape: f32[1,224], index: 2, kind: input, shape index: {}]   ;;  %s510_s3 = inlined_call_operand.vmem [shape: f32[2,224], index: 3, kind: input, shape index: {}]   ;;  %s511_s4 = inlined_call_operand.vmem [shape: f32[2,224], index: 4, kind: output, shape index: {}]  }
   0x1   :  { %v336_v0 = vld [vmem:[%s507_s1 + $0x74] ss:$8 sps:$4 sm:$0xff]   ;;  %v338_v1 = vld [vmem:[%s507_s1 + $0x70] ss:$8 sps:$4 sm:$0xff]   ;;  %v339_v2 = vld [vmem:[%s507_s1 + $0x64] ss:$8 sps:$4 sm:$0xff]   ;;  %v69_v9 = vunpack.c.l.s4 %v378_v8  ;;  %v288_v44 = vunpack.c.l.s4 %v379_v43 }
   0x2   :  { %227 = vmatprep.subr.bf16.mxu0 %v336_v0  ;;  %v341_v3 = vld [vmem:[%s507_s1 + $0x60] ss:$8 sps:$4 sm:$0xff]   ;;  %v342_v4 = vld [vmem:[%s507_s1 + $0x54] ss:$8 sps:$4 sm:$0xff]   ;;  %v344_v5 = vld [vmem:[%s507_s1 + $0x50] ss:$8 sps:$4 sm:$0xff]  }
   0x3   :  { %228 = vmatpush1.bf16.msra.mxu0 %v338_v1  ;;  %v345_v6 = vld [vmem:[%s507_s1 + $0x44] ss:$8 sps:$4 sm:$0xff]   ;;  %v347_v10 = vld [vmem:[%s507_s1 + $0x40] ss:$8 sps:$4 sm:$0xff]   ;;  %v348_v11 = vld [vmem:[%s507_s1 + $0x34] ss:$8 sps:$4 sm:$0xff]   ;;  %v70_v13 = vunpack.c.0.s8 %v69_v9  ;;  %v289_v50 = vunpack.c.0.s8 %v288_v44 }
   0x4   :  { %229 = vmatprep.subr.bf16.mxu0 %v339_v2  ;;  %v432_v12 = vshrl.u32 %v49_v7, 7  ;;  %v350_v14 = vld [vmem:[%s507_s1 + $0x30] ss:$8 sps:$4 sm:$0xff]   ;;  %v351_v15 = vld [vmem:[%s507_s1 + $0x24] ss:$8 sps:$4 sm:$0xff]   ;;  %vm295_vm1 = vcmask 1041408  }
   0x5   :  { %v353_v17 = vld [vmem:[%s507_s1 + $0x20] ss:$8 sps:$4 sm:$0xff]   ;;  %v354_v19 = vld [vmem:[%s507_s1 + $0x14] ss:$8 sps:$4 sm:$0xff]   ;;  %v356_v22 = vld [vmem:[%s507_s1 + $0x10] ss:$8 sps:$4 sm:$0xff]  }
   0x6   :  { %v73_v16 = vsub.s32 %v70_v13, %v432_v12  ;;  %v303_v18 = vld.sshfl [vmem:[%s508_s0] sm:$0x11 pattern:$0x75316420]  ;;  %v357_v23 = vld [vmem:[%s507_s1 + $0x4] ss:$8 sps:$4 sm:$0xff]   ;;  %v292_v55 = vsub.s32 %v289_v50, %v432_v12 }
   0x7   :  { %230 = vmatpush1.bf16.msra.mxu0 %v341_v3  ;;  %v67_v20 = vcombine.high %v303_v18, %v303_v18  ;;  %v359_v24 = vld [vmem:[%s507_s1] ss:$8 sps:$4 sm:$0xff]   ;;  %v360_v25 = vld [vmem:[%s507_s1 + $0xd4] ss:$8 sps:$4 sm:$0xff]   ;;  %v362_v26 = vld [vmem:[%s507_s1 + $0xd0] ss:$8 sps:$4 sm:$0xff]  }
   0x8   :  { %231 = vmatprep.subr.bf16.mxu0 %v342_v4  ;;  %v363_v27 = vld [vmem:[%s507_s1 + $0xc4] ss:$8 sps:$4 sm:$0xff]   ;;  %v365_v28 = vld [vmem:[%s507_s1 + $0xc0] ss:$8 sps:$4 sm:$0xff]   ;;  %v366_v29 = vld [vmem:[%s507_s1 + $0xb4] ss:$8 sps:$4 sm:$0xff]   ;;  %v74_v37 = vrot.slane %v303_v18, %v73_v16 }
   0x9   :  { %v81_v21 = vrot.slane %v67_v20, %v73_v16  ;;  %v368_v30 = vld [vmem:[%s507_s1 + $0xb0] ss:$8 sps:$4 sm:$0xff]   ;;  %v369_v31 = vld [vmem:[%s507_s1 + $0xa4] ss:$8 sps:$4 sm:$0xff]   ;;  %v371_v32 = vld [vmem:[%s507_s1 + $0xa0] ss:$8 sps:$4 sm:$0xff]  }
   0xa   :  { %v372_v33 = vld [vmem:[%s507_s1 + $0x94] ss:$8 sps:$4 sm:$0xff]   ;;  %v374_v34 = vld [vmem:[%s507_s1 + $0x90] ss:$8 sps:$4 sm:$0xff]   ;;  %v375_v35 = vld [vmem:[%s507_s1 + $0x84] ss:$8 sps:$4 sm:$0xff]  }
   0xb   :  { %232 = vmatpush1.bf16.msra.mxu0 %v344_v5  ;;  %332 = vmatprep.mubr.msk.bf16.mxu0 %vm223_vm0, %v81_v21  ;;  %v377_v36 = vld [vmem:[%s507_s1 + $0x80] ss:$8 sps:$4 sm:$0xff]   ;;  %v51_v38 = vsub.s32 0, %v432_v12  ;;  %v55_v40 = vsub.s32 1, %v432_v12  ;;  %vm296_vm2 = vcmask 781314  }
   0xc   :  { %233 = vmatprep.subr.bf16.mxu0 %v345_v6  ;;  %v47_v39 = vld [vmem:[%s509_s2] sm:$0x3]  ;;  %vm297_vm3 = vmor %vm296_vm2, %vm295_vm1 }
   0xd   :  { %v52_v41 = vrot.slane %v47_v39, %v51_v38  ;;  %v333_v42 = vld.sshfl [vmem:[%s510_s3] sm:$0x33 pattern:$0x76325410]  ;;  %v56_v45 = vrot.slane %v47_v39, %v55_v40 }
   0xe   :  { %v277_v48 = vcombine.high %v333_v42, %v333_v42 }
   0xf   :  { %234 = vmatpush1.bf16.msra.mxu0 %v347_v10 }
  0x10   :  { %235 = vmatprep.subr.bf16.mxu0 %v348_v11 }
  0x13   :  { %236 = vmatpush1.bf16.msra.mxu0 %v350_v14 }
  0x14   :  { %237 = vmatprep.subr.bf16.mxu0 %v351_v15 }
  0x17   :  { %238 = vmatpush1.bf16.msra.mxu0 %v353_v17 }
  0x18   :  { %239 = vmatprep.subr.bf16.mxu0 %v354_v19 }
  0x1b   :  { %240 = vmatpush1.bf16.msra.mxu0 %v356_v22 }
  0x1c   :  { %241 = vmatprep.subr.bf16.mxu0 %v357_v23 }
  0x1f   :  { %242 = vmatpush1.bf16.msra.mxu0 %v359_v24 }
  0x20   :  { %247 = vmatprep.subr.bf16.mxu0 %v360_v25 }
  0x23   :  { %248 = vmatpush2.bf16.msra.mxu0 %v362_v26 }
  0x24   :  { %249 = vmatprep.subr.bf16.mxu0 %v363_v27 }
  0x27   :  { %250 = vmatpush2.bf16.msra.mxu0 %v365_v28 }
  0x28   :  { %251 = vmatprep.subr.bf16.mxu0 %v366_v29 }
  0x2b   :  { %252 = vmatpush2.bf16.msra.mxu0 %v368_v30 }
  0x2c   :  { %253 = vmatprep.subr.bf16.mxu0 %v369_v31 }
  0x2f   :  { %254 = vmatpush2.bf16.msra.mxu0 %v371_v32 }
  0x30   :  { %255 = vmatprep.subr.bf16.mxu0 %v372_v33 }
  0x33   :  { %256 = vmatpush2.bf16.msra.mxu0 %v374_v34 }
  0x34   :  { %257 = vmatprep.subr.bf16.mxu0 %v375_v35 }
  0x37   :  { %258 = vmatpush2.bf16.msra.mxu0 %v377_v36 }
  0x3a   :  { %260 = vmatmul.mubr.bf16.vlgmr.msra.gmra.mxu0 %v74_v37 }
  0xfa   :  { %v261_v46 = vpop.f32.mrf.mxu0 }
  0xfb   :  { %v262_v47 = vadd.f32 %v261_v46, %v52_v41 }
  0xfc   :  { %v263_v49 = vpop.f32.mrf.mxu0 }
  0xfd   :  { %v280_v51 = vadd.f32 %v333_v42, %v262_v47  ;;  %v264_v52 = vadd.f32 %v263_v49, %v56_v45 }
  0xfe   :  { %v265_v53 = vpop.f32.mrf.mxu0 }
  0xff   :  { %v281_v54 = vadd.f32 %v277_v48, %v264_v52  ;;  %v282_v57 = vmax.f32 %v280_v51, 0.0 }
 0x100   :  { %v266_v56 = vpop.f32.mrf.mxu0 }
 0x101   :  { %v283_v58 = vmax.f32 %v281_v54, 0.0 }
 0x103   :  { %v286_v59 = vcombine.low %v282_v57, %v283_v58 }
 0x105   :  { %v293_v60 = vrot.slane %v286_v59, %v292_v55 }
 0x107   :  { %298 = vst.msk [vmem:[%s511_s4] sm:$0xf] %vm297_vm3, %v293_v60 }

// kernel: forward.45
= control target key start
LH: loop header
LB: loop body
LE: loop exit
PB: predicated region body
PF: predicated region fallthrough
CT: control target
= control target key end

     0   :  { %v131_v29 = vlaneseq  ;;  %v1125_v30 = vmov 1966171168   ;;  %vm755_vm0 = vcmask 785408   ;;  %s1530_s0 = inlined_call_operand.vmem [shape: bf16[2,224], index: 0, kind: input, shape index: {}]   ;;  %s1531_s1 = inlined_call_operand.vmem [shape: bf16[224,1024], index: 1, kind: input, shape index: {}]   ;;  %s1532_s2 = inlined_call_operand.vmem [shape: f32[1,1024], index: 2, kind: input, shape index: {}]   ;;  %s1533_s3 = inlined_call_operand.hbm [shape: f32[2,1024], index: 3, kind: output, shape index: {}]  }
   0x1   :  { %v73_v0 = vld [vmem:[%s1531_s1 + $0x1c0] sm:$0xff]  ;;  %v74_v2 = vld [vmem:[%s1531_s1 + $0x1c8] sm:$0xff]  ;;  %v181_v31 = vunpack.c.l.s4 %v1125_v30 }
   0x2   :  { %v77_v1 = vld [vmem:[%s1531_s1 + $0x1e0] sm:$0xff]  ;;  %v78_v4 = vld [vmem:[%s1531_s1 + $0x1e8] sm:$0xff]  ;;  %v1208_v40 = vshrl.u32 %v131_v29, 7 }
   0x3   :  { %v1041_v3 = vcombine.high %v73_v0, %v77_v1  ;;  %v1040_v5 = vcombine.low %v73_v0, %v77_v1  ;;  %v65_v6 = vld [vmem:[%s1531_s1 + $0x180] sm:$0xff]  ;;  %v1043_v8 = vcombine.high %v74_v2, %v78_v4  ;;  %v1042_v9 = vcombine.low %v74_v2, %v78_v4  ;;  %v66_v11 = vld [vmem:[%s1531_s1 + $0x188] sm:$0xff] }
   0x4   :  { %v69_v7 = vld [vmem:[%s1531_s1 + $0x1a0] sm:$0xff]  ;;  %v70_v12 = vld [vmem:[%s1531_s1 + $0x1a8] sm:$0xff]  ;;  %v182_v41 = vunpack.c.0.s8 %v181_v31 }
   0x5   :  { %v1033_v10 = vcombine.high %v65_v6, %v69_v7  ;;  %v57_v13 = vld [vmem:[%s1531_s1 + $0x140] sm:$0xff]  ;;  %759 = vmatprep.subr.bf16.mxu0 %v1041_v3  ;;  %v1035_v14 = vcombine.high %v66_v11, %v70_v12  ;;  %v58_v16 = vld [vmem:[%s1531_s1 + $0x148] sm:$0xff]  ;;  %800 = vmatprep.subr.bf16.mxu1 %v1043_v8  ;;  %v1032_v18 = vcombine.low %v65_v6, %v69_v7 }
   0x6   :  { %v61_v15 = vld [vmem:[%s1531_s1 + $0x160] sm:$0xff]  ;;  %v62_v17 = vld [vmem:[%s1531_s1 + $0x168] sm:$0xff]  ;;  %760 = vmatpush1.bf16.msra.mxu0 %v1040_v5  ;;  %801 = vmatpush1.bf16.msra.mxu1 %v1042_v9  ;;  %v1034_v19 = vcombine.low %v66_v11, %v70_v12  ;;  %v1223_v50 = vsub.s32 %v182_v41, %v1208_v40 }
   0x7   :  { %761 = vmatprep.subr.bf16.mxu0 %v1033_v10  ;;  %v1025_v20 = vcombine.high %v57_v13, %v61_v15  ;;  %802 = vmatprep.subr.bf16.mxu1 %v1035_v14  ;;  %v1027_v21 = vcombine.high %v58_v16, %v62_v17  ;;  %v49_v22 = vld [vmem:[%s1531_s1 + $0x100] sm:$0xff]  ;;  %v50_v24 = vld [vmem:[%s1531_s1 + $0x108] sm:$0xff]  ;;  %v1024_v26 = vcombine.low %v57_v13, %v61_v15 }
   0x8   :  { %v53_v23 = vld [vmem:[%s1531_s1 + $0x120] sm:$0xff]  ;;  %v54_v25 = vld [vmem:[%s1531_s1 + $0x128] sm:$0xff]  ;;  %v1026_v27 = vcombine.low %v58_v16, %v62_v17 }
   0x9   :  { %v1017_v28 = vcombine.high %v49_v22, %v53_v23  ;;  %v1019_v32 = vcombine.high %v50_v24, %v54_v25  ;;  %v41_v33 = vld [vmem:[%s1531_s1 + $0xc0] sm:$0xff]  ;;  %v42_v35 = vld [vmem:[%s1531_s1 + $0xc8] sm:$0xff]  ;;  %v1016_v37 = vcombine.low %v49_v22, %v53_v23  ;;  %v1018_v38 = vcombine.low %v50_v24, %v54_v25 }
   0xa   :  { %762 = vmatpush1.bf16.msra.mxu0 %v1032_v18  ;;  %803 = vmatpush1.bf16.msra.mxu1 %v1034_v19  ;;  %v45_v34 = vld [vmem:[%s1531_s1 + $0xe0] sm:$0xff]  ;;  %v46_v36 = vld [vmem:[%s1531_s1 + $0xe8] sm:$0xff] }
   0xb   :  { %763 = vmatprep.subr.bf16.mxu0 %v1025_v20  ;;  %804 = vmatprep.subr.bf16.mxu1 %v1027_v21  ;;  %v1009_v39 = vcombine.high %v41_v33, %v45_v34  ;;  %v1011_v42 = vcombine.high %v42_v35, %v46_v36  ;;  %v33_v43 = vld [vmem:[%s1531_s1 + $0x80] sm:$0xff]  ;;  %v34_v45 = vld [vmem:[%s1531_s1 + $0x88] sm:$0xff]  ;;  %v1008_v47 = vcombine.low %v41_v33, %v45_v34 }
   0xc   :  { %v37_v44 = vld [vmem:[%s1531_s1 + $0xa0] sm:$0xff]  ;;  %v38_v46 = vld [vmem:[%s1531_s1 + $0xa8] sm:$0xff]  ;;  %v1010_v48 = vcombine.low %v42_v35, %v46_v36 }
   0xd   :  { %v1001_v49 = vcombine.high %v33_v43, %v37_v44  ;;  %v1003_v51 = vcombine.high %v34_v45, %v38_v46  ;;  %v25_v52 = vld [vmem:[%s1531_s1 + $0x40] sm:$0xff]  ;;  %v26_v55 = vld [vmem:[%s1531_s1 + $0x48] sm:$0xff]  ;;  %v1000_v58 = vcombine.low %v33_v43, %v37_v44  ;;  %v1002_v59 = vcombine.low %v34_v45, %v38_v46 }
   0xe   :  { %764 = vmatpush1.bf16.msra.mxu0 %v1024_v26  ;;  %805 = vmatpush1.bf16.msra.mxu1 %v1026_v27  ;;  %v29_v53 = vld [vmem:[%s1531_s1 + $0x60] sm:$0xff]  ;;  %v30_v56 = vld [vmem:[%s1531_s1 + $0x68] sm:$0xff] }
   0xf   :  { %765 = vmatprep.subr.bf16.mxu0 %v1017_v28  ;;  %806 = vmatprep.subr.bf16.mxu1 %v1019_v32  ;;  %v1234_v54 = vld.sshfl [vmem:[%s1530_s0] sm:$0x11 pattern:$0x75316420]  ;;  %v993_v60 = vcombine.high %v25_v52, %v29_v53  ;;  %v995_v62 = vcombine.high %v26_v55, %v30_v56  ;;  %v18_v1 = vld [vmem:[%s1531_s1 + $0x8] sm:$0xff]  ;;  %v992_v3 = vcombine.low %v25_v52, %v29_v53 }
  0x10   :  { %v179_v57 = vcombine.high %v1234_v54, %v1234_v54  ;;  %v17_v63 = vld [vmem:[%s1531_s1] sm:$0xff]  ;;  %v22_v2 = vld [vmem:[%s1531_s1 + $0x28] sm:$0xff]  ;;  %v994_v4 = vcombine.low %v26_v55, %v30_v56 }
  0x11   :  { %v21_v0 = vld [vmem:[%s1531_s1 + $0x20] sm:$0xff]  ;;  %v987_v6 = vcombine.high %v18_v1, %v22_v2  ;;  %v122_v9 = vld [vmem:[%s1531_s1 + $0x348] sm:$0xff]  ;;  %v986_v12 = vcombine.low %v18_v1, %v22_v2 }
  0x12   :  { %766 = vmatpush1.bf16.msra.mxu0 %v1016_v37  ;;  %807 = vmatpush1.bf16.msra.mxu1 %v1018_v38  ;;  %v1245_v61 = vrot.slane %v179_v57, %v1223_v50  ;;  %v985_v5 = vcombine.high %v17_v63, %v21_v0  ;;  %v121_v7 = vld [vmem:[%s1531_s1 + $0x340] sm:$0xff]  ;;  %v126_v10 = vld [vmem:[%s1531_s1 + $0x368] sm:$0xff]  ;;  %v984_v11 = vcombine.low %v17_v63, %v21_v0 }
  0x13   :  { %767 = vmatprep.subr.bf16.mxu0 %v1009_v39  ;;  %808 = vmatprep.subr.bf16.mxu1 %v1011_v42  ;;  %v125_v8 = vld [vmem:[%s1531_s1 + $0x360] sm:$0xff]  ;;  %v1091_v14 = vcombine.high %v122_v9, %v126_v10  ;;  %v114_v17 = vld [vmem:[%s1531_s1 + $0x308] sm:$0xff]  ;;  %v1090_v20 = vcombine.low %v122_v9, %v126_v10 }
  0x14   :  { %1096 = vmatprep.mubr.msk.bf16.mxu0 %vm755_vm0, %v1245_v61  ;;  %1097 = vmatprep.mubr.msk.bf16.mxu1 %vm755_vm0, %v1245_v61  ;;  %v1089_v13 = vcombine.high %v121_v7, %v125_v8  ;;  %v113_v15 = vld [vmem:[%s1531_s1 + $0x300] sm:$0xff]  ;;  %v118_v18 = vld [vmem:[%s1531_s1 + $0x328] sm:$0xff]  ;;  %v1088_v19 = vcombine.low %v121_v7, %v125_v8 }
  0x15   :  { %v117_v16 = vld [vmem:[%s1531_s1 + $0x320] sm:$0xff]  ;;  %v1083_v22 = vcombine.high %v114_v17, %v118_v18  ;;  %v106_v25 = vld [vmem:[%s1531_s1 + $0x2c8] sm:$0xff]  ;;  %v1082_v28 = vcombine.low %v114_v17, %v118_v18 }
  0x16   :  { %768 = vmatpush1.bf16.msra.mxu0 %v1008_v47  ;;  %809 = vmatpush1.bf16.msra.mxu1 %v1010_v48  ;;  %v1081_v21 = vcombine.high %v113_v15, %v117_v16  ;;  %v105_v23 = vld [vmem:[%s1531_s1 + $0x2c0] sm:$0xff]  ;;  %v110_v26 = vld [vmem:[%s1531_s1 + $0x2e8] sm:$0xff]  ;;  %v1080_v27 = vcombine.low %v113_v15, %v117_v16 }
  0x17   :  { %769 = vmatprep.subr.bf16.mxu0 %v1001_v49  ;;  %810 = vmatprep.subr.bf16.mxu1 %v1003_v51  ;;  %v109_v24 = vld [vmem:[%s1531_s1 + $0x2e0] sm:$0xff]  ;;  %v1075_v30 = vcombine.high %v106_v25, %v110_v26 }
  0x18   :  { %v1073_v29 = vcombine.high %v105_v23, %v109_v24  ;;  %v97_v31 = vld [vmem:[%s1531_s1 + $0x280] sm:$0xff] }
  0x19   :  { %v101_v32 = vld [vmem:[%s1531_s1 + $0x2a0] sm:$0xff] }
  0x1a   :  { %770 = vmatpush1.bf16.msra.mxu0 %v1000_v58  ;;  %811 = vmatpush1.bf16.msra.mxu1 %v1002_v59 }
  0x1b   :  { %771 = vmatprep.subr.bf16.mxu0 %v993_v60  ;;  %812 = vmatprep.subr.bf16.mxu1 %v995_v62 }
  0x1e   :  { %772 = vmatpush1.bf16.msra.mxu0 %v992_v3  ;;  %813 = vmatpush1.bf16.msra.mxu1 %v994_v4 }
  0x1f   :  { %773 = vmatprep.subr.bf16.mxu0 %v985_v5  ;;  %814 = vmatprep.subr.bf16.mxu1 %v987_v6 }
  0x22   :  { %774 = vmatpush1.bf16.msra.mxu0 %v984_v11  ;;  %815 = vmatpush1.bf16.msra.mxu1 %v986_v12 }
  0x23   :  { %779 = vmatprep.subr.bf16.mxu0 %v1089_v13  ;;  %820 = vmatprep.subr.bf16.mxu1 %v1091_v14 }
  0x26   :  { %780 = vmatpush2.bf16.msra.mxu0 %v1088_v19  ;;  %821 = vmatpush2.bf16.msra.mxu1 %v1090_v20 }
  0x27   :  { %781 = vmatprep.subr.bf16.mxu0 %v1081_v21  ;;  %822 = vmatprep.subr.bf16.mxu1 %v1083_v22 }
  0x28   :  { %8 = vsyncpa [#allocation3], 0  ;;  %v98_v33 = vld [vmem:[%s1531_s1 + $0x288] sm:$0xff]  ;;  %v1072_v35 = vcombine.low %v105_v23, %v109_v24  ;;  %v1074_v36 = vcombine.low %v106_v25, %v110_v26  ;;  %v1065_v37 = vcombine.high %v97_v31, %v101_v32  ;;  %v89_v39 = vld [vmem:[%s1531_s1 + $0x240] sm:$0xff]  ;;  %v1064_v44 = vcombine.low %v97_v31, %v101_v32 }
  0x29   :  { %v102_v34 = vld [vmem:[%s1531_s1 + $0x2a8] sm:$0xff]  ;;  %v93_v41 = vld [vmem:[%s1531_s1 + $0x260] sm:$0xff]  ;;  %v75_v58 = vld [vmem:[%s1531_s1 + $0x1d0] sm:$0xff]  ;;  %v1355_v5 = vrot.slane %v1234_v54, %v1223_v50 }
  0x2a   :  { %782 = vmatpush2.bf16.msra.mxu0 %v1080_v27  ;;  %823 = vmatpush2.bf16.msra.mxu1 %v1082_v28  ;;  %v1067_v38 = vcombine.high %v98_v33, %v102_v34  ;;  %v90_v42 = vld [vmem:[%s1531_s1 + $0x248] sm:$0xff]  ;;  %v1066_v45 = vcombine.low %v98_v33, %v102_v34  ;;  %v1057_v46 = vcombine.high %v89_v39, %v93_v41  ;;  %v81_v48 = vld [vmem:[%s1531_s1 + $0x200] sm:$0xff]  ;;  %v79_v59 = vld [vmem:[%s1531_s1 + $0x1f0] sm:$0xff] }
  0x2b   :  { %783 = vmatprep.subr.bf16.mxu0 %v1073_v29  ;;  %824 = vmatprep.subr.bf16.mxu1 %v1075_v30  ;;  %v94_v43 = vld [vmem:[%s1531_s1 + $0x268] sm:$0xff]  ;;  %v85_v49 = vld [vmem:[%s1531_s1 + $0x220] sm:$0xff]  ;;  %v1056_v53 = vcombine.low %v89_v39, %v93_v41  ;;  %v76_v60 = vld [vmem:[%s1531_s1 + $0x1d8] sm:$0xff]  ;;  %v1045_v1 = vcombine.high %v75_v58, %v79_v59  ;;  %v1044_v8 = vcombine.low %v75_v58, %v79_v59 }
  0x2c   :  { %v1059_v47 = vcombine.high %v90_v42, %v94_v43  ;;  %v82_v51 = vld [vmem:[%s1531_s1 + $0x208] sm:$0xff]  ;;  %v1058_v55 = vcombine.low %v90_v42, %v94_v43  ;;  %v1049_v56 = vcombine.high %v81_v48, %v85_v49  ;;  %v80_v62 = vld [vmem:[%s1531_s1 + $0x1f8] sm:$0xff]  ;;  %v1048_v63 = vcombine.low %v81_v48, %v85_v49  ;;  %v67_v3 = vld [vmem:[%s1531_s1 + $0x190] sm:$0xff] }
  0x2d   :  { %v86_v52 = vld [vmem:[%s1531_s1 + $0x228] sm:$0xff]  ;;  %v1047_v2 = vcombine.high %v76_v60, %v80_v62  ;;  %v71_v4 = vld [vmem:[%s1531_s1 + $0x1b0] sm:$0xff]  ;;  %v68_v6 = vld [vmem:[%s1531_s1 + $0x198] sm:$0xff]  ;;  %v1046_v9 = vcombine.low %v76_v60, %v80_v62 }
  0x2e   :  { %784 = vmatpush2.bf16.msra.mxu0 %v1072_v35  ;;  %825 = vmatpush2.bf16.msra.mxu1 %v1074_v36  ;;  %v1051_v57 = vcombine.high %v82_v51, %v86_v52  ;;  %v1050_v0 = vcombine.low %v82_v51, %v86_v52  ;;  %v72_v7 = vld [vmem:[%s1531_s1 + $0x1b8] sm:$0xff]  ;;  %v1037_v10 = vcombine.high %v67_v3, %v71_v4  ;;  %v59_v50 = vld [vmem:[%s1531_s1 + $0x150] sm:$0xff] }
  0x2f   :  { %785 = vmatprep.subr.bf16.mxu0 %v1065_v37  ;;  %826 = vmatprep.subr.bf16.mxu1 %v1067_v38  ;;  %v1039_v11 = vcombine.high %v68_v6, %v72_v7  ;;  %v63_v54 = vld [vmem:[%s1531_s1 + $0x170] sm:$0xff]  ;;  %v60_v12 = vld [vmem:[%s1531_s1 + $0x158] sm:$0xff]  ;;  %v1036_v14 = vcombine.low %v67_v3, %v71_v4  ;;  %v1038_v15 = vcombine.low %v68_v6, %v72_v7 }
  0x30   :  { %v64_v13 = vld [vmem:[%s1531_s1 + $0x178] sm:$0xff]  ;;  %v1029_v16 = vcombine.high %v59_v50, %v63_v54  ;;  %v51_v18 = vld [vmem:[%s1531_s1 + $0x110] sm:$0xff]  ;;  %v1028_v22 = vcombine.low %v59_v50, %v63_v54 }
  0x31   :  { %v1031_v17 = vcombine.high %v60_v12, %v64_v13  ;;  %v55_v19 = vld [vmem:[%s1531_s1 + $0x130] sm:$0xff]  ;;  %v52_v20 = vld [vmem:[%s1531_s1 + $0x118] sm:$0xff]  ;;  %v1030_v23 = vcombine.low %v60_v12, %v64_v13 }
  0x32   :  { %786 = vmatpush2.bf16.msra.mxu0 %v1064_v44  ;;  %827 = vmatpush2.bf16.msra.mxu1 %v1066_v45  ;;  %v56_v21 = vld [vmem:[%s1531_s1 + $0x138] sm:$0xff]  ;;  %v1021_v24 = vcombine.high %v51_v18, %v55_v19  ;;  %v43_v26 = vld [vmem:[%s1531_s1 + $0xd0] sm:$0xff]  ;;  %v1020_v29 = vcombine.low %v51_v18, %v55_v19 }
  0x33   :  { %787 = vmatprep.subr.bf16.mxu0 %v1057_v46  ;;  %828 = vmatprep.subr.bf16.mxu1 %v1059_v47  ;;  %v1023_v25 = vcombine.high %v52_v20, %v56_v21  ;;  %v47_v27 = vld [vmem:[%s1531_s1 + $0xf0] sm:$0xff]  ;;  %v48_v28 = vld [vmem:[%s1531_s1 + $0xf8] sm:$0xff]  ;;  %v1022_v30 = vcombine.low %v52_v20, %v56_v21 }
  0x34   :  { %v1013_v31 = vcombine.high %v43_v26, %v47_v27  ;;  %v35_v33 = vld [vmem:[%s1531_s1 + $0x90] sm:$0xff]  ;;  %v36_v35 = vld [vmem:[%s1531_s1 + $0x98] sm:$0xff]  ;;  %v1012_v37 = vcombine.low %v43_v26, %v47_v27 }
  0x35   :  { %v39_v34 = vld [vmem:[%s1531_s1 + $0xb0] sm:$0xff]  ;;  %v40_v36 = vld [vmem:[%s1531_s1 + $0xb8] sm:$0xff] }
  0x36   :  { %788 = vmatpush2.bf16.msra.mxu0 %v1056_v53  ;;  %829 = vmatpush2.bf16.msra.mxu1 %v1058_v55  ;;  %v1005_v39 = vcombine.high %v35_v33, %v39_v34  ;;  %v1007_v41 = vcombine.high %v36_v35, %v40_v36  ;;  %v27_v42 = vld [vmem:[%s1531_s1 + $0x50] sm:$0xff]  ;;  %v28_v44 = vld [vmem:[%s1531_s1 + $0x58] sm:$0xff]  ;;  %v1004_v46 = vcombine.low %v35_v33, %v39_v34 }
  0x37   :  { %789 = vmatprep.subr.bf16.mxu0 %v1049_v56  ;;  %830 = vmatprep.subr.bf16.mxu1 %v1051_v57  ;;  %v31_v43 = vld [vmem:[%s1531_s1 + $0x70] sm:$0xff]  ;;  %v32_v45 = vld [vmem:[%s1531_s1 + $0x78] sm:$0xff]  ;;  %v1006_v47 = vcombine.low %v36_v35, %v40_v36 }
  0x38   :  { %v997_v48 = vcombine.high %v27_v42, %v31_v43  ;;  %v999_v49 = vcombine.high %v28_v44, %v32_v45  ;;  %v19_v51 = vld [vmem:[%s1531_s1 + $0x10] sm:$0xff]  ;;  %v20_v53 = vld [vmem:[%s1531_s1 + $0x18] sm:$0xff]  ;;  %v996_v56 = vcombine.low %v27_v42, %v31_v43  ;;  %v998_v57 = vcombine.low %v28_v44, %v32_v45 }
  0x39   :  { %v23_v52 = vld [vmem:[%s1531_s1 + $0x30] sm:$0xff]  ;;  %v24_v55 = vld [vmem:[%s1531_s1 + $0x38] sm:$0xff] }
  0x3a   :  { %790 = vmatpush2.bf16.msra.mxu0 %v1048_v63  ;;  %831 = vmatpush2.bf16.msra.mxu1 %v1050_v0  ;;  %v989_v58 = vcombine.high %v19_v51, %v23_v52  ;;  %v991_v59 = vcombine.high %v20_v53, %v24_v55  ;;  %v123_v60 = vld [vmem:[%s1531_s1 + $0x350] sm:$0xff]  ;;  %v124_v63 = vld [vmem:[%s1531_s1 + $0x358] sm:$0xff] }
  0x3b   :  { %841 = vmatprep.subr.bf16.mxu0 %v1045_v1  ;;  %882 = vmatprep.subr.bf16.mxu1 %v1047_v2  ;;  %v127_v62 = vld [vmem:[%s1531_s1 + $0x370] sm:$0xff]  ;;  %v128_v0 = vld [vmem:[%s1531_s1 + $0x378] sm:$0xff]  ;;  %v988_v1 = vcombine.low %v19_v51, %v23_v52  ;;  %v990_v2 = vcombine.low %v20_v53, %v24_v55  ;;  %v1126_v51 = vmov 1983009808   ;;  %v145_v53 = vsub.s32 3, %v1208_v40 }
  0x3c   :  { %v1093_v3 = vcombine.high %v123_v60, %v127_v62  ;;  %v1095_v4 = vcombine.high %v124_v63, %v128_v0  ;;  %v115_v6 = vld [vmem:[%s1531_s1 + $0x310] sm:$0xff]  ;;  %v934_v52 = vunpack.c.l.s4 %v1126_v51 }
  0x3d   :  { %792 = vmatmul.mubr.bf16.vlgmr.msra.gmra.mxu0 %v1355_v5  ;;  %833 = vmatmul.mubr.bf16.vlgmr.msra.gmra.mxu1 %v1355_v5  ;;  %v119_v7 = vld [vmem:[%s1531_s1 + $0x330] sm:$0xff] }
  0x3e   :  { %842 = vmatpush1.bf16.msra.mxu0 %v1044_v8  ;;  %883 = vmatpush1.bf16.msra.mxu1 %v1046_v9  ;;  %v116_v8 = vld [vmem:[%s1531_s1 + $0x318] sm:$0xff]  ;;  %v1085_v50 = vcombine.high %v115_v6, %v119_v7  ;;  %v107_v12 = vld [vmem:[%s1531_s1 + $0x2d0] sm:$0xff] }
  0x3f   :  { %843 = vmatprep.subr.bf16.mxu0 %v1037_v10  ;;  %884 = vmatprep.subr.bf16.mxu1 %v1039_v11  ;;  %v120_v9 = vld [vmem:[%s1531_s1 + $0x338] sm:$0xff]  ;;  %v1092_v10 = vcombine.low %v123_v60, %v127_v62  ;;  %v1094_v11 = vcombine.low %v124_v63, %v128_v0  ;;  %v111_v13 = vld [vmem:[%s1531_s1 + $0x2f0] sm:$0xff] }
  0x40   :  { %1098 = vmatprep.mubr.msk.bf16.mxu0 %vm755_vm0, %v1245_v61  ;;  %1099 = vmatprep.mubr.msk.bf16.mxu1 %vm755_vm0, %v1245_v61  ;;  %v44_v61 = vld [vmem:[%s1531_s1 + $0xd8] sm:$0xff]  ;;  %v1087_v54 = vcombine.high %v116_v8, %v120_v9  ;;  %v1077_v18 = vcombine.high %v107_v12, %v111_v13  ;;  %v99_v20 = vld [vmem:[%s1531_s1 + $0x290] sm:$0xff] }
  0x41   :  { %v1015_v32 = vcombine.high %v44_v61, %v48_v28  ;;  %v1014_v38 = vcombine.low %v44_v61, %v48_v28  ;;  %v103_v21 = vld [vmem:[%s1531_s1 + $0x2b0] sm:$0xff] }
  0x42   :  { %844 = vmatpush1.bf16.msra.mxu0 %v1036_v14  ;;  %885 = vmatpush1.bf16.msra.mxu1 %v1038_v15  ;;  %v108_v14 = vld [vmem:[%s1531_s1 + $0x2d8] sm:$0xff]  ;;  %v1069_v26 = vcombine.high %v99_v20, %v103_v21  ;;  %v91_v61 = vld [vmem:[%s1531_s1 + $0x250] sm:$0xff] }
  0x43   :  { %845 = vmatprep.subr.bf16.mxu0 %v1029_v16  ;;  %886 = vmatprep.subr.bf16.mxu1 %v1031_v17  ;;  %v112_v15 = vld [vmem:[%s1531_s1 + $0x2f8] sm:$0xff]  ;;  %v1084_v16 = vcombine.low %v115_v6, %v119_v7  ;;  %v1086_v17 = vcombine.low %v116_v8, %v120_v9  ;;  %v95_v28 = vld [vmem:[%s1531_s1 + $0x270] sm:$0xff] }
  0x44   :  { %v1079_v19 = vcombine.high %v108_v14, %v112_v15  ;;  %v1061_v33 = vcombine.high %v91_v61, %v95_v28  ;;  %v83_v35 = vld [vmem:[%s1531_s1 + $0x210] sm:$0xff] }
  0x45   :  { %v87_v36 = vld [vmem:[%s1531_s1 + $0x230] sm:$0xff] }
  0x46   :  { %846 = vmatpush1.bf16.msra.mxu0 %v1028_v22  ;;  %887 = vmatpush1.bf16.msra.mxu1 %v1030_v23  ;;  %v100_v22 = vld [vmem:[%s1531_s1 + $0x298] sm:$0xff]  ;;  %v1053_v42 = vcombine.high %v83_v35, %v87_v36  ;;  %v1052_v44 = vcombine.low %v83_v35, %v87_v36 }
  0x47   :  { %847 = vmatprep.subr.bf16.mxu0 %v1021_v24  ;;  %888 = vmatprep.subr.bf16.mxu1 %v1023_v25  ;;  %v104_v23 = vld [vmem:[%s1531_s1 + $0x2b8] sm:$0xff]  ;;  %v1076_v24 = vcombine.low %v107_v12, %v111_v13  ;;  %v1078_v25 = vcombine.low %v108_v14, %v112_v15  ;;  %v149_v13 = vsub.s32 4, %v1208_v40  ;;  %v153_v14 = vsub.s32 5, %v1208_v40 }
  0x48   :  { %v1071_v27 = vcombine.high %v100_v22, %v104_v23  ;;  %v157_v15 = vsub.s32 6, %v1208_v40 }
  0x4a   :  { %848 = vmatpush1.bf16.msra.mxu0 %v1020_v29  ;;  %889 = vmatpush1.bf16.msra.mxu1 %v1022_v30  ;;  %v92_v29 = vld [vmem:[%s1531_s1 + $0x258] sm:$0xff] }
  0x4b   :  { %849 = vmatprep.subr.bf16.mxu0 %v1013_v31  ;;  %890 = vmatprep.subr.bf16.mxu1 %v1015_v32  ;;  %v96_v30 = vld [vmem:[%s1531_s1 + $0x278] sm:$0xff]  ;;  %v1068_v31 = vcombine.low %v99_v20, %v103_v21  ;;  %v1070_v32 = vcombine.low %v100_v22, %v104_v23 }
  0x4c   :  { %v1063_v34 = vcombine.high %v92_v29, %v96_v30 }
  0x4e   :  { %850 = vmatpush1.bf16.msra.mxu0 %v1012_v37  ;;  %891 = vmatpush1.bf16.msra.mxu1 %v1014_v38  ;;  %v84_v37 = vld [vmem:[%s1531_s1 + $0x218] sm:$0xff] }
  0x4f   :  { %851 = vmatprep.subr.bf16.mxu0 %v1005_v39  ;;  %892 = vmatprep.subr.bf16.mxu1 %v1007_v41  ;;  %v88_v38 = vld [vmem:[%s1531_s1 + $0x238] sm:$0xff]  ;;  %v1060_v39 = vcombine.low %v91_v61, %v95_v28  ;;  %v1062_v41 = vcombine.low %v92_v29, %v96_v30 }
  0x50   :  { %v1055_v43 = vcombine.high %v84_v37, %v88_v38  ;;  %v1054_v45 = vcombine.low %v84_v37, %v88_v38 }
  0x52   :  { %852 = vmatpush1.bf16.msra.mxu0 %v1004_v46  ;;  %893 = vmatpush1.bf16.msra.mxu1 %v1006_v47  ;;  %v133_v46 = vsub.s32 0, %v1208_v40  ;;  %v129_v47 = vld [vmem:[%s1532_s2] sm:$0xff]  ;;  %s1127_s2 = smov [#allocation2]  }
  0x53   :  { %853 = vmatprep.subr.bf16.mxu0 %v997_v48  ;;  %894 = vmatprep.subr.bf16.mxu1 %v999_v49  ;;  %v141_v48 = vsub.s32 2, %v1208_v40  ;;  %v137_v49 = vsub.s32 1, %v1208_v40  ;;  %v158_v20 = vrot.slane %v129_v47, %v157_v15  ;;  %s975_s16 = sshll.u32 %s1127_s2, 4  ;;  %s976_s16 = int_to_ptr.vmem [resolvable:$true] %s975_s16 }
  0x54   :  { %v134_v55 = vrot.slane %v129_v47, %v133_v46  ;;  %s1103_s17 = scalar_lea.vmem %s976_s16, 256  ;;  %p1108_p1 = scmp.lt.s32.totalorder %s976_s16, %s976_s16 }
  0x55   :  { %p1104_p0 = scmp.ne.s32.totalorder %s976_s16, %s1103_s17  ;;  %p1109_p2 = scmp.lt.s32.totalorder %s1103_s17, %s1103_s17 }
  0x56   :  { %854 = vmatpush1.bf16.msra.mxu0 %v996_v56  ;;  %895 = vmatpush1.bf16.msra.mxu1 %v998_v57  ;;  %v142_v56 = vrot.slane %v129_v47, %v141_v48  ;;  %v138_v57 = vrot.slane %v129_v47, %v137_v49 }
  0x57   :  { %855 = vmatprep.subr.bf16.mxu0 %v989_v58  ;;  %896 = vmatprep.subr.bf16.mxu1 %v991_v59  ;;  %v935_v58 = vunpack.c.0.s8 %v934_v52  ;;  %p1110_p3 = por %p1109_p2, %p1108_p1 }
  0x59   :  { %p1111_p4 = pnand %p1110_p3, %p1104_p0 }
  0x5a   :  { %856 = vmatpush1.bf16.msra.mxu0 %v988_v1  ;;  %897 = vmatpush1.bf16.msra.mxu1 %v990_v2  ;;  %v938_v2 = vsub.s32 %v935_v58, %v1208_v40 }
  0x5b   :  { %861 = vmatprep.subr.bf16.mxu0 %v1093_v3  ;;  %902 = vmatprep.subr.bf16.mxu1 %v1095_v4 }
  0x5e   :  { %862 = vmatpush2.bf16.msra.mxu0 %v1092_v10  ;;  %903 = vmatpush2.bf16.msra.mxu1 %v1094_v11 }
  0x5f   :  { %863 = vmatprep.subr.bf16.mxu0 %v1085_v50  ;;  %904 = vmatprep.subr.bf16.mxu1 %v1087_v54 }
  0x62   :  { %864 = vmatpush2.bf16.msra.mxu0 %v1084_v16  ;;  %905 = vmatpush2.bf16.msra.mxu1 %v1086_v17  ;;  %v161_v16 = vsub.s32 7, %v1208_v40  ;;  %v150_v17 = vrot.slane %v129_v47, %v149_v13 }
  0x63   :  { %865 = vmatprep.subr.bf16.mxu0 %v1077_v18  ;;  %906 = vmatprep.subr.bf16.mxu1 %v1079_v19  ;;  %v154_v18 = vrot.slane %v129_v47, %v153_v14 }
  0x64   :  { %v162_v21 = vrot.slane %v129_v47, %v161_v16 }
  0x66   :  { %866 = vmatpush2.bf16.msra.mxu0 %v1076_v24  ;;  %907 = vmatpush2.bf16.msra.mxu1 %v1078_v25 }
  0x67   :  { %867 = vmatprep.subr.bf16.mxu0 %v1069_v26  ;;  %908 = vmatprep.subr.bf16.mxu1 %v1071_v27 }
  0x6a   :  { %868 = vmatpush2.bf16.msra.mxu0 %v1068_v31  ;;  %909 = vmatpush2.bf16.msra.mxu1 %v1070_v32 }
  0x6b   :  { %869 = vmatprep.subr.bf16.mxu0 %v1061_v33  ;;  %910 = vmatprep.subr.bf16.mxu1 %v1063_v34 }
  0x6e   :  { %870 = vmatpush2.bf16.msra.mxu0 %v1060_v39  ;;  %911 = vmatpush2.bf16.msra.mxu1 %v1062_v41 }
  0x6f   :  { %871 = vmatprep.subr.bf16.mxu0 %v1053_v42  ;;  %912 = vmatprep.subr.bf16.mxu1 %v1055_v43 }
  0x72   :  { %872 = vmatpush2.bf16.msra.mxu0 %v1052_v44  ;;  %913 = vmatpush2.bf16.msra.mxu1 %v1054_v45 }
  0x75   :  { %874 = vmatmul.mubr.bf16.vlgmr.msra.gmra.mxu0 %v1355_v5  ;;  %915 = vmatmul.mubr.bf16.vlgmr.msra.gmra.mxu1 %v1355_v5  ;;  %v146_v5 = vrot.slane %v129_v47, %v145_v53 }
  0xfd   :  { %v793_v59 = vpop.f32.mrf.mxu0  ;;  %v834_v62 = vpop.f32.mrf.mxu1 }
  0xfe   :  { %v794_v60 = vadd.f32 %v793_v59, %v134_v55  ;;  %v835_v63 = vadd.f32 %v834_v62, %v142_v56 }
  0xff   :  { %v795_v0 = vpop.f32.mrf.mxu0  ;;  %v836_v3 = vpop.f32.mrf.mxu1 }
 0x100   :  { %v796_v1 = vadd.f32 %v795_v0, %v138_v57  ;;  %v837_v4 = vadd.f32 %v836_v3, %v146_v5 }
 0x101   :  { %v797_v6 = vpop.f32.mrf.mxu0  ;;  %v838_v8 = vpop.f32.mrf.mxu1 }
 0x102   :  { %v931_v7 = vcombine.low %v794_v60, %v796_v1  ;;  %v932_v9 = vcombine.low %v835_v63, %v837_v4 }
 0x103   :  { %v798_v10 = vpop.f32.mrf.mxu0  ;;  %v839_v50 = vpop.f32.mrf.mxu1 }
 0x104   :  { %v939_v11 = vrot.slane %v931_v7, %v938_v2  ;;  %v946_v54 = vrot.slane %v932_v9, %v938_v2 }
 0x106   :  { %v947_v12 = vcombine.low %v939_v11, %v946_v54 }
 0x108   :  { %967 = vst [vmem:[#allocation2] sm:$0xff] %v947_v12 }
 0x135   :  { %v875_v19 = vpop.f32.mrf.mxu0  ;;  %v916_v22 = vpop.f32.mrf.mxu1 }
 0x136   :  { %v876_v24 = vadd.f32 %v875_v19, %v150_v17  ;;  %v917_v27 = vadd.f32 %v916_v22, %v158_v20 }
 0x137   :  { %v877_v23 = vpop.f32.mrf.mxu0  ;;  %v918_v26 = vpop.f32.mrf.mxu1 }
 0x138   :  { %v878_v25 = vadd.f32 %v877_v23, %v154_v18  ;;  %v919_v61 = vadd.f32 %v918_v26, %v162_v21 }
 0x139   :  { %v879_v28 = vpop.f32.mrf.mxu0  ;;  %v920_v30 = vpop.f32.mrf.mxu1 }
 0x13a   :  { %v948_v29 = vcombine.low %v876_v24, %v878_v25  ;;  %v949_v31 = vcombine.low %v917_v27, %v919_v61 }
 0x13b   :  { %v880_v32 = vpop.f32.mrf.mxu0  ;;  %v921_v34 = vpop.f32.mrf.mxu1 }
 0x13c   :  { %v956_v33 = vrot.slane %v948_v29, %v938_v2  ;;  %v963_v40 = vrot.slane %v949_v31, %v938_v2 }
 0x13e   :  { %v964_v35 = vcombine.low %v956_v33, %v963_v40 }
 0x140   :  { %968 = vst [vmem:[#allocation2 + $0x8] sm:$0xff] %v964_v35 }
 0x141   :  { %1114 = shalt.err (!%p1111_p4)
}
 0x142   :  { %978 = dma.vmem_to_hbm [thread:$0]  %s976_s16, 256, %s1533_s3, [#allocation3]  }
 0x143   :  { %1123 = dma.done.wait [#allocation3], 256  }
 0x144   :  { %1124 = vsyncadd [#allocation3], 4294967040 }
 0x145   :  { %982 = vsyncpa [#allocation3], 1 }

</bundles_post_ra>
